<compile_context>
chip_gen: v7x
topology: tpu7x:2x2x1
jax: 0.10.0
libtpu: 0.0.40
codegen_flags: <defaults>
</compile_context>

<pallas_src>
import jax
import jax.numpy as jnp
from jax.experimental import pallas as pl
from jax.experimental.pallas import tpu as pltpu

EPS = 1e-5
NEG_SLOPE = 0.4

# Layer widths of the PyTorch module (encoder then decoder).
DIMS = [773, 600, 400, 200, 100, 200, 400, 600, 773]
N_LAYERS = len(DIMS) - 1


def _round_up(n, m):
    return ((n + m - 1) // m) * m


# Output (lane) feature dims padded to 128 -> lane-dense matmul cols & stores.
OUT_PAD = [_round_up(d, 128) for d in DIMS[1:]]   # [640,512,256,128,256,512,640,896]
# Input (sublane / contraction-row) dims only need packing granularity.
# Only layer 0's 773 is de-padded: 773 -> 784 (multiple of 16 for bf16 rows).
IN_PAD = [_round_up(DIMS[0], 16)] + OUT_PAD[:-1]  # [784,640,512,256,128,256,512,640]

BN_COLS = max(OUT_PAD)  # 896 — width of the packed gamma/beta table


def _ae_fused_kernel(x_ref, bn_ref, *rest):
    """Fully fused 8-layer AE forward with manual, overlapped weight DMA.

    rest = (w_hbm_0..7, o_ref, w_vmem_0..7, dma_sems)
    """
    w_hbm = rest[0:N_LAYERS]
    o_ref = rest[N_LAYERS]
    w_vmem = rest[N_LAYERS + 1 : 2 * N_LAYERS + 1]
    sem = rest[2 * N_LAYERS + 1]

    # Issue every layer's weight DMA immediately; compute on layer i overlaps
    # with the HBM stream of layers i+1..  (total bf16 weights < 4.2 MiB).
    copies = []
    for i in range(N_LAYERS):
        cp = pltpu.make_async_copy(w_hbm[i], w_vmem[i], sem.at[i])
        cp.start()
        copies.append(cp)

    h = x_ref[...]  # f32 (B, 784), zero-padded beyond column 773

    for i in range(N_LAYERS):
        dout = OUT_PAD[i]
        copies[i].wait()
        w = w_vmem[i][...]  # bf16 (din_p, dout_p), zero-padded rows/cols

        # Linear (bias omitted: cancelled exactly by training-mode BN below).
        y = jnp.dot(h.astype(jnp.bfloat16), w,
                    preferred_element_type=jnp.float32)

        # BatchNorm1d, training mode: batch stats over axis 0, biased var.
        mean = jnp.mean(y, axis=0, keepdims=True)
        centered = y - mean
        var = jnp.mean(centered * centered, axis=0, keepdims=True)
        gamma = bn_ref[2 * i : 2 * i + 1, :dout]
        beta = bn_ref[2 * i + 1 : 2 * i + 2, :dout]
        z = gamma * (centered * jax.lax.rsqrt(var + EPS)) + beta

        if i == N_LAYERS - 1:
            h = jax.nn.sigmoid(z)
        else:
            h = jnp.where(z >= 0.0, z, NEG_SLOPE * z)

    o_ref[...] = h.astype(o_ref.dtype)


def _build_pallas_forward(batch):
    in_specs = [
        pl.BlockSpec((batch, IN_PAD[0]), lambda: (0, 0)),       # x (VMEM, auto DMA)
        pl.BlockSpec((2 * N_LAYERS, BN_COLS), lambda: (0, 0)),  # packed gamma/beta
    ]
    # Weights stay in HBM; the kernel streams them manually (overlapped DMA).
    in_specs += [pl.BlockSpec(memory_space=pl.ANY)] * N_LAYERS

    scratch_shapes = [
        pltpu.VMEM((IN_PAD[i], OUT_PAD[i]), jnp.bfloat16) for i in range(N_LAYERS)
    ]
    scratch_shapes.append(pltpu.SemaphoreType.DMA((N_LAYERS,)))

    return pl.pallas_call(
        _ae_fused_kernel,
        out_shape=jax.ShapeDtypeStruct((batch, OUT_PAD[-1]), jnp.float32),
        in_specs=in_specs,
        out_specs=pl.BlockSpec((batch, OUT_PAD[-1]), lambda: (0, 0)),
        scratch_shapes=scratch_shapes,
        compiler_params=pltpu.CompilerParams(
            # ~4.2 MiB bf16 weight scratch + <0.5 MiB activations/params/IO
            # buffers; 16 MiB leaves headroom on every chip (incl. v7x 64 MiB/TC).
            vmem_limit_bytes=16 * 1024 * 1024,
        ),
    )


@jax.jit
def ae_forward(x, weights_bf16, bn_packed):
    """Full AE forward in a single fused, DMA-overlapped Pallas kernel."""
    batch, d_in = x.shape
    x_pad = jnp.pad(x.astype(jnp.float32), ((0, 0), (0, IN_PAD[0] - d_in)))
    out_pad = _build_pallas_forward(batch)(x_pad, bn_packed, *weights_bf16)
    return out_pad[:, : DIMS[-1]]


def init_params(key):
    """Deterministic parameter init (PyTorch-default-like uniform ranges)."""
    params = []
    for din, dout in zip(DIMS[:-1], DIMS[1:]):
        key, kw, kg, kb = jax.random.split(key, 4)
        bound = 1.0 / (din ** 0.5)
        w = jax.random.uniform(kw, (din, dout), jnp.float32, -bound, bound)
        gamma = 1.0 + 0.1 * jax.random.normal(kg, (dout,), jnp.float32)
        beta = 0.05 * jax.random.normal(kb, (dout,), jnp.float32)
        params.append((w, gamma, beta))
    return params


def pack_params(params):
    """bf16 zero-padded weight arrays (one per layer, streamed from HBM) and a
    single packed (16, 896) f32 gamma/beta table (one DMA instead of 16)."""
    weights = []
    bn = jnp.zeros((2 * N_LAYERS, BN_COLS), jnp.float32)
    for i, (w, gamma, beta) in enumerate(params):
        din, dout = w.shape
        w_p = jnp.zeros((IN_PAD[i], OUT_PAD[i]), jnp.float32).at[:din, :dout].set(w)
        weights.append(w_p.astype(jnp.bfloat16))
        bn = bn.at[2 * i, :dout].set(gamma)
        bn = bn.at[2 * i + 1, :dout].set(beta)
    return weights, bn


def _reference_forward(x, params):
    """Pure-JAX reference using the SAME bf16 weight quantization as the
    kernel, so the tolerance check measures kernel fidelity (not bf16 loss)."""
    h = x.astype(jnp.float32)
    for i, (w, gamma, beta) in enumerate(params):
        y = jnp.dot(h.astype(jnp.bfloat16), w.astype(jnp.bfloat16),
                    preferred_element_type=jnp.float32)
        mean = jnp.mean(y, axis=0, keepdims=True)
        centered = y - mean
        var = jnp.mean(centered * centered, axis=0, keepdims=True)
        z = gamma[None, :] * (centered * jax.lax.rsqrt(var + EPS)) + beta[None, :]
        if i == N_LAYERS - 1:
            h = jax.nn.sigmoid(z)
        else:
            h = jnp.where(z >= 0.0, z, NEG_SLOPE * z)
    return h


if __name__ == "__main__":
    key = jax.random.PRNGKey(0)
    kx, kp = jax.random.split(key)

    B = 8  # BatchNorm1d training mode needs B > 1
    x = jax.random.uniform(kx, (B, DIMS[0]), jnp.float32)

    params = init_params(kp)
    weights_bf16, bn_packed = pack_params(params)

    out = jax.block_until_ready(ae_forward(x, weights_bf16, bn_packed))
    ref = jax.block_until_ready(_reference_forward(x, params))

    assert out.shape == (B, DIMS[-1]), out.shape
    assert bool(jnp.all(jnp.isfinite(out)))
    err = float(jnp.max(jnp.abs(out - ref)))
    # Reference uses identical bf16 weights/casts, so only accumulation-order
    # differences remain; 3e-3 is ample headroom post-sigmoid.
    assert err < 3e-3, f"mismatch vs reference: {err}"

    print("KERNEL_OK")
</pallas_src>

<mosaic_0001>
module attributes {stable_mosaic.version = 11 : i64} {
  func.func @_ae_fused_kernel(%arg0: memref<8x784xf32, #tpu.memory_space<vmem>>, %arg1: memref<16x896xf32, #tpu.memory_space<vmem>>, %arg2: memref<784x640xbf16, #tpu.memory_space<any>>, %arg3: memref<640x512xbf16, #tpu.memory_space<any>>, %arg4: memref<512x256xbf16, #tpu.memory_space<any>>, %arg5: memref<256x128xbf16, #tpu.memory_space<any>>, %arg6: memref<128x256xbf16, #tpu.memory_space<any>>, %arg7: memref<256x512xbf16, #tpu.memory_space<any>>, %arg8: memref<512x640xbf16, #tpu.memory_space<any>>, %arg9: memref<640x896xbf16, #tpu.memory_space<any>>, %arg10: memref<8x896xf32, #tpu.memory_space<vmem>>, %arg11: memref<784x640xbf16, #tpu.memory_space<vmem>>, %arg12: memref<640x512xbf16, #tpu.memory_space<vmem>>, %arg13: memref<512x256xbf16, #tpu.memory_space<vmem>>, %arg14: memref<256x128xbf16, #tpu.memory_space<vmem>>, %arg15: memref<128x256xbf16, #tpu.memory_space<vmem>>, %arg16: memref<256x512xbf16, #tpu.memory_space<vmem>>, %arg17: memref<512x640xbf16, #tpu.memory_space<vmem>>, %arg18: memref<640x896xbf16, #tpu.memory_space<vmem>>, %arg19: memref<8x!tpu.dma_semaphore, #tpu.memory_space<semaphore_mem>>) attributes {dimension_semantics = [], scalar_prefetch = 0 : i64, scratch_operands = 9 : i64, tpu.core_type = #tpu.core_type<tc>} {
    %c0_i32 = arith.constant 0 : i32
    %0 = tpu.memref_slice %arg19[%c0_i32] : memref<8x!tpu.dma_semaphore, #tpu.memory_space<semaphore_mem>> -> memref<1x!tpu.dma_semaphore, #tpu.memory_space<semaphore_mem>>
    %1 = tpu.memref_squeeze %0 : memref<1x!tpu.dma_semaphore, #tpu.memory_space<semaphore_mem>> -> memref<!tpu.dma_semaphore, #tpu.memory_space<semaphore_mem>>
    tpu.enqueue_dma source(%arg2 : memref<784x640xbf16, #tpu.memory_space<any>>) target(%arg11 : memref<784x640xbf16, #tpu.memory_space<vmem>>) target_semaphore(%1 : memref<!tpu.dma_semaphore, #tpu.memory_space<semaphore_mem>>)
    %c1_i32 = arith.constant 1 : i32
    %2 = tpu.memref_slice %arg19[%c1_i32] : memref<8x!tpu.dma_semaphore, #tpu.memory_space<semaphore_mem>> -> memref<1x!tpu.dma_semaphore, #tpu.memory_space<semaphore_mem>>
    %3 = tpu.memref_squeeze %2 : memref<1x!tpu.dma_semaphore, #tpu.memory_space<semaphore_mem>> -> memref<!tpu.dma_semaphore, #tpu.memory_space<semaphore_mem>>
    tpu.enqueue_dma source(%arg3 : memref<640x512xbf16, #tpu.memory_space<any>>) target(%arg12 : memref<640x512xbf16, #tpu.memory_space<vmem>>) target_semaphore(%3 : memref<!tpu.dma_semaphore, #tpu.memory_space<semaphore_mem>>)
    %c2_i32 = arith.constant 2 : i32
    %4 = tpu.memref_slice %arg19[%c2_i32] : memref<8x!tpu.dma_semaphore, #tpu.memory_space<semaphore_mem>> -> memref<1x!tpu.dma_semaphore, #tpu.memory_space<semaphore_mem>>
    %5 = tpu.memref_squeeze %4 : memref<1x!tpu.dma_semaphore, #tpu.memory_space<semaphore_mem>> -> memref<!tpu.dma_semaphore, #tpu.memory_space<semaphore_mem>>
    tpu.enqueue_dma source(%arg4 : memref<512x256xbf16, #tpu.memory_space<any>>) target(%arg13 : memref<512x256xbf16, #tpu.memory_space<vmem>>) target_semaphore(%5 : memref<!tpu.dma_semaphore, #tpu.memory_space<semaphore_mem>>)
    %c3_i32 = arith.constant 3 : i32
    %6 = tpu.memref_slice %arg19[%c3_i32] : memref<8x!tpu.dma_semaphore, #tpu.memory_space<semaphore_mem>> -> memref<1x!tpu.dma_semaphore, #tpu.memory_space<semaphore_mem>>
    %7 = tpu.memref_squeeze %6 : memref<1x!tpu.dma_semaphore, #tpu.memory_space<semaphore_mem>> -> memref<!tpu.dma_semaphore, #tpu.memory_space<semaphore_mem>>
    tpu.enqueue_dma source(%arg5 : memref<256x128xbf16, #tpu.memory_space<any>>) target(%arg14 : memref<256x128xbf16, #tpu.memory_space<vmem>>) target_semaphore(%7 : memref<!tpu.dma_semaphore, #tpu.memory_space<semaphore_mem>>)
    %c4_i32 = arith.constant 4 : i32
    %8 = tpu.memref_slice %arg19[%c4_i32] : memref<8x!tpu.dma_semaphore, #tpu.memory_space<semaphore_mem>> -> memref<1x!tpu.dma_semaphore, #tpu.memory_space<semaphore_mem>>
    %9 = tpu.memref_squeeze %8 : memref<1x!tpu.dma_semaphore, #tpu.memory_space<semaphore_mem>> -> memref<!tpu.dma_semaphore, #tpu.memory_space<semaphore_mem>>
    tpu.enqueue_dma source(%arg6 : memref<128x256xbf16, #tpu.memory_space<any>>) target(%arg15 : memref<128x256xbf16, #tpu.memory_space<vmem>>) target_semaphore(%9 : memref<!tpu.dma_semaphore, #tpu.memory_space<semaphore_mem>>)
    %c5_i32 = arith.constant 5 : i32
    %10 = tpu.memref_slice %arg19[%c5_i32] : memref<8x!tpu.dma_semaphore, #tpu.memory_space<semaphore_mem>> -> memref<1x!tpu.dma_semaphore, #tpu.memory_space<semaphore_mem>>
    %11 = tpu.memref_squeeze %10 : memref<1x!tpu.dma_semaphore, #tpu.memory_space<semaphore_mem>> -> memref<!tpu.dma_semaphore, #tpu.memory_space<semaphore_mem>>
    tpu.enqueue_dma source(%arg7 : memref<256x512xbf16, #tpu.memory_space<any>>) target(%arg16 : memref<256x512xbf16, #tpu.memory_space<vmem>>) target_semaphore(%11 : memref<!tpu.dma_semaphore, #tpu.memory_space<semaphore_mem>>)
    %c6_i32 = arith.constant 6 : i32
    %12 = tpu.memref_slice %arg19[%c6_i32] : memref<8x!tpu.dma_semaphore, #tpu.memory_space<semaphore_mem>> -> memref<1x!tpu.dma_semaphore, #tpu.memory_space<semaphore_mem>>
    %13 = tpu.memref_squeeze %12 : memref<1x!tpu.dma_semaphore, #tpu.memory_space<semaphore_mem>> -> memref<!tpu.dma_semaphore, #tpu.memory_space<semaphore_mem>>
    tpu.enqueue_dma source(%arg8 : memref<512x640xbf16, #tpu.memory_space<any>>) target(%arg17 : memref<512x640xbf16, #tpu.memory_space<vmem>>) target_semaphore(%13 : memref<!tpu.dma_semaphore, #tpu.memory_space<semaphore_mem>>)
    %c7_i32 = arith.constant 7 : i32
    %14 = tpu.memref_slice %arg19[%c7_i32] : memref<8x!tpu.dma_semaphore, #tpu.memory_space<semaphore_mem>> -> memref<1x!tpu.dma_semaphore, #tpu.memory_space<semaphore_mem>>
    %15 = tpu.memref_squeeze %14 : memref<1x!tpu.dma_semaphore, #tpu.memory_space<semaphore_mem>> -> memref<!tpu.dma_semaphore, #tpu.memory_space<semaphore_mem>>
    tpu.enqueue_dma source(%arg9 : memref<640x896xbf16, #tpu.memory_space<any>>) target(%arg18 : memref<640x896xbf16, #tpu.memory_space<vmem>>) target_semaphore(%15 : memref<!tpu.dma_semaphore, #tpu.memory_space<semaphore_mem>>)
    %c0 = arith.constant 0 : index
    %c0_0 = arith.constant 0 : index
    %16 = vector.load %arg0[%c0, %c0_0] : memref<8x784xf32, #tpu.memory_space<vmem>>, vector<8x784xf32>
    %c0_i32_1 = arith.constant 0 : i32
    %17 = tpu.memref_slice %arg19[%c0_i32_1] : memref<8x!tpu.dma_semaphore, #tpu.memory_space<semaphore_mem>> -> memref<1x!tpu.dma_semaphore, #tpu.memory_space<semaphore_mem>>
    %18 = tpu.memref_squeeze %17 : memref<1x!tpu.dma_semaphore, #tpu.memory_space<semaphore_mem>> -> memref<!tpu.dma_semaphore, #tpu.memory_space<semaphore_mem>>
    tpu.wait_dma2 semaphore(%18 : memref<!tpu.dma_semaphore, #tpu.memory_space<semaphore_mem>>) src(%arg2 : memref<784x640xbf16, #tpu.memory_space<any>>) dst(%arg11 : memref<784x640xbf16, #tpu.memory_space<vmem>>)
    %c0_2 = arith.constant 0 : index
    %c0_3 = arith.constant 0 : index
    %19 = vector.load %arg11[%c0_2, %c0_3] : memref<784x640xbf16, #tpu.memory_space<vmem>>, vector<784x640xbf16>
    %20 = arith.truncf %16 : vector<8x784xf32> to vector<8x784xbf16>
    %cst = arith.constant dense<0.000000e+00> : vector<8x640xf32>
    %21 = tpu.matmul %20, %19, %cst {dimension_numbers = #tpu.dot_dimension_numbers<[1], [0], [0], [1], [0, 0, 1, 1], [], []>} : vector<8x784xbf16>, vector<784x640xbf16>, vector<8x640xf32> -> vector<8x640xf32>
    %cst_4 = arith.constant dense<0.000000e+00> : vector<640xf32>
    %22 = vector.multi_reduction <add>, %21, %cst_4 [0] : vector<8x640xf32> to vector<640xf32>
    %23 = vector.shape_cast %22 : vector<640xf32> to vector<1x640xf32>
    %cst_5 = arith.constant 8.000000e+00 : f32
    %24 = vector.broadcast %cst_5 : f32 to vector<1x640xf32>
    %25 = arith.divf %23, %24 : vector<1x640xf32>
    %26 = vector.broadcast %25 : vector<1x640xf32> to vector<8x640xf32>
    %27 = arith.subf %21, %26 : vector<8x640xf32>
    %28 = arith.mulf %27, %27 : vector<8x640xf32>
    %cst_6 = arith.constant dense<0.000000e+00> : vector<640xf32>
    %29 = vector.multi_reduction <add>, %28, %cst_6 [0] : vector<8x640xf32> to vector<640xf32>
    %30 = vector.shape_cast %29 : vector<640xf32> to vector<1x640xf32>
    %cst_7 = arith.constant 8.000000e+00 : f32
    %31 = vector.broadcast %cst_7 : f32 to vector<1x640xf32>
    %32 = arith.divf %30, %31 : vector<1x640xf32>
    %c0_8 = arith.constant 0 : index
    %c0_9 = arith.constant 0 : index
    %33 = vector.load %arg1[%c0_8, %c0_9] : memref<16x896xf32, #tpu.memory_space<vmem>>, vector<1x640xf32>
    %c1 = arith.constant 1 : index
    %c0_10 = arith.constant 0 : index
    %34 = vector.load %arg1[%c1, %c0_10] : memref<16x896xf32, #tpu.memory_space<vmem>>, vector<1x640xf32>
    %cst_11 = arith.constant 9.99999974E-6 : f32
    %35 = vector.broadcast %cst_11 : f32 to vector<1x640xf32>
    %36 = arith.addf %32, %35 : vector<1x640xf32>
    %37 = math.rsqrt %36 : vector<1x640xf32>
    %38 = vector.broadcast %37 : vector<1x640xf32> to vector<8x640xf32>
    %39 = arith.mulf %27, %38 : vector<8x640xf32>
    %40 = vector.broadcast %33 : vector<1x640xf32> to vector<8x640xf32>
    %41 = arith.mulf %40, %39 : vector<8x640xf32>
    %42 = vector.broadcast %34 : vector<1x640xf32> to vector<8x640xf32>
    %43 = arith.addf %41, %42 : vector<8x640xf32>
    %cst_12 = arith.constant 0.000000e+00 : f32
    %44 = vector.broadcast %cst_12 : f32 to vector<8x640xf32>
    %45 = arith.cmpf oge, %43, %44 : vector<8x640xf32>
    %cst_13 = arith.constant 4.000000e-01 : f32
    %46 = vector.broadcast %cst_13 : f32 to vector<8x640xf32>
    %47 = arith.mulf %46, %43 : vector<8x640xf32>
    %48 = arith.select %45, %43, %47 : vector<8x640xi1>, vector<8x640xf32>
    %c1_i32_14 = arith.constant 1 : i32
    %49 = tpu.memref_slice %arg19[%c1_i32_14] : memref<8x!tpu.dma_semaphore, #tpu.memory_space<semaphore_mem>> -> memref<1x!tpu.dma_semaphore, #tpu.memory_space<semaphore_mem>>
    %50 = tpu.memref_squeeze %49 : memref<1x!tpu.dma_semaphore, #tpu.memory_space<semaphore_mem>> -> memref<!tpu.dma_semaphore, #tpu.memory_space<semaphore_mem>>
    tpu.wait_dma2 semaphore(%50 : memref<!tpu.dma_semaphore, #tpu.memory_space<semaphore_mem>>) src(%arg3 : memref<640x512xbf16, #tpu.memory_space<any>>) dst(%arg12 : memref<640x512xbf16, #tpu.memory_space<vmem>>)
    %c0_15 = arith.constant 0 : index
    %c0_16 = arith.constant 0 : index
    %51 = vector.load %arg12[%c0_15, %c0_16] : memref<640x512xbf16, #tpu.memory_space<vmem>>, vector<640x512xbf16>
    %52 = arith.truncf %48 : vector<8x640xf32> to vector<8x640xbf16>
    %cst_17 = arith.constant dense<0.000000e+00> : vector<8x512xf32>
    %53 = tpu.matmul %52, %51, %cst_17 {dimension_numbers = #tpu.dot_dimension_numbers<[1], [0], [0], [1], [0, 0, 1, 1], [], []>} : vector<8x640xbf16>, vector<640x512xbf16>, vector<8x512xf32> -> vector<8x512xf32>
    %cst_18 = arith.constant dense<0.000000e+00> : vector<512xf32>
    %54 = vector.multi_reduction <add>, %53, %cst_18 [0] : vector<8x512xf32> to vector<512xf32>
    %55 = vector.shape_cast %54 : vector<512xf32> to vector<1x512xf32>
    %cst_19 = arith.constant 8.000000e+00 : f32
    %56 = vector.broadcast %cst_19 : f32 to vector<1x512xf32>
    %57 = arith.divf %55, %56 : vector<1x512xf32>
    %58 = vector.broadcast %57 : vector<1x512xf32> to vector<8x512xf32>
    %59 = arith.subf %53, %58 : vector<8x512xf32>
    %60 = arith.mulf %59, %59 : vector<8x512xf32>
    %cst_20 = arith.constant dense<0.000000e+00> : vector<512xf32>
    %61 = vector.multi_reduction <add>, %60, %cst_20 [0] : vector<8x512xf32> to vector<512xf32>
    %62 = vector.shape_cast %61 : vector<512xf32> to vector<1x512xf32>
    %cst_21 = arith.constant 8.000000e+00 : f32
    %63 = vector.broadcast %cst_21 : f32 to vector<1x512xf32>
    %64 = arith.divf %62, %63 : vector<1x512xf32>
    %c2 = arith.constant 2 : index
    %c0_22 = arith.constant 0 : index
    %65 = vector.load %arg1[%c2, %c0_22] : memref<16x896xf32, #tpu.memory_space<vmem>>, vector<1x512xf32>
    %c3 = arith.constant 3 : index
    %c0_23 = arith.constant 0 : index
    %66 = vector.load %arg1[%c3, %c0_23] : memref<16x896xf32, #tpu.memory_space<vmem>>, vector<1x512xf32>
    %cst_24 = arith.constant 9.99999974E-6 : f32
    %67 = vector.broadcast %cst_24 : f32 to vector<1x512xf32>
    %68 = arith.addf %64, %67 : vector<1x512xf32>
    %69 = math.rsqrt %68 : vector<1x512xf32>
    %70 = vector.broadcast %69 : vector<1x512xf32> to vector<8x512xf32>
    %71 = arith.mulf %59, %70 : vector<8x512xf32>
    %72 = vector.broadcast %65 : vector<1x512xf32> to vector<8x512xf32>
    %73 = arith.mulf %72, %71 : vector<8x512xf32>
    %74 = vector.broadcast %66 : vector<1x512xf32> to vector<8x512xf32>
    %75 = arith.addf %73, %74 : vector<8x512xf32>
    %cst_25 = arith.constant 0.000000e+00 : f32
    %76 = vector.broadcast %cst_25 : f32 to vector<8x512xf32>
    %77 = arith.cmpf oge, %75, %76 : vector<8x512xf32>
    %cst_26 = arith.constant 4.000000e-01 : f32
    %78 = vector.broadcast %cst_26 : f32 to vector<8x512xf32>
    %79 = arith.mulf %78, %75 : vector<8x512xf32>
    %80 = arith.select %77, %75, %79 : vector<8x512xi1>, vector<8x512xf32>
    %c2_i32_27 = arith.constant 2 : i32
    %81 = tpu.memref_slice %arg19[%c2_i32_27] : memref<8x!tpu.dma_semaphore, #tpu.memory_space<semaphore_mem>> -> memref<1x!tpu.dma_semaphore, #tpu.memory_space<semaphore_mem>>
    %82 = tpu.memref_squeeze %81 : memref<1x!tpu.dma_semaphore, #tpu.memory_space<semaphore_mem>> -> memref<!tpu.dma_semaphore, #tpu.memory_space<semaphore_mem>>
    tpu.wait_dma2 semaphore(%82 : memref<!tpu.dma_semaphore, #tpu.memory_space<semaphore_mem>>) src(%arg4 : memref<512x256xbf16, #tpu.memory_space<any>>) dst(%arg13 : memref<512x256xbf16, #tpu.memory_space<vmem>>)
    %c0_28 = arith.constant 0 : index
    %c0_29 = arith.constant 0 : index
    %83 = vector.load %arg13[%c0_28, %c0_29] : memref<512x256xbf16, #tpu.memory_space<vmem>>, vector<512x256xbf16>
    %84 = arith.truncf %80 : vector<8x512xf32> to vector<8x512xbf16>
    %cst_30 = arith.constant dense<0.000000e+00> : vector<8x256xf32>
    %85 = tpu.matmul %84, %83, %cst_30 {dimension_numbers = #tpu.dot_dimension_numbers<[1], [0], [0], [1], [0, 0, 1, 1], [], []>} : vector<8x512xbf16>, vector<512x256xbf16>, vector<8x256xf32> -> vector<8x256xf32>
    %cst_31 = arith.constant dense<0.000000e+00> : vector<256xf32>
    %86 = vector.multi_reduction <add>, %85, %cst_31 [0] : vector<8x256xf32> to vector<256xf32>
    %87 = vector.shape_cast %86 : vector<256xf32> to vector<1x256xf32>
    %cst_32 = arith.constant 8.000000e+00 : f32
    %88 = vector.broadcast %cst_32 : f32 to vector<1x256xf32>
    %89 = arith.divf %87, %88 : vector<1x256xf32>
    %90 = vector.broadcast %89 : vector<1x256xf32> to vector<8x256xf32>
    %91 = arith.subf %85, %90 : vector<8x256xf32>
    %92 = arith.mulf %91, %91 : vector<8x256xf32>
    %cst_33 = arith.constant dense<0.000000e+00> : vector<256xf32>
    %93 = vector.multi_reduction <add>, %92, %cst_33 [0] : vector<8x256xf32> to vector<256xf32>
    %94 = vector.shape_cast %93 : vector<256xf32> to vector<1x256xf32>
    %cst_34 = arith.constant 8.000000e+00 : f32
    %95 = vector.broadcast %cst_34 : f32 to vector<1x256xf32>
    %96 = arith.divf %94, %95 : vector<1x256xf32>
    %c4 = arith.constant 4 : index
    %c0_35 = arith.constant 0 : index
    %97 = vector.load %arg1[%c4, %c0_35] : memref<16x896xf32, #tpu.memory_space<vmem>>, vector<1x256xf32>
    %c5 = arith.constant 5 : index
    %c0_36 = arith.constant 0 : index
    %98 = vector.load %arg1[%c5, %c0_36] : memref<16x896xf32, #tpu.memory_space<vmem>>, vector<1x256xf32>
    %cst_37 = arith.constant 9.99999974E-6 : f32
    %99 = vector.broadcast %cst_37 : f32 to vector<1x256xf32>
    %100 = arith.addf %96, %99 : vector<1x256xf32>
    %101 = math.rsqrt %100 : vector<1x256xf32>
    %102 = vector.broadcast %101 : vector<1x256xf32> to vector<8x256xf32>
    %103 = arith.mulf %91, %102 : vector<8x256xf32>
    %104 = vector.broadcast %97 : vector<1x256xf32> to vector<8x256xf32>
    %105 = arith.mulf %104, %103 : vector<8x256xf32>
    %106 = vector.broadcast %98 : vector<1x256xf32> to vector<8x256xf32>
    %107 = arith.addf %105, %106 : vector<8x256xf32>
    %cst_38 = arith.constant 0.000000e+00 : f32
    %108 = vector.broadcast %cst_38 : f32 to vector<8x256xf32>
    %109 = arith.cmpf oge, %107, %108 : vector<8x256xf32>
    %cst_39 = arith.constant 4.000000e-01 : f32
    %110 = vector.broadcast %cst_39 : f32 to vector<8x256xf32>
    %111 = arith.mulf %110, %107 : vector<8x256xf32>
    %112 = arith.select %109, %107, %111 : vector<8x256xi1>, vector<8x256xf32>
    %c3_i32_40 = arith.constant 3 : i32
    %113 = tpu.memref_slice %arg19[%c3_i32_40] : memref<8x!tpu.dma_semaphore, #tpu.memory_space<semaphore_mem>> -> memref<1x!tpu.dma_semaphore, #tpu.memory_space<semaphore_mem>>
    %114 = tpu.memref_squeeze %113 : memref<1x!tpu.dma_semaphore, #tpu.memory_space<semaphore_mem>> -> memref<!tpu.dma_semaphore, #tpu.memory_space<semaphore_mem>>
    tpu.wait_dma2 semaphore(%114 : memref<!tpu.dma_semaphore, #tpu.memory_space<semaphore_mem>>) src(%arg5 : memref<256x128xbf16, #tpu.memory_space<any>>) dst(%arg14 : memref<256x128xbf16, #tpu.memory_space<vmem>>)
    %c0_41 = arith.constant 0 : index
    %c0_42 = arith.constant 0 : index
    %115 = vector.load %arg14[%c0_41, %c0_42] : memref<256x128xbf16, #tpu.memory_space<vmem>>, vector<256x128xbf16>
    %116 = arith.truncf %112 : vector<8x256xf32> to vector<8x256xbf16>
    %cst_43 = arith.constant dense<0.000000e+00> : vector<8x128xf32>
    %117 = tpu.matmul %116, %115, %cst_43 {dimension_numbers = #tpu.dot_dimension_numbers<[1], [0], [0], [1], [0, 0, 1, 1], [], []>} : vector<8x256xbf16>, vector<256x128xbf16>, vector<8x128xf32> -> vector<8x128xf32>
    %cst_44 = arith.constant dense<0.000000e+00> : vector<128xf32>
    %118 = vector.multi_reduction <add>, %117, %cst_44 [0] : vector<8x128xf32> to vector<128xf32>
    %119 = vector.shape_cast %118 : vector<128xf32> to vector<1x128xf32>
    %cst_45 = arith.constant 8.000000e+00 : f32
    %120 = vector.broadcast %cst_45 : f32 to vector<1x128xf32>
    %121 = arith.divf %119, %120 : vector<1x128xf32>
    %122 = vector.broadcast %121 : vector<1x128xf32> to vector<8x128xf32>
    %123 = arith.subf %117, %122 : vector<8x128xf32>
    %124 = arith.mulf %123, %123 : vector<8x128xf32>
    %cst_46 = arith.constant dense<0.000000e+00> : vector<128xf32>
    %125 = vector.multi_reduction <add>, %124, %cst_46 [0] : vector<8x128xf32> to vector<128xf32>
    %126 = vector.shape_cast %125 : vector<128xf32> to vector<1x128xf32>
    %cst_47 = arith.constant 8.000000e+00 : f32
    %127 = vector.broadcast %cst_47 : f32 to vector<1x128xf32>
    %128 = arith.divf %126, %127 : vector<1x128xf32>
    %c6 = arith.constant 6 : index
    %c0_48 = arith.constant 0 : index
    %129 = vector.load %arg1[%c6, %c0_48] : memref<16x896xf32, #tpu.memory_space<vmem>>, vector<1x128xf32>
    %c7 = arith.constant 7 : index
    %c0_49 = arith.constant 0 : index
    %130 = vector.load %arg1[%c7, %c0_49] : memref<16x896xf32, #tpu.memory_space<vmem>>, vector<1x128xf32>
    %cst_50 = arith.constant 9.99999974E-6 : f32
    %131 = vector.broadcast %cst_50 : f32 to vector<1x128xf32>
    %132 = arith.addf %128, %131 : vector<1x128xf32>
    %133 = math.rsqrt %132 : vector<1x128xf32>
    %134 = vector.broadcast %133 : vector<1x128xf32> to vector<8x128xf32>
    %135 = arith.mulf %123, %134 : vector<8x128xf32>
    %136 = vector.broadcast %129 : vector<1x128xf32> to vector<8x128xf32>
    %137 = arith.mulf %136, %135 : vector<8x128xf32>
    %138 = vector.broadcast %130 : vector<1x128xf32> to vector<8x128xf32>
    %139 = arith.addf %137, %138 : vector<8x128xf32>
    %cst_51 = arith.constant 0.000000e+00 : f32
    %140 = vector.broadcast %cst_51 : f32 to vector<8x128xf32>
    %141 = arith.cmpf oge, %139, %140 : vector<8x128xf32>
    %cst_52 = arith.constant 4.000000e-01 : f32
    %142 = vector.broadcast %cst_52 : f32 to vector<8x128xf32>
    %143 = arith.mulf %142, %139 : vector<8x128xf32>
    %144 = arith.select %141, %139, %143 : vector<8x128xi1>, vector<8x128xf32>
    %c4_i32_53 = arith.constant 4 : i32
    %145 = tpu.memref_slice %arg19[%c4_i32_53] : memref<8x!tpu.dma_semaphore, #tpu.memory_space<semaphore_mem>> -> memref<1x!tpu.dma_semaphore, #tpu.memory_space<semaphore_mem>>
    %146 = tpu.memref_squeeze %145 : memref<1x!tpu.dma_semaphore, #tpu.memory_space<semaphore_mem>> -> memref<!tpu.dma_semaphore, #tpu.memory_space<semaphore_mem>>
    tpu.wait_dma2 semaphore(%146 : memref<!tpu.dma_semaphore, #tpu.memory_space<semaphore_mem>>) src(%arg6 : memref<128x256xbf16, #tpu.memory_space<any>>) dst(%arg15 : memref<128x256xbf16, #tpu.memory_space<vmem>>)
    %c0_54 = arith.constant 0 : index
    %c0_55 = arith.constant 0 : index
    %147 = vector.load %arg15[%c0_54, %c0_55] : memref<128x256xbf16, #tpu.memory_space<vmem>>, vector<128x256xbf16>
    %148 = arith.truncf %144 : vector<8x128xf32> to vector<8x128xbf16>
    %cst_56 = arith.constant dense<0.000000e+00> : vector<8x256xf32>
    %149 = tpu.matmul %148, %147, %cst_56 {dimension_numbers = #tpu.dot_dimension_numbers<[1], [0], [0], [1], [0, 0, 1, 1], [], []>} : vector<8x128xbf16>, vector<128x256xbf16>, vector<8x256xf32> -> vector<8x256xf32>
    %cst_57 = arith.constant dense<0.000000e+00> : vector<256xf32>
    %150 = vector.multi_reduction <add>, %149, %cst_57 [0] : vector<8x256xf32> to vector<256xf32>
    %151 = vector.shape_cast %150 : vector<256xf32> to vector<1x256xf32>
    %cst_58 = arith.constant 8.000000e+00 : f32
    %152 = vector.broadcast %cst_58 : f32 to vector<1x256xf32>
    %153 = arith.divf %151, %152 : vector<1x256xf32>
    %154 = vector.broadcast %153 : vector<1x256xf32> to vector<8x256xf32>
    %155 = arith.subf %149, %154 : vector<8x256xf32>
    %156 = arith.mulf %155, %155 : vector<8x256xf32>
    %cst_59 = arith.constant dense<0.000000e+00> : vector<256xf32>
    %157 = vector.multi_reduction <add>, %156, %cst_59 [0] : vector<8x256xf32> to vector<256xf32>
    %158 = vector.shape_cast %157 : vector<256xf32> to vector<1x256xf32>
    %cst_60 = arith.constant 8.000000e+00 : f32
    %159 = vector.broadcast %cst_60 : f32 to vector<1x256xf32>
    %160 = arith.divf %158, %159 : vector<1x256xf32>
    %c8 = arith.constant 8 : index
    %c0_61 = arith.constant 0 : index
    %161 = vector.load %arg1[%c8, %c0_61] : memref<16x896xf32, #tpu.memory_space<vmem>>, vector<1x256xf32>
    %c9 = arith.constant 9 : index
    %c0_62 = arith.constant 0 : index
    %162 = vector.load %arg1[%c9, %c0_62] : memref<16x896xf32, #tpu.memory_space<vmem>>, vector<1x256xf32>
    %cst_63 = arith.constant 9.99999974E-6 : f32
    %163 = vector.broadcast %cst_63 : f32 to vector<1x256xf32>
    %164 = arith.addf %160, %163 : vector<1x256xf32>
    %165 = math.rsqrt %164 : vector<1x256xf32>
    %166 = vector.broadcast %165 : vector<1x256xf32> to vector<8x256xf32>
    %167 = arith.mulf %155, %166 : vector<8x256xf32>
    %168 = vector.broadcast %161 : vector<1x256xf32> to vector<8x256xf32>
    %169 = arith.mulf %168, %167 : vector<8x256xf32>
    %170 = vector.broadcast %162 : vector<1x256xf32> to vector<8x256xf32>
    %171 = arith.addf %169, %170 : vector<8x256xf32>
    %cst_64 = arith.constant 0.000000e+00 : f32
    %172 = vector.broadcast %cst_64 : f32 to vector<8x256xf32>
    %173 = arith.cmpf oge, %171, %172 : vector<8x256xf32>
    %cst_65 = arith.constant 4.000000e-01 : f32
    %174 = vector.broadcast %cst_65 : f32 to vector<8x256xf32>
    %175 = arith.mulf %174, %171 : vector<8x256xf32>
    %176 = arith.select %173, %171, %175 : vector<8x256xi1>, vector<8x256xf32>
    %c5_i32_66 = arith.constant 5 : i32
    %177 = tpu.memref_slice %arg19[%c5_i32_66] : memref<8x!tpu.dma_semaphore, #tpu.memory_space<semaphore_mem>> -> memref<1x!tpu.dma_semaphore, #tpu.memory_space<semaphore_mem>>
    %178 = tpu.memref_squeeze %177 : memref<1x!tpu.dma_semaphore, #tpu.memory_space<semaphore_mem>> -> memref<!tpu.dma_semaphore, #tpu.memory_space<semaphore_mem>>
    tpu.wait_dma2 semaphore(%178 : memref<!tpu.dma_semaphore, #tpu.memory_space<semaphore_mem>>) src(%arg7 : memref<256x512xbf16, #tpu.memory_space<any>>) dst(%arg16 : memref<256x512xbf16, #tpu.memory_space<vmem>>)
    %c0_67 = arith.constant 0 : index
    %c0_68 = arith.constant 0 : index
    %179 = vector.load %arg16[%c0_67, %c0_68] : memref<256x512xbf16, #tpu.memory_space<vmem>>, vector<256x512xbf16>
    %180 = arith.truncf %176 : vector<8x256xf32> to vector<8x256xbf16>
    %cst_69 = arith.constant dense<0.000000e+00> : vector<8x512xf32>
    %181 = tpu.matmul %180, %179, %cst_69 {dimension_numbers = #tpu.dot_dimension_numbers<[1], [0], [0], [1], [0, 0, 1, 1], [], []>} : vector<8x256xbf16>, vector<256x512xbf16>, vector<8x512xf32> -> vector<8x512xf32>
    %cst_70 = arith.constant dense<0.000000e+00> : vector<512xf32>
    %182 = vector.multi_reduction <add>, %181, %cst_70 [0] : vector<8x512xf32> to vector<512xf32>
    %183 = vector.shape_cast %182 : vector<512xf32> to vector<1x512xf32>
    %cst_71 = arith.constant 8.000000e+00 : f32
    %184 = vector.broadcast %cst_71 : f32 to vector<1x512xf32>
    %185 = arith.divf %183, %184 : vector<1x512xf32>
    %186 = vector.broadcast %185 : vector<1x512xf32> to vector<8x512xf32>
    %187 = arith.subf %181, %186 : vector<8x512xf32>
    %188 = arith.mulf %187, %187 : vector<8x512xf32>
    %cst_72 = arith.constant dense<0.000000e+00> : vector<512xf32>
    %189 = vector.multi_reduction <add>, %188, %cst_72 [0] : vector<8x512xf32> to vector<512xf32>
    %190 = vector.shape_cast %189 : vector<512xf32> to vector<1x512xf32>
    %cst_73 = arith.constant 8.000000e+00 : f32
    %191 = vector.broadcast %cst_73 : f32 to vector<1x512xf32>
    %192 = arith.divf %190, %191 : vector<1x512xf32>
    %c10 = arith.constant 10 : index
    %c0_74 = arith.constant 0 : index
    %193 = vector.load %arg1[%c10, %c0_74] : memref<16x896xf32, #tpu.memory_space<vmem>>, vector<1x512xf32>
    %c11 = arith.constant 11 : index
    %c0_75 = arith.constant 0 : index
    %194 = vector.load %arg1[%c11, %c0_75] : memref<16x896xf32, #tpu.memory_space<vmem>>, vector<1x512xf32>
    %cst_76 = arith.constant 9.99999974E-6 : f32
    %195 = vector.broadcast %cst_76 : f32 to vector<1x512xf32>
    %196 = arith.addf %192, %195 : vector<1x512xf32>
    %197 = math.rsqrt %196 : vector<1x512xf32>
    %198 = vector.broadcast %197 : vector<1x512xf32> to vector<8x512xf32>
    %199 = arith.mulf %187, %198 : vector<8x512xf32>
    %200 = vector.broadcast %193 : vector<1x512xf32> to vector<8x512xf32>
    %201 = arith.mulf %200, %199 : vector<8x512xf32>
    %202 = vector.broadcast %194 : vector<1x512xf32> to vector<8x512xf32>
    %203 = arith.addf %201, %202 : vector<8x512xf32>
    %cst_77 = arith.constant 0.000000e+00 : f32
    %204 = vector.broadcast %cst_77 : f32 to vector<8x512xf32>
    %205 = arith.cmpf oge, %203, %204 : vector<8x512xf32>
    %cst_78 = arith.constant 4.000000e-01 : f32
    %206 = vector.broadcast %cst_78 : f32 to vector<8x512xf32>
    %207 = arith.mulf %206, %203 : vector<8x512xf32>
    %208 = arith.select %205, %203, %207 : vector<8x512xi1>, vector<8x512xf32>
    %c6_i32_79 = arith.constant 6 : i32
    %209 = tpu.memref_slice %arg19[%c6_i32_79] : memref<8x!tpu.dma_semaphore, #tpu.memory_space<semaphore_mem>> -> memref<1x!tpu.dma_semaphore, #tpu.memory_space<semaphore_mem>>
    %210 = tpu.memref_squeeze %209 : memref<1x!tpu.dma_semaphore, #tpu.memory_space<semaphore_mem>> -> memref<!tpu.dma_semaphore, #tpu.memory_space<semaphore_mem>>
    tpu.wait_dma2 semaphore(%210 : memref<!tpu.dma_semaphore, #tpu.memory_space<semaphore_mem>>) src(%arg8 : memref<512x640xbf16, #tpu.memory_space<any>>) dst(%arg17 : memref<512x640xbf16, #tpu.memory_space<vmem>>)
    %c0_80 = arith.constant 0 : index
    %c0_81 = arith.constant 0 : index
    %211 = vector.load %arg17[%c0_80, %c0_81] : memref<512x640xbf16, #tpu.memory_space<vmem>>, vector<512x640xbf16>
    %212 = arith.truncf %208 : vector<8x512xf32> to vector<8x512xbf16>
    %cst_82 = arith.constant dense<0.000000e+00> : vector<8x640xf32>
    %213 = tpu.matmul %212, %211, %cst_82 {dimension_numbers = #tpu.dot_dimension_numbers<[1], [0], [0], [1], [0, 0, 1, 1], [], []>} : vector<8x512xbf16>, vector<512x640xbf16>, vector<8x640xf32> -> vector<8x640xf32>
    %cst_83 = arith.constant dense<0.000000e+00> : vector<640xf32>
    %214 = vector.multi_reduction <add>, %213, %cst_83 [0] : vector<8x640xf32> to vector<640xf32>
    %215 = vector.shape_cast %214 : vector<640xf32> to vector<1x640xf32>
    %cst_84 = arith.constant 8.000000e+00 : f32
    %216 = vector.broadcast %cst_84 : f32 to vector<1x640xf32>
    %217 = arith.divf %215, %216 : vector<1x640xf32>
    %218 = vector.broadcast %217 : vector<1x640xf32> to vector<8x640xf32>
    %219 = arith.subf %213, %218 : vector<8x640xf32>
    %220 = arith.mulf %219, %219 : vector<8x640xf32>
    %cst_85 = arith.constant dense<0.000000e+00> : vector<640xf32>
    %221 = vector.multi_reduction <add>, %220, %cst_85 [0] : vector<8x640xf32> to vector<640xf32>
    %222 = vector.shape_cast %221 : vector<640xf32> to vector<1x640xf32>
    %cst_86 = arith.constant 8.000000e+00 : f32
    %223 = vector.broadcast %cst_86 : f32 to vector<1x640xf32>
    %224 = arith.divf %222, %223 : vector<1x640xf32>
    %c12 = arith.constant 12 : index
    %c0_87 = arith.constant 0 : index
    %225 = vector.load %arg1[%c12, %c0_87] : memref<16x896xf32, #tpu.memory_space<vmem>>, vector<1x640xf32>
    %c13 = arith.constant 13 : index
    %c0_88 = arith.constant 0 : index
    %226 = vector.load %arg1[%c13, %c0_88] : memref<16x896xf32, #tpu.memory_space<vmem>>, vector<1x640xf32>
    %cst_89 = arith.constant 9.99999974E-6 : f32
    %227 = vector.broadcast %cst_89 : f32 to vector<1x640xf32>
    %228 = arith.addf %224, %227 : vector<1x640xf32>
    %229 = math.rsqrt %228 : vector<1x640xf32>
    %230 = vector.broadcast %229 : vector<1x640xf32> to vector<8x640xf32>
    %231 = arith.mulf %219, %230 : vector<8x640xf32>
    %232 = vector.broadcast %225 : vector<1x640xf32> to vector<8x640xf32>
    %233 = arith.mulf %232, %231 : vector<8x640xf32>
    %234 = vector.broadcast %226 : vector<1x640xf32> to vector<8x640xf32>
    %235 = arith.addf %233, %234 : vector<8x640xf32>
    %cst_90 = arith.constant 0.000000e+00 : f32
    %236 = vector.broadcast %cst_90 : f32 to vector<8x640xf32>
    %237 = arith.cmpf oge, %235, %236 : vector<8x640xf32>
    %cst_91 = arith.constant 4.000000e-01 : f32
    %238 = vector.broadcast %cst_91 : f32 to vector<8x640xf32>
    %239 = arith.mulf %238, %235 : vector<8x640xf32>
    %240 = arith.select %237, %235, %239 : vector<8x640xi1>, vector<8x640xf32>
    %c7_i32_92 = arith.constant 7 : i32
    %241 = tpu.memref_slice %arg19[%c7_i32_92] : memref<8x!tpu.dma_semaphore, #tpu.memory_space<semaphore_mem>> -> memref<1x!tpu.dma_semaphore, #tpu.memory_space<semaphore_mem>>
    %242 = tpu.memref_squeeze %241 : memref<1x!tpu.dma_semaphore, #tpu.memory_space<semaphore_mem>> -> memref<!tpu.dma_semaphore, #tpu.memory_space<semaphore_mem>>
    tpu.wait_dma2 semaphore(%242 : memref<!tpu.dma_semaphore, #tpu.memory_space<semaphore_mem>>) src(%arg9 : memref<640x896xbf16, #tpu.memory_space<any>>) dst(%arg18 : memref<640x896xbf16, #tpu.memory_space<vmem>>)
    %c0_93 = arith.constant 0 : index
    %c0_94 = arith.constant 0 : index
    %243 = vector.load %arg18[%c0_93, %c0_94] : memref<640x896xbf16, #tpu.memory_space<vmem>>, vector<640x896xbf16>
    %244 = arith.truncf %240 : vector<8x640xf32> to vector<8x640xbf16>
    %cst_95 = arith.constant dense<0.000000e+00> : vector<8x896xf32>
    %245 = tpu.matmul %244, %243, %cst_95 {dimension_numbers = #tpu.dot_dimension_numbers<[1], [0], [0], [1], [0, 0, 1, 1], [], []>} : vector<8x640xbf16>, vector<640x896xbf16>, vector<8x896xf32> -> vector<8x896xf32>
    %cst_96 = arith.constant dense<0.000000e+00> : vector<896xf32>
    %246 = vector.multi_reduction <add>, %245, %cst_96 [0] : vector<8x896xf32> to vector<896xf32>
    %247 = vector.shape_cast %246 : vector<896xf32> to vector<1x896xf32>
    %cst_97 = arith.constant 8.000000e+00 : f32
    %248 = vector.broadcast %cst_97 : f32 to vector<1x896xf32>
    %249 = arith.divf %247, %248 : vector<1x896xf32>
    %250 = vector.broadcast %249 : vector<1x896xf32> to vector<8x896xf32>
    %251 = arith.subf %245, %250 : vector<8x896xf32>
    %252 = arith.mulf %251, %251 : vector<8x896xf32>
    %cst_98 = arith.constant dense<0.000000e+00> : vector<896xf32>
    %253 = vector.multi_reduction <add>, %252, %cst_98 [0] : vector<8x896xf32> to vector<896xf32>
    %254 = vector.shape_cast %253 : vector<896xf32> to vector<1x896xf32>
    %cst_99 = arith.constant 8.000000e+00 : f32
    %255 = vector.broadcast %cst_99 : f32 to vector<1x896xf32>
    %256 = arith.divf %254, %255 : vector<1x896xf32>
    %c14 = arith.constant 14 : index
    %c0_100 = arith.constant 0 : index
    %257 = vector.load %arg1[%c14, %c0_100] : memref<16x896xf32, #tpu.memory_space<vmem>>, vector<1x896xf32>
    %c15 = arith.constant 15 : index
    %c0_101 = arith.constant 0 : index
    %258 = vector.load %arg1[%c15, %c0_101] : memref<16x896xf32, #tpu.memory_space<vmem>>, vector<1x896xf32>
    %cst_102 = arith.constant 9.99999974E-6 : f32
    %259 = vector.broadcast %cst_102 : f32 to vector<1x896xf32>
    %260 = arith.addf %256, %259 : vector<1x896xf32>
    %261 = math.rsqrt %260 : vector<1x896xf32>
    %262 = vector.broadcast %261 : vector<1x896xf32> to vector<8x896xf32>
    %263 = arith.mulf %251, %262 : vector<8x896xf32>
    %264 = vector.broadcast %257 : vector<1x896xf32> to vector<8x896xf32>
    %265 = arith.mulf %264, %263 : vector<8x896xf32>
    %266 = vector.broadcast %258 : vector<1x896xf32> to vector<8x896xf32>
    %267 = arith.addf %265, %266 : vector<8x896xf32>
    %268 = arith.negf %267 : vector<8x896xf32>
    %269 = math.exp %268 : vector<8x896xf32>
    %cst_103 = arith.constant 1.000000e+00 : f32
    %270 = vector.broadcast %cst_103 : f32 to vector<8x896xf32>
    %271 = arith.addf %270, %269 : vector<8x896xf32>
    %272 = arith.divf %270, %271 : vector<8x896xf32>
    %c0_104 = arith.constant 0 : index
    %c0_105 = arith.constant 0 : index
    %273 = vector.load %arg10[%c0_104, %c0_105] : memref<8x896xf32, #tpu.memory_space<vmem>>, vector<8x896xf32>
    tpu.vector_store %arg10[%c0_104, %c0_105], %272 {strides = array<i32>} : memref<8x896xf32, #tpu.memory_space<vmem>>, vector<8x896xf32>,
    return
  }
}

</mosaic_0001>

<bundles_post_ra>
// kernel: ae_forward.1
= control target key start
LH: loop header
LB: loop body
LE: loop exit
PB: predicated region body
PF: predicated region fallthrough
CT: control target
= control target key end

     0   :  { %15 = vsyncpa [#allocation12], 0  ;;  %s5373_s0 = inlined_call_operand.vmem [shape: f32[8,784], index: 0, kind: input, shape index: {}]   ;;  %s5374_s1 = inlined_call_operand.hbm [shape: f32[16,896], index: 1, kind: input, shape index: {}]   ;;  %s5375_s2 = inlined_call_operand.hbm [shape: bf16[784,640], index: 2, kind: input, shape index: {}]   ;;  %s5376_s3 = inlined_call_operand.hbm [shape: bf16[640,512], index: 3, kind: input, shape index: {}]   ;;  %s5377_s4 = inlined_call_operand.hbm [shape: bf16[512,256], index: 4, kind: input, shape index: {}]   ;;  %s5378_s5 = inlined_call_operand.hbm [shape: bf16[256,128], index: 5, kind: input, shape index: {}]   ;;  %s5379_s6 = inlined_call_operand.hbm [shape: bf16[128,256], index: 6, kind: input, shape index: {}]   ;;  %s5380_s7 = inlined_call_operand.hbm [shape: bf16[256,512], index: 7, kind: input, shape index: {}]   ;;  %s5381_s8 = inlined_call_operand.hbm [shape: bf16[512,640], index: 8, kind: input, shape index: {}]   ;;  %s5382_s9 = inlined_call_operand.hbm [shape: bf16[640,896], index: 9, kind: input, shape index: {}]   ;;  %s5383_s10 = inlined_call_operand.hbm [shape: f32[8,896], index: 10, kind: output, shape index: {}]  }
   0x1   :  { %16 = vsyncpa [#allocation13], 0  ;;  %s4776_s13 = smov [#allocation11]   ;;  %s4690_s17 = scalar_lea.hbm %s5374_s1, 1792 }
   0x2   :  { %s24_s14 = sshll.u32 %s4776_s13, 4  ;;  %p4691_p0 = scmp.ne.s32.totalorder %s5374_s1, %s4690_s17  ;;  %s25_s14 = int_to_ptr.vmem [resolvable:$true] %s24_s14 }
   0x3   :  { %p4694_p1 = scmp.lt.u32.totalorder %s4690_s17, %s5374_s1 }
   0x5   :  { %p4696_p2 = pnand %p4694_p1, %p4691_p0 }
   0x7   :  { %4699 = shalt.err (!%p4696_p2)
}
   0x8   :  { %s4700_s22 = scalar_lea.vmem %s25_s14, 1792  ;;  %p4705_p4 = scmp.lt.s32.totalorder %s25_s14, %s25_s14 }
   0x9   :  { %p4701_p3 = scmp.ne.s32.totalorder %s25_s14, %s4700_s22  ;;  %p4706_p5 = scmp.lt.s32.totalorder %s4700_s22, %s4700_s22 }
   0xb   :  { %p4707_p6 = por %p4706_p5, %p4705_p4 }
   0xd   :  { %p4708_p7 = pnand %p4707_p6, %p4701_p3 }
   0xf   :  { %4711 = shalt.err (!%p4708_p7)
}
  0x10   :  { %s4777_s23 = smov 896   ;;  %s4778_s24 = smov 56  }
  0x11   :  { %30 = dma.hbm_to_vmem [thread:$0]  %s5374_s1, 1792, %s25_s14, [#allocation12], %s4777_s23, %s4777_s23, %s4778_s24  }
  0x12   :  { %4756 = dma.done.wait [#allocation12], 1792  }
  0x13   :  { %4757 = vsyncadd [#allocation12], 4294965504  ;;  %s39_s27 = sld [smem:[#allocation0]]   ;;  %s4779_s28 = smov 640  }
  0x14   :  { %51 = sst [smem:[#allocation16]] %s4779_s28  ;;  %s4780_s29 = smov 5  }
  0x15   :  { %53 = sst [smem:[#allocation16 + $0x1]] %s4779_s28  ;;  %s4781_s30 = smov 64  }
  0x16   :  { %55 = sst [smem:[#allocation16 + $0x2]] %s4780_s29  ;;  %s4782_s11 = smov 128  }
  0x17   :  { %57 = sst [smem:[#allocation16 + $0x3]] %s4781_s30  ;;  %s4783_s12 = smov 2  }
  0x18   :  { %59 = sst [smem:[#allocation16 + $0x4]] %s4782_s11  ;;  %s4784_s13 = smov 320  }
  0x19   :  { %61 = sst [smem:[#allocation16 + $0x5]] %s4783_s12  ;;  %s4243_s1 = sshll.u32 %s39_s27, 26 }
  0x1a   :  { %63 = sst [smem:[#allocation16 + $0x6]] %s4784_s13  ;;  %s4892_s14 = sadd.s32 134217728, %s4243_s1 }
  0x1b   :  { %65 = sst [smem:[#allocation16 + $0x7]] %s4781_s30  ;;  %s4785_s15 = smov 4  }
  0x1c   :  { %67 = sst [smem:[#allocation16 + $0x8]] %s4785_s15  ;;  %s4786_s16 = smov [#allocation2]  }
  0x1d   :  { %s47_s17 = sshll.u32 %s4786_s16, 4  ;;  %s4787_s18 = smov [#allocation10]   ;;  %s48_s17 = int_to_ptr.vmem [resolvable:$true] %s47_s17 }
  0x1e   :  { %s4788_s19 = smov [#allocation15]   ;;  %s4789_s22 = smov 512  }
  0x1f   :  { %69 = dma.general %s5375_s2, 31360, %s48_s17, %s4787_s18, %s4788_s19, [#allocation16], %s4892_s14, 0  }
  0x20   :  { %90 = sst [smem:[#allocation18 + $0x2]] %s4785_s15  ;;  %s4790_s24 = smov [#allocation3]  }
  0x21   :  { %86 = sst [smem:[#allocation18]] %s4789_s22  ;;  %s82_s25 = sshll.u32 %s4790_s24, 4  ;;  %s83_s25 = int_to_ptr.vmem [resolvable:$true] %s82_s25 }
  0x22   :  { %88 = sst [smem:[#allocation18 + $0x1]] %s4789_s22  ;;  %s4791_s26 = smov 256  }
  0x23   :  { %92 = sst [smem:[#allocation18 + $0x3]] %s4781_s30  ;;  %s4792_s2 = smov [#allocation10 + $0x1]  }
  0x24   :  { %94 = sst [smem:[#allocation18 + $0x4]] %s4782_s11  ;;  %s4793_s27 = smov [#allocation17]  }
  0x25   :  { %96 = sst [smem:[#allocation18 + $0x5]] %s4783_s12  ;;  %s4794_s17 = smov [#allocation4]  }
  0x26   :  { %98 = sst [smem:[#allocation18 + $0x6]] %s4791_s26  ;;  %s117_s18 = sshll.u32 %s4794_s17, 4  ;;  %s118_s18 = int_to_ptr.vmem [resolvable:$true] %s117_s18 }
  0x27   :  { %100 = sst [smem:[#allocation18 + $0x7]] %s4781_s30  ;;  %s4796_s19 = smov [#allocation19]  }
  0x28   :  { %102 = sst [smem:[#allocation18 + $0x8]] %s4785_s15  ;;  %s4797_s24 = smov [#allocation5]  }
  0x29   :  { %104 = dma.general %s5376_s3, 20480, %s83_s25, %s4792_s2, %s4793_s27, [#allocation18], %s4892_s14, 0  }
  0x2a   :  { %121 = sst [smem:[#allocation20]] %s4791_s26  ;;  %s4795_s3 = smov [#allocation10 + $0x2]  }
  0x2b   :  { %123 = sst [smem:[#allocation20 + $0x1]] %s4791_s26  ;;  %s148_s25 = sshll.u32 %s4797_s24, 4  ;;  %s149_s25 = int_to_ptr.vmem [resolvable:$true] %s148_s25 }
  0x2c   :  { %125 = sst [smem:[#allocation20 + $0x2]] %s4783_s12  ;;  %s4798_s2 = smov [#allocation6]  }
  0x2d   :  { %127 = sst [smem:[#allocation20 + $0x3]] %s4781_s30  ;;  %s164_s27 = sshll.u32 %s4798_s2, 4  ;;  %s165_s27 = int_to_ptr.vmem [resolvable:$true] %s164_s27 }
  0x2e   :  { %129 = sst [smem:[#allocation20 + $0x4]] %s4782_s11  ;;  %s4712_s16 = scalar_lea.hbm %s5378_s5, 2048 }
  0x2f   :  { %131 = sst [smem:[#allocation20 + $0x5]] %s4783_s12  ;;  %p4713_p8 = scmp.ne.s32.totalorder %s5378_s5, %s4712_s16 }
  0x30   :  { %133 = sst [smem:[#allocation20 + $0x6]] %s4782_s11  ;;  %p4716_p9 = scmp.lt.u32.totalorder %s4712_s16, %s5378_s5 }
  0x31   :  { %135 = sst [smem:[#allocation20 + $0x7]] %s4781_s30 }
  0x32   :  { %137 = sst [smem:[#allocation20 + $0x8]] %s4785_s15  ;;  %p4718_p10 = pnand %p4716_p9, %p4713_p8 }
  0x33   :  { %139 = dma.general %s5377_s4, 8192, %s118_s18, %s4795_s3, %s4796_s19, [#allocation20], %s4892_s14, 0  }
  0x34   :  { %168 = sst [smem:[#allocation26]] %s4791_s26 }
  0x35   :  { %170 = sst [smem:[#allocation26 + $0x1]] %s4791_s26 }
  0x36   :  { %172 = sst [smem:[#allocation26 + $0x2]] %s4783_s12 }
  0x37   :  { %174 = sst [smem:[#allocation26 + $0x3]] %s4781_s30 }
  0x38   :  { %176 = sst [smem:[#allocation26 + $0x4]] %s4782_s11 }
  0x39   :  { %178 = sst [smem:[#allocation26 + $0x5]] %s4783_s12 }
  0x3a   :  { %180 = sst [smem:[#allocation26 + $0x6]] %s4782_s11 }
  0x3b   :  { %182 = sst [smem:[#allocation26 + $0x7]] %s4781_s30 }
  0x3c   :  { %184 = sst [smem:[#allocation26 + $0x8]] %s4785_s15 }
  0x3d   :  { %4721 = shalt.err (!%p4718_p10)  }
  0x3e   :  { %s4722_s20 = scalar_lea.vmem %s149_s25, 2048  ;;  %p4727_p12 = scmp.lt.s32.totalorder %s149_s25, %s149_s25 }
  0x3f   :  { %p4723_p11 = scmp.ne.s32.totalorder %s149_s25, %s4722_s20  ;;  %p4728_p13 = scmp.lt.s32.totalorder %s4722_s20, %s4722_s20 }
  0x41   :  { %p4729_p0 = por %p4728_p13, %p4727_p12 }
  0x43   :  { %p4730_p1 = pnand %p4729_p0, %p4723_p11 }
  0x45   :  { %4733 = shalt.err (!%p4730_p1)  }
  0x46   :  { %151 = dma.hbm_to_vmem [thread:$0]  %s5378_s5, 2048, %s149_s25, [#allocation10 + $0x3] }
  0x47   :  { %s4799_s2 = smov [#allocation10 + $0x4]   ;;  %s4800_s4 = smov [#allocation25]  }
  0x48   :  { %186 = dma.general %s5379_s6, 2048, %s165_s27, %s4799_s2, %s4800_s4, [#allocation26], %s4892_s14, 0  }
  0x49   :  { %203 = sst [smem:[#allocation28]] %s4789_s22  ;;  %s4801_s16 = smov [#allocation7]  }
  0x4a   :  { %205 = sst [smem:[#allocation28 + $0x1]] %s4789_s22  ;;  %s199_s18 = sshll.u32 %s4801_s16, 4  ;;  %s200_s18 = int_to_ptr.vmem [resolvable:$true] %s199_s18 }
  0x4b   :  { %207 = sst [smem:[#allocation28 + $0x2]] %s4785_s15  ;;  %s4802_s5 = smov [#allocation10 + $0x5]  }
  0x4c   :  { %209 = sst [smem:[#allocation28 + $0x3]] %s4781_s30  ;;  %s4803_s6 = smov [#allocation27]  }
  0x4d   :  { %211 = sst [smem:[#allocation28 + $0x4]] %s4782_s11  ;;  %s4804_s27 = smov [#allocation8]  }
  0x4e   :  { %213 = sst [smem:[#allocation28 + $0x5]] %s4783_s12  ;;  %s234_s3 = sshll.u32 %s4804_s27, 4  ;;  %s235_s3 = int_to_ptr.vmem [resolvable:$true] %s234_s3 }
  0x4f   :  { %215 = sst [smem:[#allocation28 + $0x6]] %s4791_s26  ;;  %s4806_s26 = smov [#allocation29]  }
  0x50   :  { %217 = sst [smem:[#allocation28 + $0x7]] %s4781_s30  ;;  %s4808_s21 = smov 7  }
  0x51   :  { %219 = sst [smem:[#allocation28 + $0x8]] %s4785_s15  ;;  %s4811_s24 = smov [#allocation31]  }
  0x52   :  { %221 = dma.general %s5380_s7, 8192, %s200_s18, %s4802_s5, %s4803_s6, [#allocation28], %s4892_s14, 0  }
  0x53   :  { %238 = sst [smem:[#allocation30]] %s4779_s28  ;;  %s4805_s7 = smov [#allocation10 + $0x6]  }
  0x54   :  { %240 = sst [smem:[#allocation30 + $0x1]] %s4779_s28 }
  0x55   :  { %242 = sst [smem:[#allocation30 + $0x2]] %s4780_s29  ;;  %s4807_s29 = smov [#allocation9]  }
  0x56   :  { %244 = sst [smem:[#allocation30 + $0x3]] %s4781_s30  ;;  %s269_s20 = sshll.u32 %s4807_s29, 4  ;;  %s270_s20 = int_to_ptr.vmem [resolvable:$true] %s269_s20 }
  0x57   :  { %246 = sst [smem:[#allocation30 + $0x4]] %s4782_s11 }
  0x58   :  { %248 = sst [smem:[#allocation30 + $0x5]] %s4783_s12 }
  0x59   :  { %250 = sst [smem:[#allocation30 + $0x6]] %s4784_s13  ;;  %s4809_s13 = smov 448  }
  0x5a   :  { %252 = sst [smem:[#allocation30 + $0x7]] %s4781_s30 }
  0x5b   :  { %254 = sst [smem:[#allocation30 + $0x8]] %s4785_s15 }
  0x5c   :  { %256 = dma.general %s5381_s8, 20480, %s235_s3, %s4805_s7, %s4806_s26, [#allocation30], %s4892_s14, 0  }
  0x5d   :  { %273 = sst [smem:[#allocation32]] %s4777_s23  ;;  %s4810_s8 = smov [#allocation10 + $0x7]  }
  0x5e   :  { %275 = sst [smem:[#allocation32 + $0x1]] %s4777_s23 }
  0x5f   :  { %277 = sst [smem:[#allocation32 + $0x2]] %s4808_s21 }
  0x60   :  { %279 = sst [smem:[#allocation32 + $0x3]] %s4781_s30 }
  0x61   :  { %281 = sst [smem:[#allocation32 + $0x4]] %s4782_s11 }
  0x62   :  { %283 = sst [smem:[#allocation32 + $0x5]] %s4783_s12 }
  0x63   :  { %285 = sst [smem:[#allocation32 + $0x6]] %s4809_s13 }
  0x64   :  { %287 = sst [smem:[#allocation32 + $0x7]] %s4781_s30 }
  0x65   :  { %289 = sst [smem:[#allocation32 + $0x8]] %s4785_s15 }
  0x66   :  { %291 = dma.general %s5382_s9, 35840, %s270_s20, %s4810_s8, %s4811_s24, [#allocation32], %s4892_s14, 0  }
  0x67   :  { %v4991_v0 = vld [vmem:[%s5373_s0] sm:$0xff]  ;;  %v293_v1 = vld [vmem:[%s5373_s0 + $0x8] sm:$0xff]  ;;  %v4999_v2 = vld [vmem:[%s5373_s0 + $0x10] sm:$0xff] }
  0x68   :  { %v5004_v3 = vld [vmem:[%s5373_s0 + $0x18] sm:$0xff]  ;;  %v5009_v4 = vld [vmem:[%s5373_s0 + $0x20] sm:$0xff]  ;;  %v5014_v5 = vld [vmem:[%s5373_s0 + $0x28] sm:$0xff] }
  0x69   :  { %v5019_v6 = vld [vmem:[%s5373_s0 + $0x30] sm:$0xff] }
  0x6a   :  { %4758 = dma.done.wait [#allocation10], 31360 }
  0x6b   :  { %4759 = vsyncadd [#allocation10], 4294935936  ;;  %v5021_v7 = vpack.c.bf16 %v293_v1, %v293_v1  ;;  %v304_v8 = vld [vmem:[#allocation2 + $0x8] sm:$0xff]  ;;  %v306_v9 = vld [vmem:[#allocation2 + $0x18] sm:$0xff]  ;;  %vm555_vm0 = vcmask 130048   ;;  %vm4814_vm1 = vmmov 0  }
  0x6c   :  { %v303_v10 = vld [vmem:[#allocation2] sm:$0xff]  ;;  %559 = vmatprep.subr.bf16.mxu0 %v304_v8  ;;  %723 = vmatprep.subr.bf16.mxu1 %v306_v9  ;;  %v305_v11 = vld [vmem:[#allocation2 + $0x10] sm:$0xff]  ;;  %v308_v14 = vld [vmem:[#allocation2 + $0x28] sm:$0xff] }
  0x6d   :  { %591 = vmatprep.mubr.bf16.mxu0 %v5021_v7  ;;  %755 = vmatprep.mubr.bf16.mxu1 %v5021_v7  ;;  %v309_v12 = vld [vmem:[#allocation2 + $0x30] sm:$0xff]  ;;  %v311_v13 = vld [vmem:[#allocation2 + $0x40] sm:$0xff]  ;;  %v310_v15 = vld [vmem:[#allocation2 + $0x38] sm:$0xff] }
  0x6e   :  { %560 = vmatpush1.bf16.msra.mxu0 %v303_v10  ;;  %724 = vmatpush1.bf16.msra.mxu1 %v305_v11  ;;  %v314_v16 = vld [vmem:[#allocation2 + $0x58] sm:$0xff]  ;;  %v316_v17 = vld [vmem:[#allocation2 + $0x68] sm:$0xff]  ;;  %v313_v18 = vld [vmem:[#allocation2 + $0x50] sm:$0xff] }
  0x6f   :  { %561 = vmatprep.subr.bf16.mxu0 %v309_v12  ;;  %725 = vmatprep.subr.bf16.mxu1 %v311_v13  ;;  %v315_v19 = vld [vmem:[#allocation2 + $0x60] sm:$0xff]  ;;  %v321_v21 = vld [vmem:[#allocation2 + $0x90] sm:$0xff]  ;;  %v318_v22 = vld [vmem:[#allocation2 + $0x78] sm:$0xff] }
  0x70   :  { %v319_v20 = vld [vmem:[#allocation2 + $0x80] sm:$0xff]  ;;  %v320_v23 = vld [vmem:[#allocation2 + $0x88] sm:$0xff]  ;;  %v326_v25 = vld [vmem:[#allocation2 + $0xb8] sm:$0xff] }
  0x71   :  { %v324_v24 = vld [vmem:[#allocation2 + $0xa8] sm:$0xff]  ;;  %v323_v26 = vld [vmem:[#allocation2 + $0xa0] sm:$0xff]  ;;  %v325_v27 = vld [vmem:[#allocation2 + $0xb0] sm:$0xff] }
  0x72   :  { %562 = vmatpush1.bf16.msra.mxu0 %v308_v14  ;;  %726 = vmatpush1.bf16.msra.mxu1 %v310_v15  ;;  %v329_v28 = vld [vmem:[#allocation2 + $0xd0] sm:$0xff]  ;;  %v331_v29 = vld [vmem:[#allocation2 + $0xe0] sm:$0xff]  ;;  %v328_v30 = vld [vmem:[#allocation2 + $0xc8] sm:$0xff] }
  0x73   :  { %563 = vmatprep.subr.bf16.mxu0 %v314_v16  ;;  %727 = vmatprep.subr.bf16.mxu1 %v316_v17  ;;  %v330_v31 = vld [vmem:[#allocation2 + $0xd8] sm:$0xff]  ;;  %v336_v33 = vld [vmem:[#allocation2 + $0x108] sm:$0xff]  ;;  %v333_v34 = vld [vmem:[#allocation2 + $0xf0] sm:$0xff]  ;;  %v5027_v17 = vpack.c.bf16 %v4991_v0, %v4991_v0 }
  0x74   :  { %v334_v32 = vld [vmem:[#allocation2 + $0xf8] sm:$0xff]  ;;  %v335_v35 = vld [vmem:[#allocation2 + $0x100] sm:$0xff]  ;;  %v341_v37 = vld [vmem:[#allocation2 + $0x130] sm:$0xff] }
  0x75   :  { %v339_v36 = vld [vmem:[#allocation2 + $0x120] sm:$0xff]  ;;  %v338_v38 = vld [vmem:[#allocation2 + $0x118] sm:$0xff]  ;;  %v340_v39 = vld [vmem:[#allocation2 + $0x128] sm:$0xff] }
  0x76   :  { %564 = vmatpush1.bf16.msra.mxu0 %v313_v18  ;;  %728 = vmatpush1.bf16.msra.mxu1 %v315_v19  ;;  %v344_v40 = vld [vmem:[#allocation2 + $0x148] sm:$0xff]  ;;  %v346_v41 = vld [vmem:[#allocation2 + $0x158] sm:$0xff]  ;;  %v343_v42 = vld [vmem:[#allocation2 + $0x140] sm:$0xff] }
  0x77   :  { %565 = vmatprep.subr.bf16.mxu0 %v319_v20  ;;  %729 = vmatprep.subr.bf16.mxu1 %v321_v21  ;;  %v345_v43 = vld [vmem:[#allocation2 + $0x150] sm:$0xff]  ;;  %v351_v45 = vld [vmem:[#allocation2 + $0x180] sm:$0xff]  ;;  %v348_v46 = vld [vmem:[#allocation2 + $0x168] sm:$0xff] }
  0x78   :  { %v349_v44 = vld [vmem:[#allocation2 + $0x170] sm:$0xff]  ;;  %v350_v47 = vld [vmem:[#allocation2 + $0x178] sm:$0xff]  ;;  %v356_v49 = vld [vmem:[#allocation2 + $0x1a8] sm:$0xff] }
  0x79   :  { %v354_v48 = vld [vmem:[#allocation2 + $0x198] sm:$0xff]  ;;  %v353_v50 = vld [vmem:[#allocation2 + $0x190] sm:$0xff]  ;;  %v355_v51 = vld [vmem:[#allocation2 + $0x1a0] sm:$0xff] }
  0x7a   :  { %566 = vmatpush1.bf16.msra.mxu0 %v318_v22  ;;  %730 = vmatpush1.bf16.msra.mxu1 %v320_v23  ;;  %v359_v52 = vld [vmem:[#allocation2 + $0x1c0] sm:$0xff]  ;;  %v361_v53 = vld [vmem:[#allocation2 + $0x1d0] sm:$0xff]  ;;  %v358_v54 = vld [vmem:[#allocation2 + $0x1b8] sm:$0xff]  ;;  %v5031_v22 = vpack.c.bf16 %v5004_v3, %v5004_v3 }
  0x7b   :  { %567 = vmatprep.subr.bf16.mxu0 %v324_v24  ;;  %731 = vmatprep.subr.bf16.mxu1 %v326_v25  ;;  %v360_v55 = vld [vmem:[#allocation2 + $0x1c8] sm:$0xff]  ;;  %v366_v57 = vld [vmem:[#allocation2 + $0x1f8] sm:$0xff]  ;;  %v363_v58 = vld [vmem:[#allocation2 + $0x1e0] sm:$0xff] }
  0x7c   :  { %v364_v56 = vld [vmem:[#allocation2 + $0x1e8] sm:$0xff]  ;;  %v365_v59 = vld [vmem:[#allocation2 + $0x1f0] sm:$0xff]  ;;  %v371_v61 = vld [vmem:[#allocation2 + $0x220] sm:$0xff] }
  0x7d   :  { %v369_v60 = vld [vmem:[#allocation2 + $0x210] sm:$0xff]  ;;  %v368_v62 = vld [vmem:[#allocation2 + $0x208] sm:$0xff]  ;;  %v370_v63 = vld [vmem:[#allocation2 + $0x218] sm:$0xff] }
  0x7e   :  { %568 = vmatpush1.bf16.msra.mxu0 %v323_v26  ;;  %732 = vmatpush1.bf16.msra.mxu1 %v325_v27  ;;  %v374_v1 = vld [vmem:[#allocation2 + $0x238] sm:$0xff]  ;;  %v376_v8 = vld [vmem:[#allocation2 + $0x248] sm:$0xff]  ;;  %v373_v9 = vld [vmem:[#allocation2 + $0x230] sm:$0xff] }
  0x7f   :  { %569 = vmatprep.subr.bf16.mxu0 %v329_v28  ;;  %733 = vmatprep.subr.bf16.mxu1 %v331_v29  ;;  %v375_v10 = vld [vmem:[#allocation2 + $0x240] sm:$0xff]  ;;  %v381_v12 = vld [vmem:[#allocation2 + $0x270] sm:$0xff]  ;;  %v378_v13 = vld [vmem:[#allocation2 + $0x258] sm:$0xff] }
  0x80   :  { %v379_v11 = vld [vmem:[#allocation2 + $0x260] sm:$0xff]  ;;  %v380_v14 = vld [vmem:[#allocation2 + $0x268] sm:$0xff]  ;;  %v386_v16 = vld [vmem:[#allocation2 + $0x298] sm:$0xff] }
  0x81   :  { %v384_v15 = vld [vmem:[#allocation2 + $0x288] sm:$0xff]  ;;  %v383_v18 = vld [vmem:[#allocation2 + $0x280] sm:$0xff]  ;;  %v385_v19 = vld [vmem:[#allocation2 + $0x290] sm:$0xff] }
  0x82   :  { %570 = vmatpush1.bf16.msra.mxu0 %v328_v30  ;;  %734 = vmatpush1.bf16.msra.mxu1 %v330_v31  ;;  %v389_v20 = vld [vmem:[#allocation2 + $0x2b0] sm:$0xff]  ;;  %v391_v21 = vld [vmem:[#allocation2 + $0x2c0] sm:$0xff]  ;;  %v388_v0 = vld [vmem:[#allocation2 + $0x2a8] sm:$0xff] }
  0x83   :  { %571 = vmatprep.subr.bf16.mxu0 %v334_v32  ;;  %735 = vmatprep.subr.bf16.mxu1 %v336_v33  ;;  %v390_v23 = vld [vmem:[#allocation2 + $0x2b8] sm:$0xff]  ;;  %v396_v25 = vld [vmem:[#allocation2 + $0x2e8] sm:$0xff]  ;;  %v393_v3 = vld [vmem:[#allocation2 + $0x2d0] sm:$0xff] }
  0x84   :  { %v394_v24 = vld [vmem:[#allocation2 + $0x2d8] sm:$0xff]  ;;  %v395_v26 = vld [vmem:[#allocation2 + $0x2e0] sm:$0xff]  ;;  %v401_v28 = vld [vmem:[#allocation2 + $0x310] sm:$0xff] }
  0x85   :  { %v399_v27 = vld [vmem:[#allocation2 + $0x300] sm:$0xff]  ;;  %v398_v29 = vld [vmem:[#allocation2 + $0x2f8] sm:$0xff]  ;;  %v400_v30 = vld [vmem:[#allocation2 + $0x308] sm:$0xff] }
  0x86   :  { %572 = vmatpush1.bf16.msra.mxu0 %v333_v34  ;;  %736 = vmatpush1.bf16.msra.mxu1 %v335_v35  ;;  %v404_v31 = vld [vmem:[#allocation2 + $0x328] sm:$0xff]  ;;  %v406_v32 = vld [vmem:[#allocation2 + $0x338] sm:$0xff]  ;;  %v403_v33 = vld [vmem:[#allocation2 + $0x320] sm:$0xff] }
  0x87   :  { %573 = vmatprep.subr.bf16.mxu0 %v339_v36  ;;  %737 = vmatprep.subr.bf16.mxu1 %v341_v37  ;;  %v405_v34 = vld [vmem:[#allocation2 + $0x330] sm:$0xff]  ;;  %v411_v36 = vld [vmem:[#allocation2 + $0x360] sm:$0xff]  ;;  %v408_v37 = vld [vmem:[#allocation2 + $0x348] sm:$0xff] }
  0x88   :  { %v409_v35 = vld [vmem:[#allocation2 + $0x350] sm:$0xff] }
  0x8a   :  { %574 = vmatpush1.bf16.msra.mxu0 %v338_v38  ;;  %738 = vmatpush1.bf16.msra.mxu1 %v340_v39  ;;  %v410_v38 = vld [vmem:[#allocation2 + $0x358] sm:$0xff] }
  0x8b   :  { %575 = vmatprep.subr.bf16.mxu0 %v344_v40  ;;  %739 = vmatprep.subr.bf16.mxu1 %v346_v41  ;;  %v414_v39 = vld [vmem:[#allocation2 + $0x378] sm:$0xff]  ;;  %v416_v40 = vld [vmem:[#allocation2 + $0x388] sm:$0xff]  ;;  %v413_v41 = vld [vmem:[#allocation2 + $0x370] sm:$0xff] }
  0x8e   :  { %576 = vmatpush1.bf16.msra.mxu0 %v343_v42  ;;  %740 = vmatpush1.bf16.msra.mxu1 %v345_v43  ;;  %v415_v42 = vld [vmem:[#allocation2 + $0x380] sm:$0xff] }
  0x8f   :  { %577 = vmatprep.subr.bf16.mxu0 %v349_v44  ;;  %741 = vmatprep.subr.bf16.mxu1 %v351_v45  ;;  %v419_v43 = vld [vmem:[#allocation2 + $0x3a0] sm:$0xff]  ;;  %v421_v44 = vld [vmem:[#allocation2 + $0x3b0] sm:$0xff]  ;;  %v418_v45 = vld [vmem:[#allocation2 + $0x398] sm:$0xff] }
  0x92   :  { %578 = vmatpush1.bf16.msra.mxu0 %v348_v46  ;;  %742 = vmatpush1.bf16.msra.mxu1 %v350_v47  ;;  %v420_v46 = vld [vmem:[#allocation2 + $0x3a8] sm:$0xff] }
  0x93   :  { %579 = vmatprep.subr.bf16.mxu0 %v354_v48  ;;  %743 = vmatprep.subr.bf16.mxu1 %v356_v49  ;;  %v424_v47 = vld [vmem:[#allocation2 + $0x3c8] sm:$0xff]  ;;  %v426_v48 = vld [vmem:[#allocation2 + $0x3d8] sm:$0xff]  ;;  %v423_v49 = vld [vmem:[#allocation2 + $0x3c0] sm:$0xff] }
  0x96   :  { %580 = vmatpush1.bf16.msra.mxu0 %v353_v50  ;;  %744 = vmatpush1.bf16.msra.mxu1 %v355_v51  ;;  %v425_v50 = vld [vmem:[#allocation2 + $0x3d0] sm:$0xff] }
  0x97   :  { %581 = vmatprep.subr.bf16.mxu0 %v359_v52  ;;  %745 = vmatprep.subr.bf16.mxu1 %v361_v53  ;;  %v429_v51 = vld [vmem:[#allocation2 + $0x3f0] sm:$0xff]  ;;  %v431_v52 = vld [vmem:[#allocation2 + $0x400] sm:$0xff]  ;;  %v428_v53 = vld [vmem:[#allocation2 + $0x3e8] sm:$0xff] }
  0x9a   :  { %582 = vmatpush1.bf16.msra.mxu0 %v358_v54  ;;  %746 = vmatpush1.bf16.msra.mxu1 %v360_v55  ;;  %v430_v54 = vld [vmem:[#allocation2 + $0x3f8] sm:$0xff] }
  0x9b   :  { %583 = vmatprep.subr.bf16.mxu0 %v364_v56  ;;  %747 = vmatprep.subr.bf16.mxu1 %v366_v57  ;;  %v434_v55 = vld [vmem:[#allocation2 + $0x418] sm:$0xff]  ;;  %v436_v56 = vld [vmem:[#allocation2 + $0x428] sm:$0xff]  ;;  %v433_v57 = vld [vmem:[#allocation2 + $0x410] sm:$0xff] }
  0x9e   :  { %584 = vmatpush1.bf16.msra.mxu0 %v363_v58  ;;  %748 = vmatpush1.bf16.msra.mxu1 %v365_v59  ;;  %v435_v58 = vld [vmem:[#allocation2 + $0x420] sm:$0xff] }
  0x9f   :  { %585 = vmatprep.subr.bf16.mxu0 %v369_v60  ;;  %749 = vmatprep.subr.bf16.mxu1 %v371_v61  ;;  %v439_v59 = vld [vmem:[#allocation2 + $0x440] sm:$0xff]  ;;  %v441_v60 = vld [vmem:[#allocation2 + $0x450] sm:$0xff]  ;;  %v438_v61 = vld [vmem:[#allocation2 + $0x438] sm:$0xff] }
  0xa2   :  { %586 = vmatpush1.bf16.msra.mxu0 %v368_v62  ;;  %750 = vmatpush1.bf16.msra.mxu1 %v370_v63  ;;  %v440_v62 = vld [vmem:[#allocation2 + $0x448] sm:$0xff] }
  0xa3   :  { %587 = vmatprep.subr.bf16.mxu0 %v374_v1  ;;  %751 = vmatprep.subr.bf16.mxu1 %v376_v8  ;;  %v444_v63 = vld [vmem:[#allocation2 + $0x468] sm:$0xff]  ;;  %v446_v1 = vld [vmem:[#allocation2 + $0x478] sm:$0xff]  ;;  %v443_v8 = vld [vmem:[#allocation2 + $0x460] sm:$0xff] }
  0xa6   :  { %588 = vmatpush1.bf16.msra.mxu0 %v373_v9  ;;  %752 = vmatpush1.bf16.msra.mxu1 %v375_v10  ;;  %v445_v9 = vld [vmem:[#allocation2 + $0x470] sm:$0xff] }
  0xa7   :  { %589 = vmatprep.subr.bf16.mxu0 %v379_v11  ;;  %753 = vmatprep.subr.bf16.mxu1 %v381_v12  ;;  %v449_v10 = vld [vmem:[#allocation2 + $0x490] sm:$0xff]  ;;  %v451_v11 = vld [vmem:[#allocation2 + $0x4a0] sm:$0xff]  ;;  %v448_v12 = vld [vmem:[#allocation2 + $0x488] sm:$0xff] }
  0xaa   :  { %590 = vmatpush1.bf16.msra.mxu0 %v378_v13  ;;  %754 = vmatpush1.bf16.msra.mxu1 %v380_v14  ;;  %v450_v13 = vld [vmem:[#allocation2 + $0x498] sm:$0xff] }
  0xab   :  { %600 = vmatprep.subr.bf16.mxu0 %v384_v15  ;;  %764 = vmatprep.subr.bf16.mxu1 %v386_v16  ;;  %v454_v14 = vld [vmem:[#allocation2 + $0x4b8] sm:$0xff]  ;;  %v456_v15 = vld [vmem:[#allocation2 + $0x4c8] sm:$0xff]  ;;  %v453_v16 = vld [vmem:[#allocation2 + $0x4b0] sm:$0xff] }
  0xad   :  { %592 = vmatmul.mubr.bf16.vlgmr.msra.gmra.mrb[0].mxu0 %v5027_v17  ;;  %756 = vmatmul.mubr.bf16.vlgmr.msra.gmra.mrb[0].mxu1 %v5027_v17 }
  0xae   :  { %601 = vmatpush1.bf16.msra.mxu0 %v383_v18  ;;  %765 = vmatpush1.bf16.msra.mxu1 %v385_v19  ;;  %v455_v18 = vld [vmem:[#allocation2 + $0x4c0] sm:$0xff] }
  0xaf   :  { %602 = vmatprep.subr.bf16.mxu0 %v389_v20  ;;  %766 = vmatprep.subr.bf16.mxu1 %v391_v21  ;;  %v459_v19 = vld [vmem:[#allocation2 + $0x4e0] sm:$0xff]  ;;  %v461_v20 = vld [vmem:[#allocation2 + $0x4f0] sm:$0xff]  ;;  %v458_v21 = vld [vmem:[#allocation2 + $0x4d8] sm:$0xff] }
  0xb0   :  { %632 = vmatprep.mubr.bf16.mxu0 %v5031_v22  ;;  %796 = vmatprep.mubr.bf16.mxu1 %v5031_v22 }
  0xb2   :  { %603 = vmatpush1.bf16.msra.mxu0 %v388_v0  ;;  %767 = vmatpush1.bf16.msra.mxu1 %v390_v23  ;;  %v460_v0 = vld [vmem:[#allocation2 + $0x4e8] sm:$0xff] }
  0xb3   :  { %604 = vmatprep.subr.bf16.mxu0 %v394_v24  ;;  %768 = vmatprep.subr.bf16.mxu1 %v396_v25  ;;  %v464_v23 = vld [vmem:[#allocation2 + $0x508] sm:$0xff]  ;;  %v466_v24 = vld [vmem:[#allocation2 + $0x518] sm:$0xff]  ;;  %v5039_v25 = vpack.c.bf16 %v4999_v2, %v4999_v2 }
  0xb4   :  { %v468_v2 = vld [vmem:[#allocation2 + $0x528] sm:$0xff] }
  0xb6   :  { %605 = vmatpush1.bf16.msra.mxu0 %v393_v3  ;;  %769 = vmatpush1.bf16.msra.mxu1 %v395_v26  ;;  %v463_v3 = vld [vmem:[#allocation2 + $0x500] sm:$0xff]  ;;  %v465_v26 = vld [vmem:[#allocation2 + $0x510] sm:$0xff] }
  0xb7   :  { %606 = vmatprep.subr.bf16.mxu0 %v399_v27  ;;  %770 = vmatprep.subr.bf16.mxu1 %v401_v28  ;;  %v469_v27 = vld [vmem:[#allocation2 + $0x530] sm:$0xff]  ;;  %v471_v28 = vld [vmem:[#allocation2 + $0x540] sm:$0xff] }
  0xba   :  { %607 = vmatpush1.bf16.msra.mxu0 %v398_v29  ;;  %771 = vmatpush1.bf16.msra.mxu1 %v400_v30  ;;  %v5043_v29 = vpack.c.bf16 %v5014_v5, %v5014_v5  ;;  %v470_v30 = vld [vmem:[#allocation2 + $0x538] sm:$0xff]  ;;  %v473_v5 = vld [vmem:[#allocation2 + $0x550] sm:$0xff] }
  0xbb   :  { %608 = vmatprep.subr.bf16.mxu0 %v404_v31  ;;  %772 = vmatprep.subr.bf16.mxu1 %v406_v32  ;;  %v474_v31 = vld [vmem:[#allocation2 + $0x558] sm:$0xff]  ;;  %v476_v32 = vld [vmem:[#allocation2 + $0x568] sm:$0xff] }
  0xbe   :  { %609 = vmatpush1.bf16.msra.mxu0 %v403_v33  ;;  %773 = vmatpush1.bf16.msra.mxu1 %v405_v34  ;;  %v475_v33 = vld [vmem:[#allocation2 + $0x560] sm:$0xff] }
  0xbf   :  { %610 = vmatprep.subr.bf16.mxu0 %v409_v35  ;;  %774 = vmatprep.subr.bf16.mxu1 %v411_v36  ;;  %v479_v34 = vld [vmem:[#allocation2 + $0x580] sm:$0xff]  ;;  %v481_v35 = vld [vmem:[#allocation2 + $0x590] sm:$0xff]  ;;  %v478_v36 = vld [vmem:[#allocation2 + $0x578] sm:$0xff] }
  0xc2   :  { %611 = vmatpush1.bf16.msra.mxu0 %v408_v37  ;;  %775 = vmatpush1.bf16.msra.mxu1 %v410_v38  ;;  %v480_v37 = vld [vmem:[#allocation2 + $0x588] sm:$0xff] }
  0xc3   :  { %612 = vmatprep.subr.bf16.mxu0 %v414_v39  ;;  %776 = vmatprep.subr.bf16.mxu1 %v416_v40  ;;  %v484_v38 = vld [vmem:[#allocation2 + $0x5a8] sm:$0xff]  ;;  %v486_v39 = vld [vmem:[#allocation2 + $0x5b8] sm:$0xff]  ;;  %v483_v40 = vld [vmem:[#allocation2 + $0x5a0] sm:$0xff] }
  0xc6   :  { %613 = vmatpush1.bf16.msra.mxu0 %v413_v41  ;;  %777 = vmatpush1.bf16.msra.mxu1 %v415_v42  ;;  %v485_v41 = vld [vmem:[#allocation2 + $0x5b0] sm:$0xff] }
  0xc7   :  { %614 = vmatprep.subr.bf16.mxu0 %v419_v43  ;;  %778 = vmatprep.subr.bf16.mxu1 %v421_v44  ;;  %v489_v42 = vld [vmem:[#allocation2 + $0x5d0] sm:$0xff]  ;;  %v491_v43 = vld [vmem:[#allocation2 + $0x5e0] sm:$0xff]  ;;  %v488_v44 = vld [vmem:[#allocation2 + $0x5c8] sm:$0xff] }
  0xca   :  { %615 = vmatpush1.bf16.msra.mxu0 %v418_v45  ;;  %779 = vmatpush1.bf16.msra.mxu1 %v420_v46  ;;  %v490_v45 = vld [vmem:[#allocation2 + $0x5d8] sm:$0xff] }
  0xcb   :  { %616 = vmatprep.subr.bf16.mxu0 %v424_v47  ;;  %780 = vmatprep.subr.bf16.mxu1 %v426_v48  ;;  %v494_v46 = vld [vmem:[#allocation2 + $0x5f8] sm:$0xff]  ;;  %v496_v47 = vld [vmem:[#allocation2 + $0x608] sm:$0xff]  ;;  %v493_v48 = vld [vmem:[#allocation2 + $0x5f0] sm:$0xff] }
  0xce   :  { %617 = vmatpush1.bf16.msra.mxu0 %v423_v49  ;;  %781 = vmatpush1.bf16.msra.mxu1 %v425_v50  ;;  %v495_v49 = vld [vmem:[#allocation2 + $0x600] sm:$0xff] }
  0xcf   :  { %618 = vmatprep.subr.bf16.mxu0 %v429_v51  ;;  %782 = vmatprep.subr.bf16.mxu1 %v431_v52  ;;  %v499_v50 = vld [vmem:[#allocation2 + $0x620] sm:$0xff]  ;;  %v501_v51 = vld [vmem:[#allocation2 + $0x630] sm:$0xff]  ;;  %v498_v52 = vld [vmem:[#allocation2 + $0x618] sm:$0xff] }
  0xd2   :  { %619 = vmatpush1.bf16.msra.mxu0 %v428_v53  ;;  %783 = vmatpush1.bf16.msra.mxu1 %v430_v54  ;;  %v500_v53 = vld [vmem:[#allocation2 + $0x628] sm:$0xff] }
  0xd3   :  { %620 = vmatprep.subr.bf16.mxu0 %v434_v55  ;;  %784 = vmatprep.subr.bf16.mxu1 %v436_v56  ;;  %v504_v54 = vld [vmem:[#allocation2 + $0x648] sm:$0xff]  ;;  %v506_v55 = vld [vmem:[#allocation2 + $0x658] sm:$0xff]  ;;  %v503_v56 = vld [vmem:[#allocation2 + $0x640] sm:$0xff] }
  0xd6   :  { %621 = vmatpush1.bf16.msra.mxu0 %v433_v57  ;;  %785 = vmatpush1.bf16.msra.mxu1 %v435_v58  ;;  %v505_v57 = vld [vmem:[#allocation2 + $0x650] sm:$0xff] }
  0xd7   :  { %622 = vmatprep.subr.bf16.mxu0 %v439_v59  ;;  %786 = vmatprep.subr.bf16.mxu1 %v441_v60  ;;  %v509_v58 = vld [vmem:[#allocation2 + $0x670] sm:$0xff]  ;;  %v511_v59 = vld [vmem:[#allocation2 + $0x680] sm:$0xff]  ;;  %v508_v60 = vld [vmem:[#allocation2 + $0x668] sm:$0xff] }
  0xda   :  { %623 = vmatpush1.bf16.msra.mxu0 %v438_v61  ;;  %787 = vmatpush1.bf16.msra.mxu1 %v440_v62  ;;  %v510_v61 = vld [vmem:[#allocation2 + $0x678] sm:$0xff] }
  0xdb   :  { %624 = vmatprep.subr.bf16.mxu0 %v444_v63  ;;  %788 = vmatprep.subr.bf16.mxu1 %v446_v1  ;;  %v514_v62 = vld [vmem:[#allocation2 + $0x698] sm:$0xff]  ;;  %v516_v63 = vld [vmem:[#allocation2 + $0x6a8] sm:$0xff]  ;;  %v513_v1 = vld [vmem:[#allocation2 + $0x690] sm:$0xff] }
  0xde   :  { %625 = vmatpush1.bf16.msra.mxu0 %v443_v8  ;;  %789 = vmatpush1.bf16.msra.mxu1 %v445_v9  ;;  %v515_v8 = vld [vmem:[#allocation2 + $0x6a0] sm:$0xff] }
  0xdf   :  { %626 = vmatprep.subr.bf16.mxu0 %v449_v10  ;;  %790 = vmatprep.subr.bf16.mxu1 %v451_v11  ;;  %v519_v9 = vld [vmem:[#allocation2 + $0x6c0] sm:$0xff]  ;;  %v521_v10 = vld [vmem:[#allocation2 + $0x6d0] sm:$0xff]  ;;  %v518_v11 = vld [vmem:[#allocation2 + $0x6b8] sm:$0xff] }
  0xe2   :  { %627 = vmatpush1.bf16.msra.mxu0 %v448_v12  ;;  %791 = vmatpush1.bf16.msra.mxu1 %v450_v13  ;;  %v520_v12 = vld [vmem:[#allocation2 + $0x6c8] sm:$0xff] }
  0xe3   :  { %628 = vmatprep.subr.bf16.mxu0 %v454_v14  ;;  %792 = vmatprep.subr.bf16.mxu1 %v456_v15  ;;  %v524_v13 = vld [vmem:[#allocation2 + $0x6e8] sm:$0xff]  ;;  %v526_v14 = vld [vmem:[#allocation2 + $0x6f8] sm:$0xff]  ;;  %v523_v15 = vld [vmem:[#allocation2 + $0x6e0] sm:$0xff] }
  0xe6   :  { %629 = vmatpush1.bf16.msra.mxu0 %v453_v16  ;;  %793 = vmatpush1.bf16.msra.mxu1 %v455_v18  ;;  %v525_v16 = vld [vmem:[#allocation2 + $0x6f0] sm:$0xff] }
  0xe7   :  { %630 = vmatprep.subr.bf16.mxu0 %v459_v19  ;;  %794 = vmatprep.subr.bf16.mxu1 %v461_v20  ;;  %v529_v18 = vld [vmem:[#allocation2 + $0x710] sm:$0xff]  ;;  %v531_v19 = vld [vmem:[#allocation2 + $0x720] sm:$0xff]  ;;  %v528_v20 = vld [vmem:[#allocation2 + $0x708] sm:$0xff] }
  0xea   :  { %631 = vmatpush1.bf16.msra.mxu0 %v458_v21  ;;  %795 = vmatpush1.bf16.msra.mxu1 %v460_v0  ;;  %v530_v21 = vld [vmem:[#allocation2 + $0x718] sm:$0xff] }
  0xeb   :  { %641 = vmatprep.subr.bf16.mxu0 %v464_v23  ;;  %805 = vmatprep.subr.bf16.mxu1 %v466_v24  ;;  %v534_v0 = vld [vmem:[#allocation2 + $0x738] sm:$0xff]  ;;  %v536_v23 = vld [vmem:[#allocation2 + $0x748] sm:$0xff]  ;;  %v533_v24 = vld [vmem:[#allocation2 + $0x730] sm:$0xff] }
  0xed   :  { %633 = vmatmul.mubr.bf16.vlgmr.msra.gmra.mrb[0].mxu0 %v5039_v25  ;;  %797 = vmatmul.mubr.bf16.vlgmr.msra.gmra.mrb[0].mxu1 %v5039_v25 }
  0xee   :  { %642 = vmatpush1.bf16.msra.mxu0 %v463_v3  ;;  %806 = vmatpush1.bf16.msra.mxu1 %v465_v26  ;;  %v535_v3 = vld [vmem:[#allocation2 + $0x740] sm:$0xff] }
  0xef   :  { %643 = vmatprep.subr.bf16.mxu0 %v469_v27  ;;  %807 = vmatprep.subr.bf16.mxu1 %v471_v28  ;;  %v539_v26 = vld [vmem:[#allocation2 + $0x760] sm:$0xff]  ;;  %v541_v27 = vld [vmem:[#allocation2 + $0x770] sm:$0xff]  ;;  %v538_v28 = vld [vmem:[#allocation2 + $0x758] sm:$0xff] }
  0xf0   :  { %673 = vmatprep.mubr.bf16.mxu0 %v5043_v29  ;;  %837 = vmatprep.mubr.bf16.mxu1 %v5043_v29 }
  0xf2   :  { %644 = vmatpush1.bf16.msra.mxu0 %v468_v2  ;;  %808 = vmatpush1.bf16.msra.mxu1 %v470_v30  ;;  %v540_v2 = vld [vmem:[#allocation2 + $0x768] sm:$0xff] }
  0xf3   :  { %645 = vmatprep.subr.bf16.mxu0 %v474_v31  ;;  %809 = vmatprep.subr.bf16.mxu1 %v476_v32  ;;  %v544_v30 = vld [vmem:[#allocation2 + $0x788] sm:$0xff]  ;;  %v427_v31 = vld [vmem:[#allocation2 + $0x3e0] sm:$0xff]  ;;  %v5051_v32 = vpack.c.bf16 %v5009_v4, %v5009_v4 }
  0xf4   :  { %v392_v4 = vld [vmem:[#allocation2 + $0x2c8] sm:$0xff] }
  0xf6   :  { %646 = vmatpush1.bf16.msra.mxu0 %v473_v5  ;;  %810 = vmatpush1.bf16.msra.mxu1 %v475_v33  ;;  %v543_v5 = vld [vmem:[#allocation2 + $0x780] sm:$0xff]  ;;  %v546_v33 = vld [vmem:[#allocation2 + $0x798] sm:$0xff] }
  0xf7   :  { %647 = vmatprep.subr.bf16.mxu0 %v479_v34  ;;  %811 = vmatprep.subr.bf16.mxu1 %v481_v35  ;;  %v387_v34 = vld [vmem:[#allocation2 + $0x2a0] sm:$0xff]  ;;  %v432_v35 = vld [vmem:[#allocation2 + $0x408] sm:$0xff] }
  0xfa   :  { %648 = vmatpush1.bf16.msra.mxu0 %v478_v36  ;;  %812 = vmatpush1.bf16.msra.mxu1 %v480_v37  ;;  %v4812_v36 = vmov 0   ;;  %v437_v37 = vld [vmem:[#allocation2 + $0x430] sm:$0xff] }
  0xfb   :  { %649 = vmatprep.subr.bf16.mxu0 %v484_v38  ;;  %813 = vmatprep.subr.bf16.mxu1 %v486_v39  ;;  %v397_v38 = vld [vmem:[#allocation2 + $0x2f0] sm:$0xff]  ;;  %v5059_v39 = vpack.c.bf16 %v5019_v6, %v5019_v6  ;;  %v452_v6 = vld [vmem:[#allocation2 + $0x4a8] sm:$0xff] }
  0xfe   :  { %650 = vmatpush1.bf16.msra.mxu0 %v483_v40  ;;  %814 = vmatpush1.bf16.msra.mxu1 %v485_v41  ;;  %v442_v40 = vld [vmem:[#allocation2 + $0x458] sm:$0xff]  ;;  %v545_v41 = vld [vmem:[#allocation2 + $0x790] sm:$0xff] }
  0xff   :  { %651 = vmatprep.subr.bf16.mxu0 %v489_v42  ;;  %815 = vmatprep.subr.bf16.mxu1 %v491_v43  ;;  %v347_v42 = vld [vmem:[#allocation2 + $0x160] sm:$0xff]  ;;  %v402_v43 = vld [vmem:[#allocation2 + $0x318] sm:$0xff] }
 0x102   :  { %652 = vmatpush1.bf16.msra.mxu0 %v488_v44  ;;  %816 = vmatpush1.bf16.msra.mxu1 %v490_v45  ;;  %v447_v44 = vld [vmem:[#allocation2 + $0x480] sm:$0xff] }
 0x103   :  { %653 = vmatprep.subr.bf16.mxu0 %v494_v46  ;;  %817 = vmatprep.subr.bf16.mxu1 %v496_v47  ;;  %v307_v45 = vld [vmem:[#allocation2 + $0x20] sm:$0xff]  ;;  %v352_v46 = vld [vmem:[#allocation2 + $0x188] sm:$0xff] }
 0x104   :  { %v412_v47 = vld [vmem:[#allocation2 + $0x368] sm:$0xff] }
 0x106   :  { %654 = vmatpush1.bf16.msra.mxu0 %v493_v48  ;;  %818 = vmatpush1.bf16.msra.mxu1 %v495_v49  ;;  %v457_v48 = vld [vmem:[#allocation2 + $0x4d0] sm:$0xff]  ;;  %v312_v49 = vld [vmem:[#allocation2 + $0x48] sm:$0xff] }
 0x107   :  { %655 = vmatprep.subr.bf16.mxu0 %v499_v50  ;;  %819 = vmatprep.subr.bf16.mxu1 %v501_v51  ;;  %v357_v50 = vld [vmem:[#allocation2 + $0x1b0] sm:$0xff] }
 0x108   :  { %v417_v51 = vld [vmem:[#allocation2 + $0x390] sm:$0xff] }
 0x10a   :  { %656 = vmatpush1.bf16.msra.mxu0 %v498_v52  ;;  %820 = vmatpush1.bf16.msra.mxu1 %v500_v53  ;;  %v462_v52 = vld [vmem:[#allocation2 + $0x4f8] sm:$0xff]  ;;  %v317_v53 = vld [vmem:[#allocation2 + $0x70] sm:$0xff] }
 0x10b   :  { %657 = vmatprep.subr.bf16.mxu0 %v504_v54  ;;  %821 = vmatprep.subr.bf16.mxu1 %v506_v55  ;;  %v362_v54 = vld [vmem:[#allocation2 + $0x1d8] sm:$0xff] }
 0x10c   :  { %v422_v55 = vld [vmem:[#allocation2 + $0x3b8] sm:$0xff] }
 0x10e   :  { %658 = vmatpush1.bf16.msra.mxu0 %v503_v56  ;;  %822 = vmatpush1.bf16.msra.mxu1 %v505_v57  ;;  %v322_v56 = vld [vmem:[#allocation2 + $0x98] sm:$0xff]  ;;  %v367_v57 = vld [vmem:[#allocation2 + $0x200] sm:$0xff] }
 0x10f   :  { %659 = vmatprep.subr.bf16.mxu0 %v509_v58  ;;  %823 = vmatprep.subr.bf16.mxu1 %v511_v59  ;;  %v372_v58 = vld [vmem:[#allocation2 + $0x228] sm:$0xff] }
 0x110   :  { %v332_v59 = vld [vmem:[#allocation2 + $0xe8] sm:$0xff] }
 0x112   :  { %660 = vmatpush1.bf16.msra.mxu0 %v508_v60  ;;  %824 = vmatpush1.bf16.msra.mxu1 %v510_v61  ;;  %v377_v60 = vld [vmem:[#allocation2 + $0x250] sm:$0xff] }
 0x113   :  { %661 = vmatprep.subr.bf16.mxu0 %v514_v62  ;;  %825 = vmatprep.subr.bf16.mxu1 %v516_v63  ;;  %v337_v61 = vld [vmem:[#allocation2 + $0x110] sm:$0xff]  ;;  %v382_v62 = vld [vmem:[#allocation2 + $0x278] sm:$0xff] }
 0x114   :  { %v342_v63 = vld [vmem:[#allocation2 + $0x138] sm:$0xff] }
 0x116   :  { %662 = vmatpush1.bf16.msra.mxu0 %v513_v1  ;;  %826 = vmatpush1.bf16.msra.mxu1 %v515_v8  ;;  %v507_v1 = vld [vmem:[#allocation2 + $0x660] sm:$0xff] }
 0x117   :  { %663 = vmatprep.subr.bf16.mxu0 %v519_v9  ;;  %827 = vmatprep.subr.bf16.mxu1 %v521_v10  ;;  %v467_v8 = vld [vmem:[#allocation2 + $0x520] sm:$0xff]  ;;  %v512_v9 = vld [vmem:[#allocation2 + $0x688] sm:$0xff]  ;;  %v517_v10 = vld [vmem:[#allocation2 + $0x6b0] sm:$0xff] }
 0x11a   :  { %664 = vmatpush1.bf16.msra.mxu0 %v518_v11  ;;  %828 = vmatpush1.bf16.msra.mxu1 %v520_v12  ;;  %v477_v11 = vld [vmem:[#allocation2 + $0x570] sm:$0xff]  ;;  %v522_v12 = vld [vmem:[#allocation2 + $0x6d8] sm:$0xff] }
 0x11b   :  { %665 = vmatprep.subr.bf16.mxu0 %v524_v13  ;;  %829 = vmatprep.subr.bf16.mxu1 %v526_v14  ;;  %v482_v13 = vld [vmem:[#allocation2 + $0x598] sm:$0xff]  ;;  %v527_v14 = vld [vmem:[#allocation2 + $0x700] sm:$0xff] }
 0x11e   :  { %666 = vmatpush1.bf16.msra.mxu0 %v523_v15  ;;  %830 = vmatpush1.bf16.msra.mxu1 %v525_v16  ;;  %v487_v15 = vld [vmem:[#allocation2 + $0x5c0] sm:$0xff]  ;;  %v532_v16 = vld [vmem:[#allocation2 + $0x728] sm:$0xff] }
 0x11f   :  { %667 = vmatprep.subr.bf16.mxu0 %v529_v18  ;;  %831 = vmatprep.subr.bf16.mxu1 %v531_v19  ;;  %v537_v18 = vld [vmem:[#allocation2 + $0x750] sm:$0xff]  ;;  %v542_v19 = vld [vmem:[#allocation2 + $0x778] sm:$0xff] }
 0x122   :  { %668 = vmatpush1.bf16.msra.mxu0 %v528_v20  ;;  %832 = vmatpush1.bf16.msra.mxu1 %v530_v21  ;;  %v502_v20 = vld [vmem:[#allocation2 + $0x638] sm:$0xff]  ;;  %v4813_v21 = vmov 0.0  }
 0x123   :  { %669 = vmatprep.subr.bf16.mxu0 %v534_v0  ;;  %833 = vmatprep.subr.bf16.mxu1 %v536_v23  ;;  %v547_v0 = vld [vmem:[#allocation2 + $0x7a0] sm:$0xff] }
 0x126   :  { %670 = vmatpush1.bf16.msra.mxu0 %v533_v24  ;;  %834 = vmatpush1.bf16.msra.mxu1 %v535_v3 }
 0x127   :  { %671 = vmatprep.subr.bf16.mxu0 %v539_v26  ;;  %835 = vmatprep.subr.bf16.mxu1 %v541_v27 }
 0x12a   :  { %672 = vmatpush1.bf16.msra.mxu0 %v538_v28  ;;  %836 = vmatpush1.bf16.msra.mxu1 %v540_v2 }
 0x12b   :  { %682 = vmatprep.subr.bf16.mxu0 %v544_v30  ;;  %4297 = vmatprep.subr.bf16.mxu1 %v427_v31 }
 0x12d   :  { %674 = vmatmul.mubr.bf16.vlgmr.msra.gmra.mrb[0].mxu0 %v5051_v32  ;;  %838 = vmatmul.mubr.bf16.vlgmr.msra.gmra.mrb[0].mxu1 %v5051_v32 }
 0x12e   :  { %683 = vmatpush1.bf16.msra.mxu0 %v543_v5  ;;  %714 = vmatprep.mubr.bf16.mxu0 %v4812_v36 }
 0x12f   :  { %846 = vmatprep.subr.bf16.mxu0 %v546_v33  ;;  %4298 = vmatpush3.bf16.msra.mxu1 %v387_v34 }
 0x130   :  { %4299 = vmatprep.subr.bf16.mxu1 %v432_v35  ;;  %959 = vmatprep.mubr.bf16.mxu1 %v5031_v22  ;;  %v407_v22 = vld [vmem:[#allocation2 + $0x340] sm:$0xff] }
 0x133   :  { %4300 = vmatpush3.bf16.msra.mxu1 %v392_v4 }
 0x134   :  { %4301 = vmatprep.subr.bf16.mxu1 %v437_v37 }
 0x137   :  { %4302 = vmatpush3.bf16.msra.mxu1 %v397_v38 }
 0x138   :  { %4303 = vmatprep.subr.bf16.mxu1 %v442_v40 }
 0x139   :  { %4257 = vmatmul.mubr.msk.bf16.vlgmr.msra.gmra.mrb[0].mxu0 %vm555_vm0, %v5059_v39 }
 0x13a   :  { %847 = vmatpush1.bf16.msra.mxu0 %v545_v41  ;;  %878 = vmatprep.mubr.bf16.mxu0 %v4812_v36 }
 0x13b   :  { %4275 = vmatprep.subr.bf16.mxu0 %v347_v42  ;;  %4304 = vmatpush3.bf16.msra.mxu1 %v402_v43 }
 0x13c   :  { %4305 = vmatprep.subr.bf16.mxu1 %v447_v44 }
 0x13f   :  { %4306 = vmatpush3.bf16.msra.mxu1 %v407_v22 }
 0x140   :  { %4307 = vmatprep.subr.bf16.mxu1 %v452_v6 }
 0x141   :  { %4258 = vmatmul.mubr.msk.bf16.vlgmr.msra.gmra.mrb[4].mxu0 %vm555_vm0, %v5059_v39 }
 0x142   :  { %4276 = vmatpush3.bf16.msra.mxu0 %v307_v45  ;;  %919 = vmatprep.mubr.bf16.mxu0 %v5021_v7  ;;  %v327_v7 = vld [vmem:[#allocation2 + $0xc0] sm:$0xff] }
 0x143   :  { %4277 = vmatprep.subr.bf16.mxu0 %v352_v46  ;;  %4308 = vmatpush3.bf16.msra.mxu1 %v412_v47 }
 0x144   :  { %4309 = vmatprep.subr.bf16.mxu1 %v457_v48 }
 0x146   :  { %4278 = vmatpush3.bf16.msra.mxu0 %v312_v49 }
 0x147   :  { %4279 = vmatprep.subr.bf16.mxu0 %v357_v50  ;;  %4310 = vmatpush3.bf16.msra.mxu1 %v417_v51 }
 0x148   :  { %4311 = vmatprep.subr.bf16.mxu1 %v462_v52 }
 0x14a   :  { %4280 = vmatpush3.bf16.msra.mxu0 %v317_v53 }
 0x14b   :  { %4281 = vmatprep.subr.bf16.mxu0 %v362_v54  ;;  %4312 = vmatpush3.bf16.msra.mxu1 %v422_v55 }
 0x14e   :  { %4282 = vmatpush3.bf16.msra.mxu0 %v322_v56  ;;  %960 = vmatmul.mubr.bf16.vlgmr.msra.gmra.mrb[4].mxu1 %v5039_v25  ;;  %v472_v25 = vld [vmem:[#allocation2 + $0x548] sm:$0xff] }
 0x14f   :  { %4283 = vmatprep.subr.bf16.mxu0 %v367_v57 }
 0x152   :  { %4284 = vmatpush3.bf16.msra.mxu0 %v327_v7 }
 0x153   :  { %4285 = vmatprep.subr.bf16.mxu0 %v372_v58 }
 0x156   :  { %4286 = vmatpush3.bf16.msra.mxu0 %v332_v59 }
 0x157   :  { %4287 = vmatprep.subr.bf16.mxu0 %v377_v60 }
 0x15a   :  { %4288 = vmatpush3.bf16.msra.mxu0 %v337_v61 }
 0x15b   :  { %4289 = vmatprep.subr.bf16.mxu0 %v382_v62 }
 0x15e   :  { %4290 = vmatpush3.bf16.msra.mxu0 %v342_v63 }
 0x15f   :  { %4319 = vmatprep.subr.bf16.mxu0 %v507_v1 }
 0x161   :  { %920 = vmatmul.mubr.bf16.vlgmr.msra.gmra.mrb[8].mxu0 %v5027_v17  ;;  %v492_v17 = vld [vmem:[#allocation2 + $0x5e8] sm:$0xff] }
 0x162   :  { %4320 = vmatpush3.bf16.msra.mxu0 %v467_v8  ;;  %999 = vmatprep.mubr.bf16.mxu0 %v5043_v29  ;;  %v497_v29 = vld [vmem:[#allocation2 + $0x610] sm:$0xff] }
 0x163   :  { %4321 = vmatprep.subr.bf16.mxu0 %v512_v9 }
 0x166   :  { %4322 = vmatpush3.bf16.msra.mxu0 %v472_v25 }
 0x167   :  { %4323 = vmatprep.subr.bf16.mxu0 %v517_v10 }
 0x16a   :  { %4324 = vmatpush3.bf16.msra.mxu0 %v477_v11 }
 0x16b   :  { %4325 = vmatprep.subr.bf16.mxu0 %v522_v12 }
 0x16e   :  { %4326 = vmatpush3.bf16.msra.mxu0 %v482_v13 }
 0x16f   :  { %4327 = vmatprep.subr.bf16.mxu0 %v527_v14 }
 0x172   :  { %4328 = vmatpush3.bf16.msra.mxu0 %v487_v15 }
 0x173   :  { %4329 = vmatprep.subr.bf16.mxu0 %v532_v16 }
 0x176   :  { %4330 = vmatpush3.bf16.msra.mxu0 %v492_v17 }
 0x177   :  { %4331 = vmatprep.subr.bf16.mxu0 %v537_v18 }
 0x17a   :  { %4332 = vmatpush3.bf16.msra.mxu0 %v497_v29 }
 0x17b   :  { %4333 = vmatprep.subr.bf16.mxu0 %v542_v19 }
 0x17e   :  { %4334 = vmatpush3.bf16.msra.mxu0 %v502_v20 }
 0x17f   :  { %4462 = vmatprep.subr.bf16.mxu0 %v4813_v21 }
 0x181   :  { %1000 = vmatmul.mubr.bf16.vlgmr.msra.gmra.mrb[12].mxu0 %v5051_v32 }
 0x182   :  { %4463 = vmatpush3.bf16.msra.mxu0 %v547_v0  ;;  %4464 = vmatprep.mubr.msk.bf16.mxu0 %vm4814_vm1, %v4813_v21 }
 0x189   :  { %4465 = vmatmul.mubr.msk.bf16.vlgmr.msra.gmra.mrb[16].mxu0 %vm555_vm0, %v5059_v39 }
 0x200   :  { %v839_v23 = vpop.f32.mrb[0].mxu1 }
 0x201   :  { %v841_v24 = vpop.f32.mrb[1].mxu1 }
 0x202   :  { %v843_v3 = vpop.f32.mrb[2].mxu1 }
 0x203   :  { %v844_v26 = vpop.f32.mrb[3].mxu1 }
 0x20c   :  { %v716_v27 = vpop.f32.mrb[0].mxu0 }
 0x20d   :  { %v1047_v28 = vrot.slane %v716_v27, 4  ;;  %v718_v2 = vpop.f32.mrb[1].mxu0 }
 0x20e   :  { %v1053_v30 = vrot.slane %v718_v2, 4  ;;  %v720_v31 = vpop.f32.mrb[2].mxu0 }
 0x20f   :  { %v1048_v5 = vadd.f32 %v1047_v28, %v716_v27  ;;  %v721_v33 = vpop.f32.mrb[3].mxu0 }
 0x210   :  { %v1054_v32 = vadd.f32 %v1053_v30, %v718_v2 }
 0x211   :  { %v1049_v34 = vrot.slane %v1048_v5, 2 }
 0x212   :  { %v1055_v35 = vrot.slane %v1054_v32, 2 }
 0x213   :  { %v1050_v4 = vadd.f32 %v1049_v34, %v1048_v5  ;;  %v1151_v5 = vlaneseq }
 0x214   :  { %v1056_v37 = vadd.f32 %v1055_v35, %v1054_v32  ;;  %v880_v38 = vpop.f32.mrb[4].mxu0 }
 0x215   :  { %v1051_v40 = vrot.slane %v1050_v4, 1  ;;  %v4488_v41 = vadd.f32 %v880_v38, %v839_v23  ;;  %v882_v39 = vpop.f32.mrb[5].mxu0 }
 0x216   :  { %v1057_v42 = vrot.slane %v1056_v37, 1  ;;  %v4489_v43 = vadd.f32 %v882_v39, %v841_v24  ;;  %v884_v44 = vpop.f32.mrb[6].mxu0 }
 0x217   :  { %v1052_v22 = vadd.f32 %v1051_v40, %v1050_v4  ;;  %v1059_v6 = vrot.slane %v4488_v41, 4  ;;  %v885_v45 = vpop.f32.mrb[7].mxu0  ;;  %v1128_v40 = vld [vmem:[#allocation11] ss:$8 sm:$0xf] }
 0x218   :  { %v1058_v46 = vadd.f32 %v1057_v42, %v1056_v37  ;;  %v1065_v47 = vrot.slane %v4489_v43, 4  ;;  %v1129_v42 = vld [vmem:[#allocation11] ss:$8 sm:$0x10] }
 0x219   :  { %v1078_v48 = vmul.f32 0.125, %v1052_v22  ;;  %v1060_v49 = vadd.f32 %v4488_v41, %v1059_v6  ;;  %v1132_v22 = vld [vmem:[#allocation11 + $0x1] ss:$8 sm:$0xf] }
 0x21a   :  { %v1079_v50 = vmul.f32 0.125, %v1058_v46  ;;  %v1066_v51 = vadd.f32 %v4489_v43, %v1065_v47  ;;  %v1133_v6 = vld [vmem:[#allocation11 + $0x1] ss:$8 sm:$0x10]  ;;  %v5094_v46 = vor.u32 %v1129_v42, %v1128_v40 }
 0x21b   :  { %v5076_v52 = vsub.f32 %v716_v27, %v1078_v48  ;;  %v1061_v53 = vrot.slane %v1060_v49, 2 }
 0x21c   :  { %v5078_v54 = vsub.f32 %v718_v2, %v1079_v50  ;;  %v1067_v55 = vrot.slane %v1066_v51, 2 }
 0x21d   :  { %v1088_v56 = vmul.f32 %v5076_v52, %v5076_v52  ;;  %v1062_v57 = vadd.f32 %v1061_v53, %v1060_v49 }
 0x21e   :  { %v1089_v7 = vmul.f32 %v5078_v54, %v5078_v54  ;;  %v1068_v58 = vadd.f32 %v1067_v55, %v1066_v51  ;;  %v5102_v55 = vor.u32 %v1133_v6, %v1132_v22 }
 0x21f   :  { %v1093_v59 = vrot.slane %v1088_v56, 4  ;;  %v1063_v60 = vrot.slane %v1062_v57, 1 }
 0x220   :  { %v1099_v61 = vrot.slane %v1089_v7, 4  ;;  %v1069_v62 = vrot.slane %v1068_v58, 1 }
 0x221   :  { %v1094_v63 = vadd.f32 %v1093_v59, %v1088_v56  ;;  %v1064_v1 = vadd.f32 %v1063_v60, %v1062_v57  ;;  %v4313_v8 = vpop.f32.mrb[4].mxu1 }
 0x222   :  { %v1100_v9 = vadd.f32 %v1099_v61, %v1089_v7  ;;  %v1070_v25 = vadd.f32 %v1069_v62, %v1068_v58  ;;  %v4314_v10 = vpop.f32.mrb[5].mxu1 }
 0x223   :  { %v1095_v11 = vrot.slane %v1094_v63, 2  ;;  %v1080_v12 = vmul.f32 0.125, %v1064_v1  ;;  %v4315_v13 = vadd.f32 %v4314_v10, %v4313_v8  ;;  %v4316_v14 = vpop.f32.mrb[6].mxu1 }
 0x224   :  { %v1101_v15 = vrot.slane %v1100_v9, 2  ;;  %v1081_v16 = vmul.f32 0.125, %v1070_v25  ;;  %v4317_v17 = vpop.f32.mrb[7].mxu1 }
 0x225   :  { %v1096_v18 = vadd.f32 %v1095_v11, %v1094_v63  ;;  %v5084_v29 = vsub.f32 %v4488_v41, %v1080_v12  ;;  %v5092_v41 = vshrl.u32 %v1151_v5, 7 }
 0x226   :  { %v1102_v19 = vadd.f32 %v1101_v15, %v1100_v9  ;;  %v5086_v20 = vsub.f32 %v4489_v43, %v1081_v16 }
 0x227   :  { %v1097_v0 = vrot.slane %v1096_v18, 1  ;;  %v1090_v23 = vmul.f32 %v5084_v29, %v5084_v29  ;;  %v5097_v47 = vsub.s32 0, %v5092_v41  ;;  %v5100_v50 = vsub.s32 1, %v5092_v41 }
 0x228   :  { %v1103_v24 = vrot.slane %v1102_v19, 1  ;;  %v1091_v3 = vmul.f32 %v5086_v20, %v5086_v20  ;;  %v5115_v15 = vsub.s32 2, %v5092_v41  ;;  %v5118_v17 = vsub.s32 3, %v5092_v41 }
 0x229   :  { %v1098_v26 = vadd.f32 %v1097_v0, %v1096_v18  ;;  %v1105_v27 = vrot.slane %v1090_v23, 4  ;;  %v1154_v60 = vrot.slane %v5094_v46, %v5097_v47  ;;  %v1158_v1 = vrot.slane %v5094_v46, %v5100_v50 }
 0x22a   :  { %v1104_v28 = vadd.f32 %v1103_v24, %v1102_v19  ;;  %v1111_v2 = vrot.slane %v1091_v3, 4  ;;  %v1185_v25 = vrot.slane %v5102_v55, %v5097_v47  ;;  %v1189_v11 = vrot.slane %v5102_v55, %v5100_v50 }
 0x22b   :  { %v1123_v30 = vmul.f32 0.125, %v1098_v26  ;;  %v1106_v31 = vadd.f32 %v1105_v27, %v1090_v23  ;;  %v1166_v24 = vrot.slane %v5094_v46, %v5118_v17  ;;  %v1193_v27 = vrot.slane %v5102_v55, %v5115_v15 }
 0x22c   :  { %v1124_v33 = vmul.f32 0.125, %v1104_v28  ;;  %v1112_v32 = vadd.f32 %v1111_v2, %v1091_v3  ;;  %v1197_v2 = vrot.slane %v5102_v55, %v5118_v17 }
 0x22d   :  { %v1135_v34 = vadd.f32 1e-05, %v1123_v30  ;;  %v1107_v35 = vrot.slane %v1106_v31, 2 }
 0x22e   :  { %v1136_v4 = vadd.f32 1e-05, %v1124_v33  ;;  %v1113_v37 = vrot.slane %v1112_v32, 2 }
 0x22f   :  { %4602 = vrsqrt.f32 %v1135_v34  ;;  %v1108_v38 = vadd.f32 %v1107_v35, %v1106_v31 }
 0x230   :  { %4604 = vrsqrt.f32 %v1136_v4  ;;  %v1114_v39 = vadd.f32 %v1113_v37, %v1112_v32 }
 0x231   :  { %v1109_v43 = vrot.slane %v1108_v38, 1 }
 0x232   :  { %v1115_v44 = vrot.slane %v1114_v39, 1 }
 0x233   :  { %v1110_v45 = vadd.f32 %v1109_v43, %v1108_v38 }
 0x234   :  { %v1116_v48 = vadd.f32 %v1115_v44, %v1114_v39  ;;  %v4291_v49 = vpop.f32.mrb[8].mxu0 }
 0x235   :  { %v1125_v51 = vmul.f32 0.125, %v1110_v45  ;;  %v4292_v53 = vpop.f32.mrb[9].mxu0 }
 0x236   :  { %v1126_v56 = vmul.f32 0.125, %v1116_v48  ;;  %v4293_v57 = vadd.f32 %v4292_v53, %v4291_v49  ;;  %v4294_v7 = vpop.f32.mrb[10].mxu0 }
 0x237   :  { %v1137_v58 = vadd.f32 1e-05, %v1125_v51  ;;  %v4295_v59 = vpop.f32.mrb[11].mxu0 }
 0x238   :  { %v1138_v61 = vadd.f32 1e-05, %v1126_v56  ;;  %v962_v62 = vadd.f32 %v4315_v13, %v4293_v57 }
 0x239   :  { %v4603_v63 = vpop.eup %4602  ;;  %4606 = vrsqrt.f32 %v1137_v58 }
 0x23a   :  { %v4605_v8 = vpop.eup %4604  ;;  %v1145_v9 = vmul.f32 %v4603_v63, %v5076_v52  ;;  %4608 = vrsqrt.f32 %v1138_v61 }
 0x23b   :  { %v1146_v10 = vmul.f32 %v4605_v8, %v5078_v54  ;;  %v1162_v54 = vrot.slane %v5094_v46, %v5115_v15 }
 0x23c   :  { %v1176_v12 = vmul.f32 %v1154_v60, %v1145_v9 }
 0x23d   :  { %v1177_v14 = vmul.f32 %v1158_v1, %v1146_v10 }
 0x23e   :  { %v1207_v13 = vadd.f32 %v1185_v25, %v1176_v12  ;;  %v5137_v25 = vsub.s32 4, %v5092_v41 }
 0x23f   :  { %v1208_v16 = vadd.f32 %v1189_v11, %v1177_v14 }
 0x240   :  { %vm1212_vm2 = vcmp.ge.f32.partialorder %v1207_v13, 0.0  ;;  %v1217_v52 = vmul.f32 0.4, %v1207_v13  ;;  %v1170_v10 = vrot.slane %v5094_v46, %v5137_v25  ;;  %v1201_v14 = vrot.slane %v5102_v55, %v5137_v25 }
 0x241   :  { %vm1213_vm3 = vcmp.ge.f32.partialorder %v1208_v16, 0.0  ;;  %v1218_v18 = vmul.f32 0.4, %v1208_v16 }
 0x242   :  { %v5120_v19 = vsel %vm1212_vm2, %v1207_v13, %v1217_v52 }
 0x243   :  { %v4607_v0 = vpop.eup %4606  ;;  %v1223_v23 = vsel %vm1213_vm3, %v1208_v16, %v1218_v18 }
 0x244   :  { %v4609_v3 = vpop.eup %4608  ;;  %v1147_v26 = vmul.f32 %v4607_v0, %v5084_v29 }
 0x245   :  { %v1148_v28 = vmul.f32 %v4609_v3, %v5086_v20 }
 0x246   :  { %v1178_v30 = vmul.f32 %v1162_v54, %v1147_v26 }
 0x247   :  { %v1179_v31 = vmul.f32 %v1166_v24, %v1148_v28 }
 0x248   :  { %v1209_v5 = vadd.f32 %v1193_v27, %v1178_v30 }
 0x249   :  { %v1210_v33 = vadd.f32 %v1197_v2, %v1179_v31 }
 0x24a   :  { %vm1214_vm4 = vcmp.ge.f32.partialorder %v1209_v5, 0.0  ;;  %v1219_v32 = vmul.f32 0.4, %v1209_v5 }
 0x24b   :  { %vm1215_vm5 = vcmp.ge.f32.partialorder %v1210_v33, 0.0  ;;  %v1220_v34 = vmul.f32 0.4, %v1210_v33 }
 0x24c   :  { %v5132_v35 = vsel %vm1214_vm4, %v1209_v5, %v1219_v32 }
 0x24d   :  { %v5134_v4 = vsel %vm1215_vm5, %v1210_v33, %v1220_v34 }
 0x254   :  { %v4335_v29 = vpop.f32.mrb[12].mxu0 }
 0x255   :  { %v4336_v37 = vpop.f32.mrb[13].mxu0 }
 0x256   :  { %v4337_v38 = vadd.f32 %v4336_v37, %v4335_v29  ;;  %v4338_v40 = vpop.f32.mrb[14].mxu0 }
 0x257   :  { %v4339_v20 = vpop.f32.mrb[15].mxu0 }
 0x258   :  { %v1002_v39 = vadd.f32 %v4337_v38, %v962_v62 }
 0x25c   :  { %v1041_v42 = vpop.f32.mrb[16].mxu0 }
 0x25d   :  { %v1042_v43 = vadd.f32 %v1041_v42, %v1002_v39  ;;  %v4466_v44 = vpop.f32.mrb[17].mxu0 }
 0x25e   :  { %v1044_v22 = vpop.f32.mrb[18].mxu0 }
 0x25f   :  { %v1071_v6 = vrot.slane %v1042_v43, 4  ;;  %v4467_v45 = vpop.f32.mrb[19].mxu0 }
 0x261   :  { %v1072_v48 = vadd.f32 %v1071_v6, %v1042_v43 }
 0x263   :  { %v1073_v49 = vrot.slane %v1072_v48, 2 }
 0x265   :  { %v1074_v51 = vadd.f32 %v1073_v49, %v1072_v48 }
 0x267   :  { %v1075_v53 = vrot.slane %v1074_v51, 1 }
 0x269   :  { %v1076_v56 = vadd.f32 %v1075_v53, %v1074_v51 }
 0x26b   :  { %v1082_v57 = vmul.f32 0.125, %v1076_v56 }
 0x26d   :  { %v1087_v7 = vsub.f32 %v1042_v43, %v1082_v57 }
 0x26f   :  { %v1092_v58 = vmul.f32 %v1087_v7, %v1087_v7 }
 0x271   :  { %v1117_v59 = vrot.slane %v1092_v58, 4 }
 0x273   :  { %v1118_v60 = vadd.f32 %v1117_v59, %v1092_v58 }
 0x275   :  { %v1119_v61 = vrot.slane %v1118_v60, 2 }
 0x277   :  { %v1120_v63 = vadd.f32 %v1119_v61, %v1118_v60 }
 0x279   :  { %v1121_v1 = vrot.slane %v1120_v63, 1 }
 0x27b   :  { %v1122_v62 = vadd.f32 %v1121_v1, %v1120_v63 }
 0x27d   :  { %v1127_v8 = vmul.f32 0.125, %v1122_v62 }
 0x27f   :  { %v1139_v9 = vadd.f32 1e-05, %v1127_v8 }
 0x281   :  { %4610 = vrsqrt.f32 %v1139_v9 }
 0x28b   :  { %v4611_v11 = vpop.eup %4610 }
 0x28c   :  { %v1149_v12 = vmul.f32 %v4611_v11, %v1087_v7 }
 0x28e   :  { %v1180_v13 = vmul.f32 %v1170_v10, %v1149_v12 }
 0x290   :  { %v1211_v16 = vadd.f32 %v1201_v14, %v1180_v13 }
 0x292   :  { %vm1216_vm6 = vcmp.ge.f32.partialorder %v1211_v16, 0.0  ;;  %v1221_v52 = vmul.f32 0.4, %v1211_v16 }
 0x294   :  { %v5143_v18 = vsel %vm1216_vm6, %v1211_v16, %v1221_v52 }
 0x295   :  { %4760 = dma.done.wait [#allocation10 + $0x1], 20480 }
 0x296   :  { %4761 = vsyncadd [#allocation10 + $0x1], 4294946816  ;;  %v1392_v54 = vpack.c.bf16 %v1223_v23, %v1223_v23  ;;  %v1232_v0 = vld [vmem:[#allocation3 + $0x8] sm:$0xff]  ;;  %v1234_v24 = vld [vmem:[#allocation3 + $0x18] sm:$0xff] }
 0x297   :  { %v1231_v3 = vld [vmem:[#allocation3] sm:$0xff]  ;;  %1396 = vmatprep.subr.bf16.mxu1 %v1232_v0  ;;  %1519 = vmatprep.subr.bf16.mxu0 %v1234_v24  ;;  %v1233_v46 = vld [vmem:[#allocation3 + $0x10] sm:$0xff]  ;;  %v1236_v26 = vld [vmem:[#allocation3 + $0x28] sm:$0xff] }
 0x298   :  { %1428 = vmatprep.mubr.bf16.mxu1 %v1392_v54  ;;  %1551 = vmatprep.mubr.bf16.mxu0 %v1392_v54  ;;  %v1238_v27 = vld [vmem:[#allocation3 + $0x38] sm:$0xff]  ;;  %v1235_v55 = vld [vmem:[#allocation3 + $0x20] sm:$0xff]  ;;  %v1237_v28 = vld [vmem:[#allocation3 + $0x30] sm:$0xff] }
 0x299   :  { %1397 = vmatpush1.bf16.msra.mxu1 %v1231_v3  ;;  %1520 = vmatpush1.bf16.msra.mxu0 %v1233_v46  ;;  %v1240_v2 = vld [vmem:[#allocation3 + $0x48] sm:$0xff]  ;;  %v1242_v30 = vld [vmem:[#allocation3 + $0x58] sm:$0xff]  ;;  %v1239_v23 = vld [vmem:[#allocation3 + $0x40] sm:$0xff] }
 0x29a   :  { %1398 = vmatprep.subr.bf16.mxu1 %v1236_v26  ;;  %1521 = vmatprep.subr.bf16.mxu0 %v1238_v27  ;;  %v1241_v31 = vld [vmem:[#allocation3 + $0x50] sm:$0xff]  ;;  %v1244_v5 = vld [vmem:[#allocation3 + $0x68] sm:$0xff]  ;;  %v1246_v33 = vld [vmem:[#allocation3 + $0x78] sm:$0xff] }
 0x29b   :  { %v1243_v32 = vld [vmem:[#allocation3 + $0x60] sm:$0xff]  ;;  %v1245_v34 = vld [vmem:[#allocation3 + $0x70] sm:$0xff]  ;;  %v1248_v29 = vld [vmem:[#allocation3 + $0x88] sm:$0xff] }
 0x29c   :  { %v1250_v37 = vld [vmem:[#allocation3 + $0x98] sm:$0xff]  ;;  %v1247_v38 = vld [vmem:[#allocation3 + $0x80] sm:$0xff]  ;;  %v1249_v40 = vld [vmem:[#allocation3 + $0x90] sm:$0xff] }
 0x29d   :  { %1399 = vmatpush1.bf16.msra.mxu1 %v1235_v55  ;;  %1522 = vmatpush1.bf16.msra.mxu0 %v1237_v28  ;;  %v1252_v20 = vld [vmem:[#allocation3 + $0xa8] sm:$0xff]  ;;  %v1254_v39 = vld [vmem:[#allocation3 + $0xb8] sm:$0xff]  ;;  %v1251_v42 = vld [vmem:[#allocation3 + $0xa0] sm:$0xff] }
 0x29e   :  { %1400 = vmatprep.subr.bf16.mxu1 %v1240_v2  ;;  %1523 = vmatprep.subr.bf16.mxu0 %v1242_v30  ;;  %v1253_v43 = vld [vmem:[#allocation3 + $0xb0] sm:$0xff]  ;;  %v1256_v44 = vld [vmem:[#allocation3 + $0xc8] sm:$0xff]  ;;  %v1258_v22 = vld [vmem:[#allocation3 + $0xd8] sm:$0xff] }
 0x29f   :  { %v1255_v6 = vld [vmem:[#allocation3 + $0xc0] sm:$0xff]  ;;  %v1257_v45 = vld [vmem:[#allocation3 + $0xd0] sm:$0xff]  ;;  %v1260_v48 = vld [vmem:[#allocation3 + $0xe8] sm:$0xff] }
 0x2a0   :  { %v1262_v49 = vld [vmem:[#allocation3 + $0xf8] sm:$0xff]  ;;  %v1259_v51 = vld [vmem:[#allocation3 + $0xe0] sm:$0xff]  ;;  %v1261_v53 = vld [vmem:[#allocation3 + $0xf0] sm:$0xff] }
 0x2a1   :  { %1401 = vmatpush1.bf16.msra.mxu1 %v1239_v23  ;;  %1524 = vmatpush1.bf16.msra.mxu0 %v1241_v31  ;;  %v1264_v56 = vld [vmem:[#allocation3 + $0x108] sm:$0xff]  ;;  %v1266_v57 = vld [vmem:[#allocation3 + $0x118] sm:$0xff]  ;;  %v1263_v7 = vld [vmem:[#allocation3 + $0x100] sm:$0xff] }
 0x2a2   :  { %1402 = vmatprep.subr.bf16.mxu1 %v1244_v5  ;;  %1525 = vmatprep.subr.bf16.mxu0 %v1246_v33  ;;  %v1265_v58 = vld [vmem:[#allocation3 + $0x110] sm:$0xff]  ;;  %v1268_v59 = vld [vmem:[#allocation3 + $0x128] sm:$0xff]  ;;  %v1270_v60 = vld [vmem:[#allocation3 + $0x138] sm:$0xff] }
 0x2a3   :  { %v1267_v61 = vld [vmem:[#allocation3 + $0x120] sm:$0xff]  ;;  %v1269_v63 = vld [vmem:[#allocation3 + $0x130] sm:$0xff]  ;;  %v1272_v1 = vld [vmem:[#allocation3 + $0x148] sm:$0xff] }
 0x2a4   :  { %v1274_v62 = vld [vmem:[#allocation3 + $0x158] sm:$0xff]  ;;  %v1271_v8 = vld [vmem:[#allocation3 + $0x140] sm:$0xff]  ;;  %v1273_v9 = vld [vmem:[#allocation3 + $0x150] sm:$0xff] }
 0x2a5   :  { %1403 = vmatpush1.bf16.msra.mxu1 %v1243_v32  ;;  %1526 = vmatpush1.bf16.msra.mxu0 %v1245_v34  ;;  %v1276_v10 = vld [vmem:[#allocation3 + $0x168] sm:$0xff]  ;;  %v1278_v11 = vld [vmem:[#allocation3 + $0x178] sm:$0xff]  ;;  %v1275_v12 = vld [vmem:[#allocation3 + $0x160] sm:$0xff]  ;;  %v1391_v32 = vpack.c.bf16 %v5120_v19, %v5120_v19 }
 0x2a6   :  { %1404 = vmatprep.subr.bf16.mxu1 %v1248_v29  ;;  %1527 = vmatprep.subr.bf16.mxu0 %v1250_v37  ;;  %v1277_v14 = vld [vmem:[#allocation3 + $0x170] sm:$0xff]  ;;  %v1280_v13 = vld [vmem:[#allocation3 + $0x188] sm:$0xff]  ;;  %v1282_v16 = vld [vmem:[#allocation3 + $0x198] sm:$0xff] }
 0x2a7   :  { %v1279_v52 = vld [vmem:[#allocation3 + $0x180] sm:$0xff]  ;;  %v1281_v54 = vld [vmem:[#allocation3 + $0x190] sm:$0xff]  ;;  %v1284_v0 = vld [vmem:[#allocation3 + $0x1a8] sm:$0xff] }
 0x2a8   :  { %v1286_v24 = vld [vmem:[#allocation3 + $0x1b8] sm:$0xff]  ;;  %v1283_v3 = vld [vmem:[#allocation3 + $0x1a0] sm:$0xff]  ;;  %v1285_v46 = vld [vmem:[#allocation3 + $0x1b0] sm:$0xff] }
 0x2a9   :  { %1405 = vmatpush1.bf16.msra.mxu1 %v1247_v38  ;;  %1528 = vmatpush1.bf16.msra.mxu0 %v1249_v40  ;;  %v1288_v26 = vld [vmem:[#allocation3 + $0x1c8] sm:$0xff]  ;;  %v1290_v27 = vld [vmem:[#allocation3 + $0x1d8] sm:$0xff]  ;;  %v1287_v55 = vld [vmem:[#allocation3 + $0x1c0] sm:$0xff]  ;;  %v1394_v40 = vpack.c.bf16 %v5134_v4, %v5134_v4 }
 0x2aa   :  { %1406 = vmatprep.subr.bf16.mxu1 %v1252_v20  ;;  %1529 = vmatprep.subr.bf16.mxu0 %v1254_v39  ;;  %v1289_v28 = vld [vmem:[#allocation3 + $0x1d0] sm:$0xff]  ;;  %v1292_v2 = vld [vmem:[#allocation3 + $0x1e8] sm:$0xff]  ;;  %v1294_v30 = vld [vmem:[#allocation3 + $0x1f8] sm:$0xff] }
 0x2ab   :  { %v1291_v23 = vld [vmem:[#allocation3 + $0x1e0] sm:$0xff]  ;;  %v1293_v31 = vld [vmem:[#allocation3 + $0x1f0] sm:$0xff]  ;;  %v1296_v5 = vld [vmem:[#allocation3 + $0x208] sm:$0xff] }
 0x2ac   :  { %v1298_v33 = vld [vmem:[#allocation3 + $0x218] sm:$0xff]  ;;  %v1295_v34 = vld [vmem:[#allocation3 + $0x200] sm:$0xff]  ;;  %v1297_v29 = vld [vmem:[#allocation3 + $0x210] sm:$0xff] }
 0x2ad   :  { %1407 = vmatpush1.bf16.msra.mxu1 %v1251_v42  ;;  %1530 = vmatpush1.bf16.msra.mxu0 %v1253_v43  ;;  %v1300_v37 = vld [vmem:[#allocation3 + $0x228] sm:$0xff]  ;;  %v1302_v38 = vld [vmem:[#allocation3 + $0x238] sm:$0xff]  ;;  %v1299_v20 = vld [vmem:[#allocation3 + $0x220] sm:$0xff] }
 0x2ae   :  { %1408 = vmatprep.subr.bf16.mxu1 %v1256_v44  ;;  %1531 = vmatprep.subr.bf16.mxu0 %v1258_v22  ;;  %v1301_v39 = vld [vmem:[#allocation3 + $0x230] sm:$0xff]  ;;  %v1304_v19 = vld [vmem:[#allocation3 + $0x248] sm:$0xff]  ;;  %v1306_v42 = vld [vmem:[#allocation3 + $0x258] sm:$0xff] }
 0x2af   :  { %v1303_v43 = vld [vmem:[#allocation3 + $0x240] sm:$0xff]  ;;  %v1305_v44 = vld [vmem:[#allocation3 + $0x250] sm:$0xff]  ;;  %v1308_v22 = vld [vmem:[#allocation3 + $0x268] sm:$0xff] }
 0x2b0   :  { %v1310_v4 = vld [vmem:[#allocation3 + $0x278] sm:$0xff] }
 0x2b1   :  { %1409 = vmatpush1.bf16.msra.mxu1 %v1255_v6  ;;  %1532 = vmatpush1.bf16.msra.mxu0 %v1257_v45  ;;  %v1307_v6 = vld [vmem:[#allocation3 + $0x260] sm:$0xff]  ;;  %v1309_v45 = vld [vmem:[#allocation3 + $0x270] sm:$0xff] }
 0x2b2   :  { %1410 = vmatprep.subr.bf16.mxu1 %v1260_v48  ;;  %1533 = vmatprep.subr.bf16.mxu0 %v1262_v49  ;;  %v1312_v48 = vld [vmem:[#allocation3 + $0x288] sm:$0xff]  ;;  %v1314_v49 = vld [vmem:[#allocation3 + $0x298] sm:$0xff] }
 0x2b5   :  { %1411 = vmatpush1.bf16.msra.mxu1 %v1259_v51  ;;  %1534 = vmatpush1.bf16.msra.mxu0 %v1261_v53  ;;  %v1311_v51 = vld [vmem:[#allocation3 + $0x280] sm:$0xff]  ;;  %v1313_v53 = vld [vmem:[#allocation3 + $0x290] sm:$0xff] }
 0x2b6   :  { %1412 = vmatprep.subr.bf16.mxu1 %v1264_v56  ;;  %1535 = vmatprep.subr.bf16.mxu0 %v1266_v57  ;;  %v1316_v56 = vld [vmem:[#allocation3 + $0x2a8] sm:$0xff]  ;;  %v1318_v57 = vld [vmem:[#allocation3 + $0x2b8] sm:$0xff] }
 0x2b9   :  { %1413 = vmatpush1.bf16.msra.mxu1 %v1263_v7  ;;  %1536 = vmatpush1.bf16.msra.mxu0 %v1265_v58  ;;  %v1315_v7 = vld [vmem:[#allocation3 + $0x2a0] sm:$0xff]  ;;  %v1317_v58 = vld [vmem:[#allocation3 + $0x2b0] sm:$0xff] }
 0x2ba   :  { %1414 = vmatprep.subr.bf16.mxu1 %v1268_v59  ;;  %1537 = vmatprep.subr.bf16.mxu0 %v1270_v60  ;;  %v1320_v59 = vld [vmem:[#allocation3 + $0x2c8] sm:$0xff]  ;;  %v1322_v60 = vld [vmem:[#allocation3 + $0x2d8] sm:$0xff] }
 0x2bd   :  { %1415 = vmatpush1.bf16.msra.mxu1 %v1267_v61  ;;  %1538 = vmatpush1.bf16.msra.mxu0 %v1269_v63  ;;  %v1319_v61 = vld [vmem:[#allocation3 + $0x2c0] sm:$0xff]  ;;  %v1321_v63 = vld [vmem:[#allocation3 + $0x2d0] sm:$0xff] }
 0x2be   :  { %1416 = vmatprep.subr.bf16.mxu1 %v1272_v1  ;;  %1539 = vmatprep.subr.bf16.mxu0 %v1274_v62  ;;  %v1324_v1 = vld [vmem:[#allocation3 + $0x2e8] sm:$0xff]  ;;  %v1326_v62 = vld [vmem:[#allocation3 + $0x2f8] sm:$0xff] }
 0x2c1   :  { %1417 = vmatpush1.bf16.msra.mxu1 %v1271_v8  ;;  %1540 = vmatpush1.bf16.msra.mxu0 %v1273_v9  ;;  %v1323_v8 = vld [vmem:[#allocation3 + $0x2e0] sm:$0xff]  ;;  %v1325_v9 = vld [vmem:[#allocation3 + $0x2f0] sm:$0xff] }
 0x2c2   :  { %1418 = vmatprep.subr.bf16.mxu1 %v1276_v10  ;;  %1541 = vmatprep.subr.bf16.mxu0 %v1278_v11  ;;  %v1328_v10 = vld [vmem:[#allocation3 + $0x308] sm:$0xff]  ;;  %v1330_v11 = vld [vmem:[#allocation3 + $0x318] sm:$0xff] }
 0x2c5   :  { %1419 = vmatpush1.bf16.msra.mxu1 %v1275_v12  ;;  %1542 = vmatpush1.bf16.msra.mxu0 %v1277_v14  ;;  %v1327_v12 = vld [vmem:[#allocation3 + $0x300] sm:$0xff]  ;;  %v1329_v14 = vld [vmem:[#allocation3 + $0x310] sm:$0xff] }
 0x2c6   :  { %1420 = vmatprep.subr.bf16.mxu1 %v1280_v13  ;;  %1543 = vmatprep.subr.bf16.mxu0 %v1282_v16  ;;  %v1332_v13 = vld [vmem:[#allocation3 + $0x328] sm:$0xff]  ;;  %v1334_v16 = vld [vmem:[#allocation3 + $0x338] sm:$0xff] }
 0x2c9   :  { %1421 = vmatpush1.bf16.msra.mxu1 %v1279_v52  ;;  %1544 = vmatpush1.bf16.msra.mxu0 %v1281_v54  ;;  %v1331_v52 = vld [vmem:[#allocation3 + $0x320] sm:$0xff]  ;;  %v1333_v54 = vld [vmem:[#allocation3 + $0x330] sm:$0xff] }
 0x2ca   :  { %1422 = vmatprep.subr.bf16.mxu1 %v1284_v0  ;;  %1545 = vmatprep.subr.bf16.mxu0 %v1286_v24  ;;  %v1336_v0 = vld [vmem:[#allocation3 + $0x348] sm:$0xff]  ;;  %v1338_v24 = vld [vmem:[#allocation3 + $0x358] sm:$0xff] }
 0x2cd   :  { %1423 = vmatpush1.bf16.msra.mxu1 %v1283_v3  ;;  %1546 = vmatpush1.bf16.msra.mxu0 %v1285_v46  ;;  %v1335_v3 = vld [vmem:[#allocation3 + $0x340] sm:$0xff]  ;;  %v1337_v46 = vld [vmem:[#allocation3 + $0x350] sm:$0xff] }
 0x2ce   :  { %1424 = vmatprep.subr.bf16.mxu1 %v1288_v26  ;;  %1547 = vmatprep.subr.bf16.mxu0 %v1290_v27  ;;  %v1340_v26 = vld [vmem:[#allocation3 + $0x368] sm:$0xff]  ;;  %v1342_v27 = vld [vmem:[#allocation3 + $0x378] sm:$0xff] }
 0x2d1   :  { %1425 = vmatpush1.bf16.msra.mxu1 %v1287_v55  ;;  %1548 = vmatpush1.bf16.msra.mxu0 %v1289_v28  ;;  %v1339_v55 = vld [vmem:[#allocation3 + $0x360] sm:$0xff]  ;;  %v1341_v28 = vld [vmem:[#allocation3 + $0x370] sm:$0xff] }
 0x2d2   :  { %1426 = vmatprep.subr.bf16.mxu1 %v1292_v2  ;;  %1549 = vmatprep.subr.bf16.mxu0 %v1294_v30  ;;  %v1344_v2 = vld [vmem:[#allocation3 + $0x388] sm:$0xff]  ;;  %v1346_v30 = vld [vmem:[#allocation3 + $0x398] sm:$0xff] }
 0x2d5   :  { %1427 = vmatpush1.bf16.msra.mxu1 %v1291_v23  ;;  %1550 = vmatpush1.bf16.msra.mxu0 %v1293_v31  ;;  %v1343_v23 = vld [vmem:[#allocation3 + $0x380] sm:$0xff]  ;;  %v1345_v31 = vld [vmem:[#allocation3 + $0x390] sm:$0xff] }
 0x2d6   :  { %1437 = vmatprep.subr.bf16.mxu1 %v1296_v5  ;;  %1560 = vmatprep.subr.bf16.mxu0 %v1298_v33  ;;  %v1348_v5 = vld [vmem:[#allocation3 + $0x3a8] sm:$0xff]  ;;  %v1350_v33 = vld [vmem:[#allocation3 + $0x3b8] sm:$0xff] }
 0x2d8   :  { %1429 = vmatmul.mubr.bf16.vlgmr.msra.gmra.mrb[8].mxu1 %v1391_v32  ;;  %1552 = vmatmul.mubr.bf16.vlgmr.msra.gmra.mrb[20].mxu0 %v1391_v32  ;;  %v1347_v32 = vld [vmem:[#allocation3 + $0x3a0] sm:$0xff] }
 0x2d9   :  { %1438 = vmatpush1.bf16.msra.mxu1 %v1295_v34  ;;  %1561 = vmatpush1.bf16.msra.mxu0 %v1297_v29  ;;  %v1349_v34 = vld [vmem:[#allocation3 + $0x3b0] sm:$0xff]  ;;  %v1352_v29 = vld [vmem:[#allocation3 + $0x3c8] sm:$0xff] }
 0x2da   :  { %1439 = vmatprep.subr.bf16.mxu1 %v1300_v37  ;;  %1562 = vmatprep.subr.bf16.mxu0 %v1302_v38  ;;  %v1354_v37 = vld [vmem:[#allocation3 + $0x3d8] sm:$0xff]  ;;  %v1351_v38 = vld [vmem:[#allocation3 + $0x3c0] sm:$0xff] }
 0x2db   :  { %1469 = vmatprep.mubr.bf16.mxu1 %v1394_v40  ;;  %1592 = vmatprep.mubr.bf16.mxu0 %v1394_v40  ;;  %v1353_v40 = vld [vmem:[#allocation3 + $0x3d0] sm:$0xff] }
 0x2dd   :  { %1440 = vmatpush1.bf16.msra.mxu1 %v1299_v20  ;;  %1563 = vmatpush1.bf16.msra.mxu0 %v1301_v39  ;;  %v1356_v20 = vld [vmem:[#allocation3 + $0x3e8] sm:$0xff]  ;;  %v1358_v39 = vld [vmem:[#allocation3 + $0x3f8] sm:$0xff] }
 0x2de   :  { %1441 = vmatprep.subr.bf16.mxu1 %v1304_v19  ;;  %1564 = vmatprep.subr.bf16.mxu0 %v1306_v42  ;;  %v1355_v19 = vld [vmem:[#allocation3 + $0x3e0] sm:$0xff]  ;;  %v1357_v42 = vld [vmem:[#allocation3 + $0x3f0] sm:$0xff] }
 0x2e1   :  { %1442 = vmatpush1.bf16.msra.mxu1 %v1303_v43  ;;  %1565 = vmatpush1.bf16.msra.mxu0 %v1305_v44  ;;  %v1360_v43 = vld [vmem:[#allocation3 + $0x408] sm:$0xff]  ;;  %v1362_v44 = vld [vmem:[#allocation3 + $0x418] sm:$0xff] }
 0x2e2   :  { %1443 = vmatprep.subr.bf16.mxu1 %v1308_v22  ;;  %1566 = vmatprep.subr.bf16.mxu0 %v1310_v4  ;;  %v1393_v22 = vpack.c.bf16 %v5132_v35, %v5132_v35  ;;  %v1359_v4 = vld [vmem:[#allocation3 + $0x400] sm:$0xff] }
 0x2e3   :  { %v1367_v35 = vld [vmem:[#allocation3 + $0x440] sm:$0xff] }
 0x2e5   :  { %1444 = vmatpush1.bf16.msra.mxu1 %v1307_v6  ;;  %1567 = vmatpush1.bf16.msra.mxu0 %v1309_v45  ;;  %v1361_v6 = vld [vmem:[#allocation3 + $0x410] sm:$0xff]  ;;  %v1364_v45 = vld [vmem:[#allocation3 + $0x428] sm:$0xff] }
 0x2e6   :  { %1445 = vmatprep.subr.bf16.mxu1 %v1312_v48  ;;  %1568 = vmatprep.subr.bf16.mxu0 %v1314_v49  ;;  %v1366_v48 = vld [vmem:[#allocation3 + $0x438] sm:$0xff]  ;;  %v1363_v49 = vld [vmem:[#allocation3 + $0x420] sm:$0xff] }
 0x2e9   :  { %1446 = vmatpush1.bf16.msra.mxu1 %v1311_v51  ;;  %1569 = vmatpush1.bf16.msra.mxu0 %v1313_v53  ;;  %v1365_v51 = vld [vmem:[#allocation3 + $0x430] sm:$0xff]  ;;  %v1368_v53 = vld [vmem:[#allocation3 + $0x448] sm:$0xff] }
 0x2ea   :  { %1447 = vmatprep.subr.bf16.mxu1 %v1316_v56  ;;  %1570 = vmatprep.subr.bf16.mxu0 %v1318_v57  ;;  %v1370_v56 = vld [vmem:[#allocation3 + $0x458] sm:$0xff]  ;;  %v1369_v57 = vld [vmem:[#allocation3 + $0x450] sm:$0xff] }
 0x2ed   :  { %1448 = vmatpush1.bf16.msra.mxu1 %v1315_v7  ;;  %1571 = vmatpush1.bf16.msra.mxu0 %v1317_v58  ;;  %v1372_v7 = vld [vmem:[#allocation3 + $0x468] sm:$0xff]  ;;  %v1374_v58 = vld [vmem:[#allocation3 + $0x478] sm:$0xff] }
 0x2ee   :  { %1449 = vmatprep.subr.bf16.mxu1 %v1320_v59  ;;  %1572 = vmatprep.subr.bf16.mxu0 %v1322_v60  ;;  %v1371_v59 = vld [vmem:[#allocation3 + $0x460] sm:$0xff]  ;;  %v1373_v60 = vld [vmem:[#allocation3 + $0x470] sm:$0xff] }
 0x2f1   :  { %1450 = vmatpush1.bf16.msra.mxu1 %v1319_v61  ;;  %1573 = vmatpush1.bf16.msra.mxu0 %v1321_v63  ;;  %v1376_v61 = vld [vmem:[#allocation3 + $0x488] sm:$0xff]  ;;  %v1378_v63 = vld [vmem:[#allocation3 + $0x498] sm:$0xff] }
 0x2f2   :  { %1451 = vmatprep.subr.bf16.mxu1 %v1324_v1  ;;  %1574 = vmatprep.subr.bf16.mxu0 %v1326_v62  ;;  %v1375_v1 = vld [vmem:[#allocation3 + $0x480] sm:$0xff]  ;;  %v1377_v62 = vld [vmem:[#allocation3 + $0x490] sm:$0xff] }
 0x2f5   :  { %1452 = vmatpush1.bf16.msra.mxu1 %v1323_v8  ;;  %1575 = vmatpush1.bf16.msra.mxu0 %v1325_v9  ;;  %v1380_v8 = vld [vmem:[#allocation3 + $0x4a8] sm:$0xff]  ;;  %v1382_v9 = vld [vmem:[#allocation3 + $0x4b8] sm:$0xff] }
 0x2f6   :  { %1453 = vmatprep.subr.bf16.mxu1 %v1328_v10  ;;  %1576 = vmatprep.subr.bf16.mxu0 %v1330_v11  ;;  %v1379_v10 = vld [vmem:[#allocation3 + $0x4a0] sm:$0xff]  ;;  %v1381_v11 = vld [vmem:[#allocation3 + $0x4b0] sm:$0xff] }
 0x2f9   :  { %1454 = vmatpush1.bf16.msra.mxu1 %v1327_v12  ;;  %1577 = vmatpush1.bf16.msra.mxu0 %v1329_v14  ;;  %v1384_v12 = vld [vmem:[#allocation3 + $0x4c8] sm:$0xff]  ;;  %v1386_v14 = vld [vmem:[#allocation3 + $0x4d8] sm:$0xff] }
 0x2fa   :  { %1455 = vmatprep.subr.bf16.mxu1 %v1332_v13  ;;  %1578 = vmatprep.subr.bf16.mxu0 %v1334_v16  ;;  %v1383_v13 = vld [vmem:[#allocation3 + $0x4c0] sm:$0xff]  ;;  %v1385_v16 = vld [vmem:[#allocation3 + $0x4d0] sm:$0xff] }
 0x2fd   :  { %1456 = vmatpush1.bf16.msra.mxu1 %v1331_v52  ;;  %1579 = vmatpush1.bf16.msra.mxu0 %v1333_v54  ;;  %v1388_v52 = vld [vmem:[#allocation3 + $0x4e8] sm:$0xff]  ;;  %v1390_v54 = vld [vmem:[#allocation3 + $0x4f8] sm:$0xff] }
 0x2fe   :  { %1457 = vmatprep.subr.bf16.mxu1 %v1336_v0  ;;  %1580 = vmatprep.subr.bf16.mxu0 %v1338_v24  ;;  %v1387_v0 = vld [vmem:[#allocation3 + $0x4e0] sm:$0xff]  ;;  %v1389_v24 = vld [vmem:[#allocation3 + $0x4f0] sm:$0xff] }
 0x301   :  { %1458 = vmatpush1.bf16.msra.mxu1 %v1335_v3  ;;  %1581 = vmatpush1.bf16.msra.mxu0 %v1337_v46  ;;  %v1395_v3 = vpack.c.bf16 %v5143_v18, %v5143_v18 }
 0x302   :  { %1459 = vmatprep.subr.bf16.mxu1 %v1340_v26  ;;  %1582 = vmatprep.subr.bf16.mxu0 %v1342_v27 }
 0x305   :  { %1460 = vmatpush1.bf16.msra.mxu1 %v1339_v55  ;;  %1583 = vmatpush1.bf16.msra.mxu0 %v1341_v28 }
 0x306   :  { %1461 = vmatprep.subr.bf16.mxu1 %v1344_v2  ;;  %1584 = vmatprep.subr.bf16.mxu0 %v1346_v30 }
 0x309   :  { %1462 = vmatpush1.bf16.msra.mxu1 %v1343_v23  ;;  %1585 = vmatpush1.bf16.msra.mxu0 %v1345_v31 }
 0x30a   :  { %1463 = vmatprep.subr.bf16.mxu1 %v1348_v5  ;;  %1586 = vmatprep.subr.bf16.mxu0 %v1350_v33 }
 0x30d   :  { %1464 = vmatpush1.bf16.msra.mxu1 %v1347_v32  ;;  %1587 = vmatpush1.bf16.msra.mxu0 %v1349_v34 }
 0x30e   :  { %1465 = vmatprep.subr.bf16.mxu1 %v1352_v29  ;;  %1588 = vmatprep.subr.bf16.mxu0 %v1354_v37 }
 0x311   :  { %1466 = vmatpush1.bf16.msra.mxu1 %v1351_v38  ;;  %1589 = vmatpush1.bf16.msra.mxu0 %v1353_v40 }
 0x312   :  { %1467 = vmatprep.subr.bf16.mxu1 %v1356_v20  ;;  %1590 = vmatprep.subr.bf16.mxu0 %v1358_v39 }
 0x315   :  { %1468 = vmatpush1.bf16.msra.mxu1 %v1355_v19  ;;  %1591 = vmatpush1.bf16.msra.mxu0 %v1357_v42 }
 0x316   :  { %1478 = vmatprep.subr.bf16.mxu1 %v1360_v43  ;;  %1601 = vmatprep.subr.bf16.mxu0 %v1362_v44 }
 0x318   :  { %1470 = vmatmul.mubr.bf16.vlgmr.msra.gmra.mrb[8].mxu1 %v1393_v22  ;;  %1593 = vmatmul.mubr.bf16.vlgmr.msra.gmra.mrb[20].mxu0 %v1393_v22 }
 0x319   :  { %1479 = vmatpush1.bf16.msra.mxu1 %v1359_v4  ;;  %1602 = vmatpush1.bf16.msra.mxu0 %v1361_v6 }
 0x31a   :  { %1480 = vmatprep.subr.bf16.mxu1 %v1364_v45  ;;  %1603 = vmatprep.subr.bf16.mxu0 %v1366_v48 }
 0x31b   :  { %1510 = vmatprep.mubr.bf16.mxu1 %v4812_v36  ;;  %1633 = vmatprep.mubr.bf16.mxu0 %v4812_v36 }
 0x31d   :  { %1481 = vmatpush1.bf16.msra.mxu1 %v1363_v49  ;;  %1604 = vmatpush1.bf16.msra.mxu0 %v1365_v51 }
 0x31e   :  { %1482 = vmatprep.subr.bf16.mxu1 %v1368_v53  ;;  %1605 = vmatprep.subr.bf16.mxu0 %v1370_v56 }
 0x321   :  { %1483 = vmatpush1.bf16.msra.mxu1 %v1367_v35  ;;  %1606 = vmatpush1.bf16.msra.mxu0 %v1369_v57 }
 0x322   :  { %1484 = vmatprep.subr.bf16.mxu1 %v1372_v7  ;;  %1607 = vmatprep.subr.bf16.mxu0 %v1374_v58 }
 0x325   :  { %1485 = vmatpush1.bf16.msra.mxu1 %v1371_v59  ;;  %1608 = vmatpush1.bf16.msra.mxu0 %v1373_v60 }
 0x326   :  { %1486 = vmatprep.subr.bf16.mxu1 %v1376_v61  ;;  %1609 = vmatprep.subr.bf16.mxu0 %v1378_v63 }
 0x329   :  { %1487 = vmatpush1.bf16.msra.mxu1 %v1375_v1  ;;  %1610 = vmatpush1.bf16.msra.mxu0 %v1377_v62 }
 0x32a   :  { %1488 = vmatprep.subr.bf16.mxu1 %v1380_v8  ;;  %1611 = vmatprep.subr.bf16.mxu0 %v1382_v9 }
 0x32d   :  { %1489 = vmatpush1.bf16.msra.mxu1 %v1379_v10  ;;  %1612 = vmatpush1.bf16.msra.mxu0 %v1381_v11 }
 0x32e   :  { %1490 = vmatprep.subr.bf16.mxu1 %v1384_v12  ;;  %1613 = vmatprep.subr.bf16.mxu0 %v1386_v14 }
 0x331   :  { %1491 = vmatpush1.bf16.msra.mxu1 %v1383_v13  ;;  %1614 = vmatpush1.bf16.msra.mxu0 %v1385_v16 }
 0x332   :  { %1492 = vmatprep.subr.bf16.mxu1 %v1388_v52  ;;  %1615 = vmatprep.subr.bf16.mxu0 %v1390_v54 }
 0x335   :  { %1493 = vmatpush1.bf16.msra.mxu1 %v1387_v0  ;;  %1616 = vmatpush1.bf16.msra.mxu0 %v1389_v24 }
 0x338   :  { %1511 = vmatmul.mubr.bf16.vlgmr.msra.gmra.mrb[8].mxu1 %v1395_v3  ;;  %1634 = vmatmul.mubr.bf16.vlgmr.msra.gmra.mrb[20].mxu0 %v1395_v3 }
 0x40b   :  { %v1512_v46 = vpop.f32.mrb[8].mxu1  ;;  %v1635_v26 = vpop.f32.mrb[20].mxu0 }
 0x40c   :  { %v1642_v27 = vrot.slane %v1512_v46, 4  ;;  %v1654_v55 = vrot.slane %v1635_v26, 4  ;;  %v1514_v28 = vpop.f32.mrb[9].mxu1  ;;  %v1637_v2 = vpop.f32.mrb[21].mxu0 }
 0x40d   :  { %v1648_v30 = vrot.slane %v1514_v28, 4  ;;  %v1660_v23 = vrot.slane %v1637_v2, 4  ;;  %v1516_v31 = vpop.f32.mrb[10].mxu1  ;;  %v1639_v5 = vpop.f32.mrb[22].mxu0 }
 0x40e   :  { %v1643_v33 = vadd.f32 %v1642_v27, %v1512_v46  ;;  %v1655_v32 = vadd.f32 %v1654_v55, %v1635_v26  ;;  %v1517_v34 = vpop.f32.mrb[11].mxu1  ;;  %v1640_v29 = vpop.f32.mrb[23].mxu0 }
 0x40f   :  { %v1649_v37 = vadd.f32 %v1648_v30, %v1514_v28  ;;  %v1661_v18 = vadd.f32 %v1660_v23, %v1637_v2 }
 0x410   :  { %v1644_v38 = vrot.slane %v1643_v33, 2  ;;  %v1656_v40 = vrot.slane %v1655_v32, 2 }
 0x411   :  { %v1650_v20 = vrot.slane %v1649_v37, 2  ;;  %v1662_v39 = vrot.slane %v1661_v18, 2 }
 0x412   :  { %v1645_v19 = vadd.f32 %v1644_v38, %v1643_v33  ;;  %v1657_v42 = vadd.f32 %v1656_v40, %v1655_v32 }
 0x413   :  { %v1651_v43 = vadd.f32 %v1650_v20, %v1649_v37  ;;  %v1663_v44 = vadd.f32 %v1662_v39, %v1661_v18 }
 0x414   :  { %v1646_v22 = vrot.slane %v1645_v19, 1  ;;  %v1658_v4 = vrot.slane %v1657_v42, 1 }
 0x415   :  { %v1652_v6 = vrot.slane %v1651_v43, 1  ;;  %v1664_v45 = vrot.slane %v1663_v44, 1 }
 0x416   :  { %v1647_v48 = vadd.f32 %v1646_v22, %v1645_v19  ;;  %v1659_v49 = vadd.f32 %v1658_v4, %v1657_v42  ;;  %v1707_v19 = vld [vmem:[#allocation11 + $0x2] ss:$8 sm:$0xf]  ;;  %v1709_v42 = vld [vmem:[#allocation11 + $0x3] ss:$8 sm:$0xf] }
 0x417   :  { %v1653_v51 = vadd.f32 %v1652_v6, %v1651_v43  ;;  %v1665_v53 = vadd.f32 %v1664_v45, %v1663_v44  ;;  %v1726_v43 = vrot.slane %v1707_v19, %v5097_v47  ;;  %v1734_v22 = vrot.slane %v1707_v19, %v5115_v15 }
 0x418   :  { %v1666_v56 = vmul.f32 0.125, %v1647_v48  ;;  %v1668_v35 = vmul.f32 0.125, %v1659_v49  ;;  %v1751_v45 = vrot.slane %v1709_v42, %v5097_v47  ;;  %v1730_v48 = vrot.slane %v1707_v19, %v5100_v50 }
 0x419   :  { %v1667_v57 = vmul.f32 0.125, %v1653_v51  ;;  %v1669_v7 = vmul.f32 0.125, %v1665_v53  ;;  %v1759_v53 = vrot.slane %v1709_v42, %v5115_v15 }
 0x41a   :  { %v1670_v58 = vsub.f32 %v1512_v46, %v1666_v56  ;;  %v1672_v59 = vsub.f32 %v1635_v26, %v1668_v35  ;;  %v1738_v56 = vrot.slane %v1707_v19, %v5118_v17 }
 0x41b   :  { %v1671_v60 = vsub.f32 %v1514_v28, %v1667_v57  ;;  %v1673_v61 = vsub.f32 %v1637_v2, %v1669_v7 }
 0x41c   :  { %v1674_v63 = vmul.f32 %v1670_v58, %v1670_v58  ;;  %v1676_v1 = vmul.f32 %v1672_v59, %v1672_v59 }
 0x41d   :  { %v1675_v62 = vmul.f32 %v1671_v60, %v1671_v60  ;;  %v1677_v8 = vmul.f32 %v1673_v61, %v1673_v61 }
 0x41e   :  { %v1678_v9 = vrot.slane %v1674_v63, 4  ;;  %v1690_v10 = vrot.slane %v1676_v1, 4 }
 0x41f   :  { %v1684_v11 = vrot.slane %v1675_v62, 4  ;;  %v1696_v12 = vrot.slane %v1677_v8, 4 }
 0x420   :  { %v1679_v14 = vadd.f32 %v1678_v9, %v1674_v63  ;;  %v1691_v13 = vadd.f32 %v1690_v10, %v1676_v1  ;;  %v1755_v63 = vrot.slane %v1709_v42, %v5100_v50 }
 0x421   :  { %v1685_v16 = vadd.f32 %v1684_v11, %v1675_v62  ;;  %v1697_v52 = vadd.f32 %v1696_v12, %v1677_v8  ;;  %v1763_v8 = vrot.slane %v1709_v42, %v5118_v17 }
 0x422   :  { %v1680_v54 = vrot.slane %v1679_v14, 2  ;;  %v1692_v0 = vrot.slane %v1691_v13, 2 }
 0x423   :  { %v1686_v24 = vrot.slane %v1685_v16, 2  ;;  %v1698_v3 = vrot.slane %v1697_v52, 2 }
 0x424   :  { %v1681_v46 = vadd.f32 %v1680_v54, %v1679_v14  ;;  %v1693_v26 = vadd.f32 %v1692_v0, %v1691_v13 }
 0x425   :  { %v1687_v27 = vadd.f32 %v1686_v24, %v1685_v16  ;;  %v1699_v55 = vadd.f32 %v1698_v3, %v1697_v52 }
 0x426   :  { %v1682_v28 = vrot.slane %v1681_v46, 1  ;;  %v1694_v2 = vrot.slane %v1693_v26, 1 }
 0x427   :  { %v1688_v30 = vrot.slane %v1687_v27, 1  ;;  %v1700_v23 = vrot.slane %v1699_v55, 1 }
 0x428   :  { %v1683_v31 = vadd.f32 %v1682_v28, %v1681_v46  ;;  %v1695_v5 = vadd.f32 %v1694_v2, %v1693_v26 }
 0x429   :  { %v1689_v33 = vadd.f32 %v1688_v30, %v1687_v27  ;;  %v1701_v32 = vadd.f32 %v1700_v23, %v1699_v55 }
 0x42a   :  { %v1702_v34 = vmul.f32 0.125, %v1683_v31  ;;  %v1704_v29 = vmul.f32 0.125, %v1695_v5 }
 0x42b   :  { %v1703_v37 = vmul.f32 0.125, %v1689_v33  ;;  %v1705_v18 = vmul.f32 0.125, %v1701_v32 }
 0x42c   :  { %v1710_v38 = vadd.f32 1e-05, %v1702_v34  ;;  %v1712_v40 = vadd.f32 1e-05, %v1704_v29 }
 0x42d   :  { %v1711_v20 = vadd.f32 1e-05, %v1703_v37  ;;  %v1713_v39 = vadd.f32 1e-05, %v1705_v18 }
 0x42e   :  { %4612 = vrsqrt.f32 %v1710_v38 }
 0x42f   :  { %4614 = vrsqrt.f32 %v1712_v40 }
 0x430   :  { %4616 = vrsqrt.f32 %v1711_v20 }
 0x431   :  { %4618 = vrsqrt.f32 %v1713_v39 }
 0x438   :  { %v4613_v44 = vpop.eup %4612 }
 0x439   :  { %v4615_v4 = vpop.eup %4614  ;;  %v1718_v6 = vmul.f32 %v4613_v44, %v1670_v58 }
 0x43a   :  { %v4617_v49 = vpop.eup %4616  ;;  %v1720_v51 = vmul.f32 %v4615_v4, %v1672_v59 }
 0x43b   :  { %v4619_v35 = vpop.eup %4618  ;;  %v1743_v57 = vmul.f32 %v1726_v43, %v1718_v6  ;;  %v1719_v7 = vmul.f32 %v4617_v49, %v1671_v60 }
 0x43c   :  { %v1745_v1 = vmul.f32 %v1734_v22, %v1720_v51  ;;  %v1721_v62 = vmul.f32 %v4619_v35, %v1673_v61 }
 0x43d   :  { %v1768_v58 = vadd.f32 %v1751_v45, %v1743_v57  ;;  %v1744_v9 = vmul.f32 %v1730_v48, %v1719_v7 }
 0x43e   :  { %v1770_v10 = vadd.f32 %v1759_v53, %v1745_v1  ;;  %v1746_v11 = vmul.f32 %v1738_v56, %v1721_v62 }
 0x43f   :  { %vm1772_vm7 = vcmp.ge.f32.partialorder %v1768_v58, 0.0  ;;  %v1776_v12 = vmul.f32 0.4, %v1768_v58  ;;  %v1769_v59 = vadd.f32 %v1755_v63, %v1744_v9 }
 0x440   :  { %vm1774_vm8 = vcmp.ge.f32.partialorder %v1770_v10, 0.0  ;;  %v1778_v14 = vmul.f32 0.4, %v1770_v10  ;;  %v1771_v13 = vadd.f32 %v1763_v8, %v1746_v11 }
 0x441   :  { %v5163_v16 = vsel %vm1772_vm7, %v1768_v58, %v1776_v12  ;;  %vm1773_vm9 = vcmp.ge.f32.partialorder %v1769_v59, 0.0  ;;  %v1777_v60 = vmul.f32 0.4, %v1769_v59 }
 0x442   :  { %v5165_v52 = vsel %vm1774_vm8, %v1770_v10, %v1778_v14  ;;  %vm1775_vm10 = vcmp.ge.f32.partialorder %v1771_v13, 0.0  ;;  %v1779_v61 = vmul.f32 0.4, %v1771_v13 }
 0x443   :  { %v1781_v54 = vsel %vm1773_vm9, %v1769_v59, %v1777_v60 }
 0x444   :  { %v5167_v0 = vsel %vm1775_vm10, %v1771_v13, %v1779_v61 }
 0x445   :  { %4762 = dma.done.wait [#allocation10 + $0x2], 8192 }
 0x446   :  { %4763 = vsyncadd [#allocation10 + $0x2], 4294959104  ;;  %v1853_v24 = vpack.c.bf16 %v1781_v54, %v1781_v54  ;;  %v1789_v3 = vld [vmem:[#allocation4 + $0x8] sm:$0xff]  ;;  %v1788_v46 = vld [vmem:[#allocation4] sm:$0xff]  ;;  %v1852_v56 = vpack.c.bf16 %v5163_v16, %v5163_v16  ;;  %v1855_v35 = vpack.c.bf16 %v5167_v0, %v5167_v0 }
 0x447   :  { %v1791_v26 = vld [vmem:[#allocation4 + $0x18] sm:$0xff]  ;;  %1856 = vmatprep.subr.bf16.mxu1 %v1789_v3  ;;  %v1790_v27 = vld [vmem:[#allocation4 + $0x10] sm:$0xff]  ;;  %v1793_v55 = vld [vmem:[#allocation4 + $0x28] sm:$0xff] }
 0x448   :  { %1888 = vmatprep.mubr.bf16.mxu1 %v1853_v24  ;;  %1857 = vmatpush1.bf16.msra.mxu1 %v1788_v46  ;;  %v1792_v28 = vld [vmem:[#allocation4 + $0x20] sm:$0xff]  ;;  %v1795_v2 = vld [vmem:[#allocation4 + $0x38] sm:$0xff]  ;;  %v1794_v30 = vld [vmem:[#allocation4 + $0x30] sm:$0xff] }
 0x449   :  { %1858 = vmatprep.subr.bf16.mxu1 %v1791_v26  ;;  %v1797_v23 = vld [vmem:[#allocation4 + $0x48] sm:$0xff]  ;;  %v1796_v31 = vld [vmem:[#allocation4 + $0x40] sm:$0xff]  ;;  %v1799_v5 = vld [vmem:[#allocation4 + $0x58] sm:$0xff] }
 0x44a   :  { %v1798_v33 = vld [vmem:[#allocation4 + $0x50] sm:$0xff]  ;;  %v1801_v32 = vld [vmem:[#allocation4 + $0x68] sm:$0xff]  ;;  %v1800_v34 = vld [vmem:[#allocation4 + $0x60] sm:$0xff] }
 0x44b   :  { %v1803_v29 = vld [vmem:[#allocation4 + $0x78] sm:$0xff]  ;;  %v1802_v37 = vld [vmem:[#allocation4 + $0x70] sm:$0xff]  ;;  %v1805_v18 = vld [vmem:[#allocation4 + $0x88] sm:$0xff] }
 0x44c   :  { %1859 = vmatpush1.bf16.msra.mxu1 %v1790_v27  ;;  %v1804_v38 = vld [vmem:[#allocation4 + $0x80] sm:$0xff]  ;;  %v1807_v40 = vld [vmem:[#allocation4 + $0x98] sm:$0xff]  ;;  %v1806_v20 = vld [vmem:[#allocation4 + $0x90] sm:$0xff] }
 0x44d   :  { %1860 = vmatprep.subr.bf16.mxu1 %v1793_v55  ;;  %v1809_v39 = vld [vmem:[#allocation4 + $0xa8] sm:$0xff]  ;;  %v1808_v19 = vld [vmem:[#allocation4 + $0xa0] sm:$0xff]  ;;  %v1811_v42 = vld [vmem:[#allocation4 + $0xb8] sm:$0xff] }
 0x44e   :  { %v1810_v43 = vld [vmem:[#allocation4 + $0xb0] sm:$0xff]  ;;  %v1813_v44 = vld [vmem:[#allocation4 + $0xc8] sm:$0xff]  ;;  %v1812_v22 = vld [vmem:[#allocation4 + $0xc0] sm:$0xff] }
 0x44f   :  { %v1815_v4 = vld [vmem:[#allocation4 + $0xd8] sm:$0xff]  ;;  %v1814_v6 = vld [vmem:[#allocation4 + $0xd0] sm:$0xff]  ;;  %v1817_v45 = vld [vmem:[#allocation4 + $0xe8] sm:$0xff] }
 0x450   :  { %1861 = vmatpush1.bf16.msra.mxu1 %v1792_v28  ;;  %v1816_v48 = vld [vmem:[#allocation4 + $0xe0] sm:$0xff]  ;;  %v1819_v49 = vld [vmem:[#allocation4 + $0xf8] sm:$0xff]  ;;  %v1818_v51 = vld [vmem:[#allocation4 + $0xf0] sm:$0xff] }
 0x451   :  { %1862 = vmatprep.subr.bf16.mxu1 %v1795_v2  ;;  %v1821_v53 = vld [vmem:[#allocation4 + $0x108] sm:$0xff]  ;;  %v1820_v57 = vld [vmem:[#allocation4 + $0x100] sm:$0xff]  ;;  %v1823_v7 = vld [vmem:[#allocation4 + $0x118] sm:$0xff] }
 0x452   :  { %v1822_v63 = vld [vmem:[#allocation4 + $0x110] sm:$0xff]  ;;  %v1825_v1 = vld [vmem:[#allocation4 + $0x128] sm:$0xff]  ;;  %v1824_v62 = vld [vmem:[#allocation4 + $0x120] sm:$0xff] }
 0x453   :  { %v1827_v8 = vld [vmem:[#allocation4 + $0x138] sm:$0xff]  ;;  %v1826_v58 = vld [vmem:[#allocation4 + $0x130] sm:$0xff]  ;;  %v1829_v9 = vld [vmem:[#allocation4 + $0x148] sm:$0xff] }
 0x454   :  { %1863 = vmatpush1.bf16.msra.mxu1 %v1794_v30  ;;  %v1828_v10 = vld [vmem:[#allocation4 + $0x140] sm:$0xff]  ;;  %v1831_v11 = vld [vmem:[#allocation4 + $0x158] sm:$0xff]  ;;  %v1830_v12 = vld [vmem:[#allocation4 + $0x150] sm:$0xff] }
 0x455   :  { %1864 = vmatprep.subr.bf16.mxu1 %v1797_v23  ;;  %v1833_v59 = vld [vmem:[#allocation4 + $0x168] sm:$0xff]  ;;  %v1832_v14 = vld [vmem:[#allocation4 + $0x160] sm:$0xff]  ;;  %v1835_v13 = vld [vmem:[#allocation4 + $0x178] sm:$0xff] }
 0x456   :  { %v1834_v16 = vld [vmem:[#allocation4 + $0x170] sm:$0xff]  ;;  %v1837_v60 = vld [vmem:[#allocation4 + $0x188] sm:$0xff]  ;;  %v1836_v61 = vld [vmem:[#allocation4 + $0x180] sm:$0xff] }
 0x457   :  { %v1839_v54 = vld [vmem:[#allocation4 + $0x198] sm:$0xff]  ;;  %v1838_v0 = vld [vmem:[#allocation4 + $0x190] sm:$0xff]  ;;  %v1841_v24 = vld [vmem:[#allocation4 + $0x1a8] sm:$0xff] }
 0x458   :  { %1865 = vmatpush1.bf16.msra.mxu1 %v1796_v31  ;;  %v1840_v3 = vld [vmem:[#allocation4 + $0x1a0] sm:$0xff]  ;;  %v1843_v46 = vld [vmem:[#allocation4 + $0x1b8] sm:$0xff]  ;;  %v1842_v26 = vld [vmem:[#allocation4 + $0x1b0] sm:$0xff] }
 0x459   :  { %1866 = vmatprep.subr.bf16.mxu1 %v1799_v5  ;;  %v1845_v27 = vld [vmem:[#allocation4 + $0x1c8] sm:$0xff]  ;;  %v1844_v55 = vld [vmem:[#allocation4 + $0x1c0] sm:$0xff]  ;;  %v1847_v28 = vld [vmem:[#allocation4 + $0x1d8] sm:$0xff] }
 0x45a   :  { %v1846_v2 = vld [vmem:[#allocation4 + $0x1d0] sm:$0xff]  ;;  %v1849_v30 = vld [vmem:[#allocation4 + $0x1e8] sm:$0xff]  ;;  %v1848_v23 = vld [vmem:[#allocation4 + $0x1e0] sm:$0xff] }
 0x45b   :  { %v1851_v31 = vld [vmem:[#allocation4 + $0x1f8] sm:$0xff]  ;;  %v1850_v5 = vld [vmem:[#allocation4 + $0x1f0] sm:$0xff] }
 0x45c   :  { %1867 = vmatpush1.bf16.msra.mxu1 %v1798_v33  ;;  %v1854_v33 = vpack.c.bf16 %v5165_v52, %v5165_v52 }
 0x45d   :  { %1868 = vmatprep.subr.bf16.mxu1 %v1801_v32 }
 0x460   :  { %1869 = vmatpush1.bf16.msra.mxu1 %v1800_v34 }
 0x461   :  { %1870 = vmatprep.subr.bf16.mxu1 %v1803_v29 }
 0x464   :  { %1871 = vmatpush1.bf16.msra.mxu1 %v1802_v37 }
 0x465   :  { %1872 = vmatprep.subr.bf16.mxu1 %v1805_v18 }
 0x468   :  { %1873 = vmatpush1.bf16.msra.mxu1 %v1804_v38 }
 0x469   :  { %1874 = vmatprep.subr.bf16.mxu1 %v1807_v40 }
 0x46c   :  { %1875 = vmatpush1.bf16.msra.mxu1 %v1806_v20 }
 0x46d   :  { %1876 = vmatprep.subr.bf16.mxu1 %v1809_v39 }
 0x470   :  { %1877 = vmatpush1.bf16.msra.mxu1 %v1808_v19 }
 0x471   :  { %1878 = vmatprep.subr.bf16.mxu1 %v1811_v42 }
 0x474   :  { %1879 = vmatpush1.bf16.msra.mxu1 %v1810_v43 }
 0x475   :  { %1880 = vmatprep.subr.bf16.mxu1 %v1813_v44 }
 0x478   :  { %1881 = vmatpush1.bf16.msra.mxu1 %v1812_v22 }
 0x479   :  { %1882 = vmatprep.subr.bf16.mxu1 %v1815_v4 }
 0x47c   :  { %1883 = vmatpush1.bf16.msra.mxu1 %v1814_v6 }
 0x47d   :  { %1884 = vmatprep.subr.bf16.mxu1 %v1817_v45 }
 0x480   :  { %1885 = vmatpush1.bf16.msra.mxu1 %v1816_v48 }
 0x481   :  { %1886 = vmatprep.subr.bf16.mxu1 %v1819_v49 }
 0x484   :  { %1887 = vmatpush1.bf16.msra.mxu1 %v1818_v51 }
 0x485   :  { %1897 = vmatprep.subr.bf16.mxu1 %v1821_v53 }
 0x487   :  { %1889 = vmatmul.mubr.bf16.vlgmr.msra.gmra.mrb[12].mxu1 %v1852_v56 }
 0x488   :  { %1898 = vmatpush1.bf16.msra.mxu1 %v1820_v57  ;;  %1929 = vmatprep.mubr.bf16.mxu1 %v1855_v35 }
 0x489   :  { %1899 = vmatprep.subr.bf16.mxu1 %v1823_v7 }
 0x48c   :  { %1900 = vmatpush1.bf16.msra.mxu1 %v1822_v63 }
 0x48d   :  { %1901 = vmatprep.subr.bf16.mxu1 %v1825_v1 }
 0x490   :  { %1902 = vmatpush1.bf16.msra.mxu1 %v1824_v62 }
 0x491   :  { %1903 = vmatprep.subr.bf16.mxu1 %v1827_v8 }
 0x494   :  { %1904 = vmatpush1.bf16.msra.mxu1 %v1826_v58 }
 0x495   :  { %1905 = vmatprep.subr.bf16.mxu1 %v1829_v9 }
 0x498   :  { %1906 = vmatpush1.bf16.msra.mxu1 %v1828_v10 }
 0x499   :  { %1907 = vmatprep.subr.bf16.mxu1 %v1831_v11 }
 0x49c   :  { %1908 = vmatpush1.bf16.msra.mxu1 %v1830_v12 }
 0x49d   :  { %1909 = vmatprep.subr.bf16.mxu1 %v1833_v59 }
 0x4a0   :  { %1910 = vmatpush1.bf16.msra.mxu1 %v1832_v14 }
 0x4a1   :  { %1911 = vmatprep.subr.bf16.mxu1 %v1835_v13 }
 0x4a4   :  { %1912 = vmatpush1.bf16.msra.mxu1 %v1834_v16  ;;  %v1971_v16 = vld [vmem:[#allocation11 + $0x4] ss:$8 sm:$0x3] }
 0x4a5   :  { %1913 = vmatprep.subr.bf16.mxu1 %v1837_v60  ;;  %v1973_v60 = vld [vmem:[#allocation11 + $0x5] ss:$8 sm:$0x3] }
 0x4a8   :  { %1914 = vmatpush1.bf16.msra.mxu1 %v1836_v61  ;;  %v1984_v61 = vrot.slane %v1971_v16, %v5097_v47 }
 0x4a9   :  { %1915 = vmatprep.subr.bf16.mxu1 %v1839_v54 }
 0x4ac   :  { %1916 = vmatpush1.bf16.msra.mxu1 %v1838_v0  ;;  %v1988_v0 = vrot.slane %v1971_v16, %v5100_v50 }
 0x4ad   :  { %1917 = vmatprep.subr.bf16.mxu1 %v1841_v24 }
 0x4b0   :  { %1918 = vmatpush1.bf16.msra.mxu1 %v1840_v3 }
 0x4b1   :  { %1919 = vmatprep.subr.bf16.mxu1 %v1843_v46  ;;  %v1997_v46 = vrot.slane %v1973_v60, %v5097_v47 }
 0x4b4   :  { %1920 = vmatpush1.bf16.msra.mxu1 %v1842_v26 }
 0x4b5   :  { %1921 = vmatprep.subr.bf16.mxu1 %v1845_v27  ;;  %v2001_v27 = vrot.slane %v1973_v60, %v5100_v50 }
 0x4b8   :  { %1922 = vmatpush1.bf16.msra.mxu1 %v1844_v55 }
 0x4b9   :  { %1923 = vmatprep.subr.bf16.mxu1 %v1847_v28 }
 0x4bc   :  { %1924 = vmatpush1.bf16.msra.mxu1 %v1846_v2 }
 0x4bd   :  { %1925 = vmatprep.subr.bf16.mxu1 %v1849_v30 }
 0x4c0   :  { %1926 = vmatpush1.bf16.msra.mxu1 %v1848_v23 }
 0x4c1   :  { %1927 = vmatprep.subr.bf16.mxu1 %v1851_v31 }
 0x4c4   :  { %1928 = vmatpush1.bf16.msra.mxu1 %v1850_v5 }
 0x4c7   :  { %1930 = vmatmul.mubr.bf16.vlgmr.msra.gmra.mrb[12].mxu1 %v1854_v33 }
 0x59a   :  { %v1931_v32 = vpop.f32.mrb[12].mxu1 }
 0x59b   :  { %v1938_v34 = vrot.slane %v1931_v32, 4  ;;  %v1933_v29 = vpop.f32.mrb[13].mxu1 }
 0x59c   :  { %v1944_v37 = vrot.slane %v1933_v29, 4  ;;  %v1935_v18 = vpop.f32.mrb[14].mxu1 }
 0x59d   :  { %v1939_v38 = vadd.f32 %v1938_v34, %v1931_v32  ;;  %v1936_v40 = vpop.f32.mrb[15].mxu1 }
 0x59e   :  { %v1945_v20 = vadd.f32 %v1944_v37, %v1933_v29 }
 0x59f   :  { %v1940_v39 = vrot.slane %v1939_v38, 2 }
 0x5a0   :  { %v1946_v19 = vrot.slane %v1945_v20, 2 }
 0x5a1   :  { %v1941_v42 = vadd.f32 %v1940_v39, %v1939_v38 }
 0x5a2   :  { %v1947_v43 = vadd.f32 %v1946_v19, %v1945_v20 }
 0x5a3   :  { %v1942_v44 = vrot.slane %v1941_v42, 1 }
 0x5a4   :  { %v1948_v22 = vrot.slane %v1947_v43, 1 }
 0x5a5   :  { %v1943_v4 = vadd.f32 %v1942_v44, %v1941_v42 }
 0x5a6   :  { %v1949_v6 = vadd.f32 %v1948_v22, %v1947_v43 }
 0x5a7   :  { %v1950_v45 = vmul.f32 0.125, %v1943_v4 }
 0x5a8   :  { %v1951_v52 = vmul.f32 0.125, %v1949_v6 }
 0x5a9   :  { %v1952_v48 = vsub.f32 %v1931_v32, %v1950_v45 }
 0x5aa   :  { %v1953_v49 = vsub.f32 %v1933_v29, %v1951_v52 }
 0x5ab   :  { %v1954_v51 = vmul.f32 %v1952_v48, %v1952_v48 }
 0x5ac   :  { %v1955_v53 = vmul.f32 %v1953_v49, %v1953_v49 }
 0x5ad   :  { %v1956_v56 = vrot.slane %v1954_v51, 4 }
 0x5ae   :  { %v1962_v35 = vrot.slane %v1955_v53, 4 }
 0x5af   :  { %v1957_v57 = vadd.f32 %v1956_v56, %v1954_v51 }
 0x5b0   :  { %v1963_v7 = vadd.f32 %v1962_v35, %v1955_v53 }
 0x5b1   :  { %v1958_v63 = vrot.slane %v1957_v57, 2 }
 0x5b2   :  { %v1964_v1 = vrot.slane %v1963_v7, 2 }
 0x5b3   :  { %v1959_v62 = vadd.f32 %v1958_v63, %v1957_v57 }
 0x5b4   :  { %v1965_v8 = vadd.f32 %v1964_v1, %v1963_v7 }
 0x5b5   :  { %v1960_v58 = vrot.slane %v1959_v62, 1 }
 0x5b6   :  { %v1966_v9 = vrot.slane %v1965_v8, 1 }
 0x5b7   :  { %v1961_v10 = vadd.f32 %v1960_v58, %v1959_v62 }
 0x5b8   :  { %v1967_v11 = vadd.f32 %v1966_v9, %v1965_v8 }
 0x5b9   :  { %v1968_v12 = vmul.f32 0.125, %v1961_v10 }
 0x5ba   :  { %v1969_v59 = vmul.f32 0.125, %v1967_v11 }
 0x5bb   :  { %v1974_v14 = vadd.f32 1e-05, %v1968_v12 }
 0x5bc   :  { %v1975_v13 = vadd.f32 1e-05, %v1969_v59 }
 0x5bd   :  { %4620 = vrsqrt.f32 %v1974_v14 }
 0x5be   :  { %4622 = vrsqrt.f32 %v1975_v13 }
 0x5c7   :  { %v4621_v54 = vpop.eup %4620 }
 0x5c8   :  { %v4623_v24 = vpop.eup %4622  ;;  %v1978_v3 = vmul.f32 %v4621_v54, %v1952_v48 }
 0x5c9   :  { %v1979_v26 = vmul.f32 %v4623_v24, %v1953_v49 }
 0x5ca   :  { %v1991_v55 = vmul.f32 %v1984_v61, %v1978_v3 }
 0x5cb   :  { %v1992_v28 = vmul.f32 %v1988_v0, %v1979_v26 }
 0x5cc   :  { %v2004_v2 = vadd.f32 %v1997_v46, %v1991_v55 }
 0x5cd   :  { %v2005_v30 = vadd.f32 %v2001_v27, %v1992_v28 }
 0x5ce   :  { %vm2006_vm11 = vcmp.ge.f32.partialorder %v2004_v2, 0.0  ;;  %v2008_v23 = vmul.f32 0.4, %v2004_v2 }
 0x5cf   :  { %vm2007_vm12 = vcmp.ge.f32.partialorder %v2005_v30, 0.0  ;;  %v2009_v31 = vmul.f32 0.4, %v2005_v30 }
 0x5d0   :  { %v2010_v5 = vsel %vm2006_vm11, %v2004_v2, %v2008_v23 }
 0x5d1   :  { %v2011_v33 = vsel %vm2007_vm12, %v2005_v30, %v2009_v31 }
 0x5d2   :  { %4764 = dma.done.wait [#allocation10 + $0x3], 2048 }
 0x5d3   :  { %4765 = vsyncadd [#allocation10 + $0x3], 4294965248  ;;  %v2033_v32 = vpack.c.bf16 %v2011_v33, %v2011_v33  ;;  %v2024_v34 = vld [vmem:[#allocation5 + $0x40] sm:$0xff]  ;;  %v2025_v37 = vld [vmem:[#allocation5 + $0x48] sm:$0xff]  ;;  %v2032_v52 = vpack.c.bf16 %v2010_v5, %v2010_v5 }
 0x5d4   :  { %v2016_v29 = vld [vmem:[#allocation5] sm:$0xff]  ;;  %4343 = vmatprep.subr.bf16.mxu0 %v2024_v34  ;;  %v2017_v18 = vld [vmem:[#allocation5 + $0x8] sm:$0xff]  ;;  %v2026_v38 = vld [vmem:[#allocation5 + $0x50] sm:$0xff] }
 0x5d5   :  { %2066 = vmatprep.mubr.bf16.mxu0 %v2033_v32  ;;  %4344 = vmatpush3.bf16.msra.mxu0 %v2016_v29  ;;  %v2018_v40 = vld [vmem:[#allocation5 + $0x10] sm:$0xff]  ;;  %v2027_v20 = vld [vmem:[#allocation5 + $0x58] sm:$0xff]  ;;  %v2028_v19 = vld [vmem:[#allocation5 + $0x60] sm:$0xff] }
 0x5d6   :  { %4345 = vmatprep.subr.bf16.mxu0 %v2025_v37  ;;  %v2019_v39 = vld [vmem:[#allocation5 + $0x18] sm:$0xff]  ;;  %v2020_v42 = vld [vmem:[#allocation5 + $0x20] sm:$0xff]  ;;  %v2029_v43 = vld [vmem:[#allocation5 + $0x68] sm:$0xff] }
 0x5d7   :  { %v2021_v44 = vld [vmem:[#allocation5 + $0x28] sm:$0xff]  ;;  %v2030_v22 = vld [vmem:[#allocation5 + $0x70] sm:$0xff]  ;;  %v2031_v6 = vld [vmem:[#allocation5 + $0x78] sm:$0xff] }
 0x5d8   :  { %v2022_v4 = vld [vmem:[#allocation5 + $0x30] sm:$0xff]  ;;  %v2023_v45 = vld [vmem:[#allocation5 + $0x38] sm:$0xff]  ;;  %v2090_v54 = vld [vmem:[#allocation11 + $0x6] ss:$0 sm:$0xff] }
 0x5d9   :  { %4346 = vmatpush3.bf16.msra.mxu0 %v2017_v18  ;;  %v2091_v24 = vld [vmem:[#allocation11 + $0x7] ss:$0 sm:$0xff] }
 0x5da   :  { %4347 = vmatprep.subr.bf16.mxu0 %v2026_v38 }
 0x5dd   :  { %4348 = vmatpush3.bf16.msra.mxu0 %v2018_v40 }
 0x5de   :  { %4349 = vmatprep.subr.bf16.mxu0 %v2027_v20 }
 0x5e1   :  { %4350 = vmatpush3.bf16.msra.mxu0 %v2019_v39 }
 0x5e2   :  { %4351 = vmatprep.subr.bf16.mxu0 %v2028_v19 }
 0x5e5   :  { %4352 = vmatpush3.bf16.msra.mxu0 %v2020_v42 }
 0x5e6   :  { %4353 = vmatprep.subr.bf16.mxu0 %v2029_v43 }
 0x5e9   :  { %4354 = vmatpush3.bf16.msra.mxu0 %v2021_v44 }
 0x5ea   :  { %4355 = vmatprep.subr.bf16.mxu0 %v2030_v22 }
 0x5ed   :  { %4356 = vmatpush3.bf16.msra.mxu0 %v2022_v4 }
 0x5ee   :  { %4357 = vmatprep.subr.bf16.mxu0 %v2031_v6 }
 0x5f1   :  { %4358 = vmatpush3.bf16.msra.mxu0 %v2023_v45 }
 0x5f4   :  { %2067 = vmatmul.mubr.bf16.vlgmr.msra.gmra.mrb[24].mxu0 %v2032_v52 }
 0x6c7   :  { %v4359_v48 = vpop.f32.mrb[24].mxu0 }
 0x6c8   :  { %v4360_v49 = vpop.f32.mrb[25].mxu0 }
 0x6c9   :  { %v4361_v51 = vadd.f32 %v4360_v49, %v4359_v48  ;;  %v4362_v53 = vpop.f32.mrb[26].mxu0 }
 0x6ca   :  { %v4363_v56 = vpop.f32.mrb[27].mxu0 }
 0x6cb   :  { %v2074_v35 = vrot.slane %v4361_v51, 4 }
 0x6cd   :  { %v2075_v57 = vadd.f32 %v4361_v51, %v2074_v35 }
 0x6cf   :  { %v2076_v7 = vrot.slane %v2075_v57, 2 }
 0x6d1   :  { %v2077_v63 = vadd.f32 %v2076_v7, %v2075_v57 }
 0x6d3   :  { %v2078_v1 = vrot.slane %v2077_v63, 1 }
 0x6d5   :  { %v2079_v62 = vadd.f32 %v2078_v1, %v2077_v63 }
 0x6d7   :  { %v2080_v8 = vmul.f32 0.125, %v2079_v62 }
 0x6d9   :  { %v2081_v58 = vsub.f32 %v4361_v51, %v2080_v8 }
 0x6db   :  { %v2082_v9 = vmul.f32 %v2081_v58, %v2081_v58 }
 0x6dd   :  { %v2083_v10 = vrot.slane %v2082_v9, 4 }
 0x6df   :  { %v2084_v11 = vadd.f32 %v2083_v10, %v2082_v9 }
 0x6e1   :  { %v2085_v12 = vrot.slane %v2084_v11, 2 }
 0x6e3   :  { %v2086_v59 = vadd.f32 %v2085_v12, %v2084_v11 }
 0x6e5   :  { %v2087_v14 = vrot.slane %v2086_v59, 1 }
 0x6e7   :  { %v2088_v13 = vadd.f32 %v2087_v14, %v2086_v59 }
 0x6e9   :  { %v2089_v16 = vmul.f32 0.125, %v2088_v13 }
 0x6eb   :  { %v2092_v60 = vadd.f32 1e-05, %v2089_v16 }
 0x6ed   :  { %4624 = vrsqrt.f32 %v2092_v60 }
 0x6f7   :  { %v4625_v61 = vpop.eup %4624 }
 0x6f8   :  { %v2094_v0 = vmul.f32 %v4625_v61, %v2081_v58 }
 0x6fa   :  { %v2095_v3 = vmul.f32 %v2094_v0, %v2090_v54 }
 0x6fc   :  { %v2096_v46 = vadd.f32 %v2095_v3, %v2091_v24 }
 0x6fe   :  { %vm2097_vm13 = vcmp.ge.f32.partialorder %v2096_v46, 0.0  ;;  %v2098_v26 = vmul.f32 0.4, %v2096_v46 }
 0x700   :  { %v2099_v27 = vsel %vm2097_vm13, %v2096_v46, %v2098_v26 }
 0x701   :  { %4766 = dma.done.wait [#allocation10 + $0x4], 2048 }
 0x702   :  { %4767 = vsyncadd [#allocation10 + $0x4], 4294965248  ;;  %2153 = vmatprep.mubr.bf16.mxu0 %v4812_v36  ;;  %v2105_v55 = vld [vmem:[#allocation6 + $0x8] sm:$0xff]  ;;  %v2104_v28 = vld [vmem:[#allocation6] sm:$0xff]  ;;  %v2120_v39 = vpack.c.bf16 %v2099_v27, %v2099_v27 }
 0x703   :  { %v2107_v2 = vld [vmem:[#allocation6 + $0x18] sm:$0xff]  ;;  %2121 = vmatprep.subr.bf16.mxu0 %v2105_v55  ;;  %v2106_v30 = vld [vmem:[#allocation6 + $0x10] sm:$0xff]  ;;  %v2109_v23 = vld [vmem:[#allocation6 + $0x28] sm:$0xff] }
 0x704   :  { %2122 = vmatpush1.bf16.msra.mxu0 %v2104_v28  ;;  %v2108_v31 = vld [vmem:[#allocation6 + $0x20] sm:$0xff]  ;;  %v2111_v5 = vld [vmem:[#allocation6 + $0x38] sm:$0xff]  ;;  %v2110_v33 = vld [vmem:[#allocation6 + $0x30] sm:$0xff] }
 0x705   :  { %2123 = vmatprep.subr.bf16.mxu0 %v2107_v2  ;;  %v2113_v32 = vld [vmem:[#allocation6 + $0x48] sm:$0xff]  ;;  %v2112_v34 = vld [vmem:[#allocation6 + $0x40] sm:$0xff]  ;;  %v2115_v29 = vld [vmem:[#allocation6 + $0x58] sm:$0xff] }
 0x706   :  { %v2114_v37 = vld [vmem:[#allocation6 + $0x50] sm:$0xff]  ;;  %v2117_v18 = vld [vmem:[#allocation6 + $0x68] sm:$0xff]  ;;  %v2116_v38 = vld [vmem:[#allocation6 + $0x60] sm:$0xff] }
 0x707   :  { %v2119_v40 = vld [vmem:[#allocation6 + $0x78] sm:$0xff]  ;;  %v2118_v20 = vld [vmem:[#allocation6 + $0x70] sm:$0xff] }
 0x708   :  { %2124 = vmatpush1.bf16.msra.mxu0 %v2106_v30  ;;  %v2195_v27 = vld [vmem:[#allocation11 + $0x38] ss:$8 sm:$0x3]  ;;  %v2197_v55 = vld [vmem:[#allocation11 + $0x39] ss:$8 sm:$0x3] }
 0x709   :  { %2125 = vmatprep.subr.bf16.mxu0 %v2109_v23  ;;  %v2208_v28 = vrot.slane %v2195_v27, %v5097_v47  ;;  %v2212_v30 = vrot.slane %v2195_v27, %v5100_v50 }
 0x70c   :  { %2126 = vmatpush1.bf16.msra.mxu0 %v2108_v31 }
 0x70d   :  { %2127 = vmatprep.subr.bf16.mxu0 %v2111_v5  ;;  %v2221_v5 = vrot.slane %v2197_v55, %v5097_v47 }
 0x710   :  { %2128 = vmatpush1.bf16.msra.mxu0 %v2110_v33 }
 0x711   :  { %2129 = vmatprep.subr.bf16.mxu0 %v2113_v32  ;;  %v2225_v32 = vrot.slane %v2197_v55, %v5100_v50 }
 0x714   :  { %2130 = vmatpush1.bf16.msra.mxu0 %v2112_v34 }
 0x715   :  { %2131 = vmatprep.subr.bf16.mxu0 %v2115_v29 }
 0x718   :  { %2132 = vmatpush1.bf16.msra.mxu0 %v2114_v37 }
 0x719   :  { %2133 = vmatprep.subr.bf16.mxu0 %v2117_v18 }
 0x71c   :  { %2134 = vmatpush1.bf16.msra.mxu0 %v2116_v38 }
 0x71d   :  { %2135 = vmatprep.subr.bf16.mxu0 %v2119_v40 }
 0x720   :  { %2136 = vmatpush1.bf16.msra.mxu0 %v2118_v20 }
 0x723   :  { %2154 = vmatmul.mubr.bf16.vlgmr.msra.gmra.mrb[28].mxu0 %v2120_v39 }
 0x7f6   :  { %v2155_v19 = vpop.f32.mrb[28].mxu0 }
 0x7f7   :  { %v2162_v42 = vrot.slane %v2155_v19, 4  ;;  %v2157_v43 = vpop.f32.mrb[29].mxu0 }
 0x7f8   :  { %v2168_v44 = vrot.slane %v2157_v43, 4  ;;  %v2159_v22 = vpop.f32.mrb[30].mxu0 }
 0x7f9   :  { %v2163_v4 = vadd.f32 %v2162_v42, %v2155_v19  ;;  %v2160_v6 = vpop.f32.mrb[31].mxu0 }
 0x7fa   :  { %v2169_v45 = vadd.f32 %v2168_v44, %v2157_v43 }
 0x7fb   :  { %v2164_v52 = vrot.slane %v2163_v4, 2 }
 0x7fc   :  { %v2170_v48 = vrot.slane %v2169_v45, 2 }
 0x7fd   :  { %v2165_v49 = vadd.f32 %v2164_v52, %v2163_v4 }
 0x7fe   :  { %v2171_v51 = vadd.f32 %v2170_v48, %v2169_v45 }
 0x7ff   :  { %v2166_v53 = vrot.slane %v2165_v49, 1 }
 0x800   :  { %v2172_v56 = vrot.slane %v2171_v51, 1 }
 0x801   :  { %v2167_v35 = vadd.f32 %v2166_v53, %v2165_v49 }
 0x802   :  { %v2173_v57 = vadd.f32 %v2172_v56, %v2171_v51 }
 0x803   :  { %v2174_v7 = vmul.f32 0.125, %v2167_v35 }
 0x804   :  { %v2175_v63 = vmul.f32 0.125, %v2173_v57 }
 0x805   :  { %v2176_v1 = vsub.f32 %v2155_v19, %v2174_v7 }
 0x806   :  { %v2177_v62 = vsub.f32 %v2157_v43, %v2175_v63 }
 0x807   :  { %v2178_v8 = vmul.f32 %v2176_v1, %v2176_v1 }
 0x808   :  { %v2179_v58 = vmul.f32 %v2177_v62, %v2177_v62 }
 0x809   :  { %v2180_v9 = vrot.slane %v2178_v8, 4 }
 0x80a   :  { %v2186_v10 = vrot.slane %v2179_v58, 4 }
 0x80b   :  { %v2181_v11 = vadd.f32 %v2180_v9, %v2178_v8 }
 0x80c   :  { %v2187_v12 = vadd.f32 %v2186_v10, %v2179_v58 }
 0x80d   :  { %v2182_v59 = vrot.slane %v2181_v11, 2 }
 0x80e   :  { %v2188_v14 = vrot.slane %v2187_v12, 2 }
 0x80f   :  { %v2183_v13 = vadd.f32 %v2182_v59, %v2181_v11 }
 0x810   :  { %v2189_v16 = vadd.f32 %v2188_v14, %v2187_v12 }
 0x811   :  { %v2184_v60 = vrot.slane %v2183_v13, 1 }
 0x812   :  { %v2190_v61 = vrot.slane %v2189_v16, 1 }
 0x813   :  { %v2185_v54 = vadd.f32 %v2184_v60, %v2183_v13 }
 0x814   :  { %v2191_v0 = vadd.f32 %v2190_v61, %v2189_v16 }
 0x815   :  { %v2192_v24 = vmul.f32 0.125, %v2185_v54 }
 0x816   :  { %v2193_v3 = vmul.f32 0.125, %v2191_v0 }
 0x817   :  { %v2198_v46 = vadd.f32 1e-05, %v2192_v24 }
 0x818   :  { %v2199_v26 = vadd.f32 1e-05, %v2193_v3 }
 0x819   :  { %4626 = vrsqrt.f32 %v2198_v46 }
 0x81a   :  { %4628 = vrsqrt.f32 %v2199_v26 }
 0x823   :  { %v4627_v2 = vpop.eup %4626 }
 0x824   :  { %v4629_v23 = vpop.eup %4628  ;;  %v2202_v31 = vmul.f32 %v4627_v2, %v2176_v1 }
 0x825   :  { %v2203_v33 = vmul.f32 %v4629_v23, %v2177_v62 }
 0x826   :  { %v2215_v34 = vmul.f32 %v2208_v28, %v2202_v31 }
 0x827   :  { %v2216_v29 = vmul.f32 %v2212_v30, %v2203_v33 }
 0x828   :  { %v2228_v37 = vadd.f32 %v2221_v5, %v2215_v34 }
 0x829   :  { %v2229_v18 = vadd.f32 %v2225_v32, %v2216_v29 }
 0x82a   :  { %vm2230_vm14 = vcmp.ge.f32.partialorder %v2228_v37, 0.0  ;;  %v2232_v38 = vmul.f32 0.4, %v2228_v37 }
 0x82b   :  { %vm2231_vm15 = vcmp.ge.f32.partialorder %v2229_v18, 0.0  ;;  %v2233_v40 = vmul.f32 0.4, %v2229_v18 }
 0x82c   :  { %v5184_v20 = vsel %vm2230_vm14, %v2228_v37, %v2232_v38 }
 0x82d   :  { %v2235_v39 = vsel %vm2231_vm15, %v2229_v18, %v2233_v40 }
 0x82e   :  { %4768 = dma.done.wait [#allocation10 + $0x5], 8192 }
 0x82f   :  { %4769 = vsyncadd [#allocation10 + $0x5], 4294959104  ;;  %v2304_v19 = vpack.c.bf16 %v2235_v39, %v2235_v39  ;;  %v2240_v42 = vld [vmem:[#allocation7 + $0x8] sm:$0xff]  ;;  %v2242_v43 = vld [vmem:[#allocation7 + $0x18] sm:$0xff] }
 0x830   :  { %v2239_v44 = vld [vmem:[#allocation7] sm:$0xff]  ;;  %2305 = vmatprep.subr.bf16.mxu0 %v2240_v42  ;;  %2346 = vmatprep.subr.bf16.mxu1 %v2242_v43  ;;  %v2241_v22 = vld [vmem:[#allocation7 + $0x10] sm:$0xff]  ;;  %v2244_v4 = vld [vmem:[#allocation7 + $0x28] sm:$0xff] }
 0x831   :  { %2337 = vmatprep.mubr.bf16.mxu0 %v2304_v19  ;;  %2378 = vmatprep.mubr.bf16.mxu1 %v2304_v19  ;;  %v2246_v6 = vld [vmem:[#allocation7 + $0x38] sm:$0xff]  ;;  %v2243_v45 = vld [vmem:[#allocation7 + $0x20] sm:$0xff]  ;;  %v2245_v52 = vld [vmem:[#allocation7 + $0x30] sm:$0xff] }
 0x832   :  { %2306 = vmatpush1.bf16.msra.mxu0 %v2239_v44  ;;  %2347 = vmatpush1.bf16.msra.mxu1 %v2241_v22  ;;  %v2248_v48 = vld [vmem:[#allocation7 + $0x48] sm:$0xff]  ;;  %v2250_v49 = vld [vmem:[#allocation7 + $0x58] sm:$0xff]  ;;  %v2247_v51 = vld [vmem:[#allocation7 + $0x40] sm:$0xff] }
 0x833   :  { %2307 = vmatprep.subr.bf16.mxu0 %v2244_v4  ;;  %2348 = vmatprep.subr.bf16.mxu1 %v2246_v6  ;;  %v2249_v53 = vld [vmem:[#allocation7 + $0x50] sm:$0xff]  ;;  %v2252_v56 = vld [vmem:[#allocation7 + $0x68] sm:$0xff]  ;;  %v2254_v35 = vld [vmem:[#allocation7 + $0x78] sm:$0xff] }
 0x834   :  { %v2251_v57 = vld [vmem:[#allocation7 + $0x60] sm:$0xff]  ;;  %v2253_v7 = vld [vmem:[#allocation7 + $0x70] sm:$0xff]  ;;  %v2256_v63 = vld [vmem:[#allocation7 + $0x88] sm:$0xff] }
 0x835   :  { %v2258_v1 = vld [vmem:[#allocation7 + $0x98] sm:$0xff]  ;;  %v2255_v62 = vld [vmem:[#allocation7 + $0x80] sm:$0xff]  ;;  %v2257_v8 = vld [vmem:[#allocation7 + $0x90] sm:$0xff] }
 0x836   :  { %2308 = vmatpush1.bf16.msra.mxu0 %v2243_v45  ;;  %2349 = vmatpush1.bf16.msra.mxu1 %v2245_v52  ;;  %v2260_v58 = vld [vmem:[#allocation7 + $0xa8] sm:$0xff]  ;;  %v2262_v9 = vld [vmem:[#allocation7 + $0xb8] sm:$0xff]  ;;  %v2259_v10 = vld [vmem:[#allocation7 + $0xa0] sm:$0xff] }
 0x837   :  { %2309 = vmatprep.subr.bf16.mxu0 %v2248_v48  ;;  %2350 = vmatprep.subr.bf16.mxu1 %v2250_v49  ;;  %v2261_v11 = vld [vmem:[#allocation7 + $0xb0] sm:$0xff]  ;;  %v2264_v12 = vld [vmem:[#allocation7 + $0xc8] sm:$0xff]  ;;  %v2266_v59 = vld [vmem:[#allocation7 + $0xd8] sm:$0xff]  ;;  %v2303_v49 = vpack.c.bf16 %v5184_v20, %v5184_v20 }
 0x838   :  { %v2263_v14 = vld [vmem:[#allocation7 + $0xc0] sm:$0xff]  ;;  %v2265_v13 = vld [vmem:[#allocation7 + $0xd0] sm:$0xff]  ;;  %v2268_v16 = vld [vmem:[#allocation7 + $0xe8] sm:$0xff] }
 0x839   :  { %v2270_v60 = vld [vmem:[#allocation7 + $0xf8] sm:$0xff]  ;;  %v2267_v61 = vld [vmem:[#allocation7 + $0xe0] sm:$0xff]  ;;  %v2269_v54 = vld [vmem:[#allocation7 + $0xf0] sm:$0xff] }
 0x83a   :  { %2310 = vmatpush1.bf16.msra.mxu0 %v2247_v51  ;;  %2351 = vmatpush1.bf16.msra.mxu1 %v2249_v53  ;;  %v2272_v0 = vld [vmem:[#allocation7 + $0x108] sm:$0xff]  ;;  %v2274_v24 = vld [vmem:[#allocation7 + $0x118] sm:$0xff]  ;;  %v2271_v3 = vld [vmem:[#allocation7 + $0x100] sm:$0xff] }
 0x83b   :  { %2311 = vmatprep.subr.bf16.mxu0 %v2252_v56  ;;  %2352 = vmatprep.subr.bf16.mxu1 %v2254_v35  ;;  %v2273_v46 = vld [vmem:[#allocation7 + $0x110] sm:$0xff]  ;;  %v2276_v26 = vld [vmem:[#allocation7 + $0x128] sm:$0xff]  ;;  %v2278_v27 = vld [vmem:[#allocation7 + $0x138] sm:$0xff] }
 0x83c   :  { %v2275_v55 = vld [vmem:[#allocation7 + $0x120] sm:$0xff]  ;;  %v2277_v28 = vld [vmem:[#allocation7 + $0x130] sm:$0xff]  ;;  %v2280_v2 = vld [vmem:[#allocation7 + $0x148] sm:$0xff] }
 0x83d   :  { %v2282_v30 = vld [vmem:[#allocation7 + $0x158] sm:$0xff]  ;;  %v2279_v23 = vld [vmem:[#allocation7 + $0x140] sm:$0xff]  ;;  %v2281_v31 = vld [vmem:[#allocation7 + $0x150] sm:$0xff] }
 0x83e   :  { %2312 = vmatpush1.bf16.msra.mxu0 %v2251_v57  ;;  %2353 = vmatpush1.bf16.msra.mxu1 %v2253_v7  ;;  %v2284_v5 = vld [vmem:[#allocation7 + $0x168] sm:$0xff]  ;;  %v2286_v33 = vld [vmem:[#allocation7 + $0x178] sm:$0xff]  ;;  %v2283_v32 = vld [vmem:[#allocation7 + $0x160] sm:$0xff] }
 0x83f   :  { %2313 = vmatprep.subr.bf16.mxu0 %v2256_v63  ;;  %2354 = vmatprep.subr.bf16.mxu1 %v2258_v1  ;;  %v2285_v34 = vld [vmem:[#allocation7 + $0x170] sm:$0xff]  ;;  %v2288_v29 = vld [vmem:[#allocation7 + $0x188] sm:$0xff]  ;;  %v2290_v37 = vld [vmem:[#allocation7 + $0x198] sm:$0xff] }
 0x840   :  { %v2287_v18 = vld [vmem:[#allocation7 + $0x180] sm:$0xff]  ;;  %v2289_v38 = vld [vmem:[#allocation7 + $0x190] sm:$0xff]  ;;  %v2292_v40 = vld [vmem:[#allocation7 + $0x1a8] sm:$0xff] }
 0x841   :  { %v2294_v39 = vld [vmem:[#allocation7 + $0x1b8] sm:$0xff]  ;;  %v2291_v19 = vld [vmem:[#allocation7 + $0x1a0] sm:$0xff]  ;;  %v2293_v42 = vld [vmem:[#allocation7 + $0x1b0] sm:$0xff] }
 0x842   :  { %2314 = vmatpush1.bf16.msra.mxu0 %v2255_v62  ;;  %2355 = vmatpush1.bf16.msra.mxu1 %v2257_v8  ;;  %v2296_v43 = vld [vmem:[#allocation7 + $0x1c8] sm:$0xff]  ;;  %v2298_v44 = vld [vmem:[#allocation7 + $0x1d8] sm:$0xff]  ;;  %v2295_v22 = vld [vmem:[#allocation7 + $0x1c0] sm:$0xff] }
 0x843   :  { %2315 = vmatprep.subr.bf16.mxu0 %v2260_v58  ;;  %2356 = vmatprep.subr.bf16.mxu1 %v2262_v9  ;;  %v2297_v4 = vld [vmem:[#allocation7 + $0x1d0] sm:$0xff]  ;;  %v2300_v6 = vld [vmem:[#allocation7 + $0x1e8] sm:$0xff]  ;;  %v2302_v45 = vld [vmem:[#allocation7 + $0x1f8] sm:$0xff] }
 0x844   :  { %v2299_v52 = vld [vmem:[#allocation7 + $0x1e0] sm:$0xff]  ;;  %v2301_v48 = vld [vmem:[#allocation7 + $0x1f0] sm:$0xff] }
 0x846   :  { %2316 = vmatpush1.bf16.msra.mxu0 %v2259_v10  ;;  %2357 = vmatpush1.bf16.msra.mxu1 %v2261_v11 }
 0x847   :  { %2317 = vmatprep.subr.bf16.mxu0 %v2264_v12  ;;  %2358 = vmatprep.subr.bf16.mxu1 %v2266_v59 }
 0x84a   :  { %2318 = vmatpush1.bf16.msra.mxu0 %v2263_v14  ;;  %2359 = vmatpush1.bf16.msra.mxu1 %v2265_v13 }
 0x84b   :  { %2319 = vmatprep.subr.bf16.mxu0 %v2268_v16  ;;  %2360 = vmatprep.subr.bf16.mxu1 %v2270_v60 }
 0x84e   :  { %2320 = vmatpush1.bf16.msra.mxu0 %v2267_v61  ;;  %2361 = vmatpush1.bf16.msra.mxu1 %v2269_v54 }
 0x84f   :  { %2321 = vmatprep.subr.bf16.mxu0 %v2272_v0  ;;  %2362 = vmatprep.subr.bf16.mxu1 %v2274_v24 }
 0x852   :  { %2322 = vmatpush1.bf16.msra.mxu0 %v2271_v3  ;;  %2363 = vmatpush1.bf16.msra.mxu1 %v2273_v46 }
 0x853   :  { %2323 = vmatprep.subr.bf16.mxu0 %v2276_v26  ;;  %2364 = vmatprep.subr.bf16.mxu1 %v2278_v27 }
 0x856   :  { %2324 = vmatpush1.bf16.msra.mxu0 %v2275_v55  ;;  %2365 = vmatpush1.bf16.msra.mxu1 %v2277_v28 }
 0x857   :  { %2325 = vmatprep.subr.bf16.mxu0 %v2280_v2  ;;  %2366 = vmatprep.subr.bf16.mxu1 %v2282_v30 }
 0x85a   :  { %2326 = vmatpush1.bf16.msra.mxu0 %v2279_v23  ;;  %2367 = vmatpush1.bf16.msra.mxu1 %v2281_v31 }
 0x85b   :  { %2327 = vmatprep.subr.bf16.mxu0 %v2284_v5  ;;  %2368 = vmatprep.subr.bf16.mxu1 %v2286_v33 }
 0x85e   :  { %2328 = vmatpush1.bf16.msra.mxu0 %v2283_v32  ;;  %2369 = vmatpush1.bf16.msra.mxu1 %v2285_v34 }
 0x85f   :  { %2329 = vmatprep.subr.bf16.mxu0 %v2288_v29  ;;  %2370 = vmatprep.subr.bf16.mxu1 %v2290_v37 }
 0x862   :  { %2330 = vmatpush1.bf16.msra.mxu0 %v2287_v18  ;;  %2371 = vmatpush1.bf16.msra.mxu1 %v2289_v38 }
 0x863   :  { %2331 = vmatprep.subr.bf16.mxu0 %v2292_v40  ;;  %2372 = vmatprep.subr.bf16.mxu1 %v2294_v39 }
 0x866   :  { %2332 = vmatpush1.bf16.msra.mxu0 %v2291_v19  ;;  %2373 = vmatpush1.bf16.msra.mxu1 %v2293_v42 }
 0x867   :  { %2333 = vmatprep.subr.bf16.mxu0 %v2296_v43  ;;  %2374 = vmatprep.subr.bf16.mxu1 %v2298_v44 }
 0x86a   :  { %2334 = vmatpush1.bf16.msra.mxu0 %v2295_v22  ;;  %2375 = vmatpush1.bf16.msra.mxu1 %v2297_v4 }
 0x86b   :  { %2335 = vmatprep.subr.bf16.mxu0 %v2300_v6  ;;  %2376 = vmatprep.subr.bf16.mxu1 %v2302_v45 }
 0x86e   :  { %2336 = vmatpush1.bf16.msra.mxu0 %v2299_v52  ;;  %2377 = vmatpush1.bf16.msra.mxu1 %v2301_v48 }
 0x871   :  { %2338 = vmatmul.mubr.bf16.vlgmr.msra.gmra.mrb[32].mxu0 %v2303_v49  ;;  %2379 = vmatmul.mubr.bf16.vlgmr.msra.gmra.mrb[16].mxu1 %v2303_v49 }
 0x944   :  { %v2339_v51 = vpop.f32.mrb[32].mxu0  ;;  %v2380_v53 = vpop.f32.mrb[16].mxu1 }
 0x945   :  { %v2387_v56 = vrot.slane %v2339_v51, 4  ;;  %v2399_v35 = vrot.slane %v2380_v53, 4  ;;  %v2341_v57 = vpop.f32.mrb[33].mxu0  ;;  %v2382_v7 = vpop.f32.mrb[17].mxu1 }
 0x946   :  { %v2393_v63 = vrot.slane %v2341_v57, 4  ;;  %v2405_v1 = vrot.slane %v2382_v7, 4  ;;  %v2343_v62 = vpop.f32.mrb[34].mxu0  ;;  %v2384_v8 = vpop.f32.mrb[18].mxu1 }
 0x947   :  { %v2388_v58 = vadd.f32 %v2387_v56, %v2339_v51  ;;  %v2400_v9 = vadd.f32 %v2399_v35, %v2380_v53  ;;  %v2344_v10 = vpop.f32.mrb[35].mxu0  ;;  %v2385_v11 = vpop.f32.mrb[19].mxu1 }
 0x948   :  { %v2394_v12 = vadd.f32 %v2393_v63, %v2341_v57  ;;  %v2406_v20 = vadd.f32 %v2405_v1, %v2382_v7 }
 0x949   :  { %v2389_v59 = vrot.slane %v2388_v58, 2  ;;  %v2401_v14 = vrot.slane %v2400_v9, 2 }
 0x94a   :  { %v2395_v13 = vrot.slane %v2394_v12, 2  ;;  %v2407_v16 = vrot.slane %v2406_v20, 2 }
 0x94b   :  { %v2390_v60 = vadd.f32 %v2389_v59, %v2388_v58  ;;  %v2402_v61 = vadd.f32 %v2401_v14, %v2400_v9 }
 0x94c   :  { %v2396_v54 = vadd.f32 %v2395_v13, %v2394_v12  ;;  %v2408_v0 = vadd.f32 %v2407_v16, %v2406_v20 }
 0x94d   :  { %v2391_v24 = vrot.slane %v2390_v60, 1  ;;  %v2403_v3 = vrot.slane %v2402_v61, 1 }
 0x94e   :  { %v2397_v46 = vrot.slane %v2396_v54, 1  ;;  %v2409_v26 = vrot.slane %v2408_v0, 1 }
 0x94f   :  { %v2392_v27 = vadd.f32 %v2391_v24, %v2390_v60  ;;  %v2404_v55 = vadd.f32 %v2403_v3, %v2402_v61  ;;  %v2452_v60 = vld [vmem:[#allocation11 + $0x3a] ss:$8 sm:$0xf]  ;;  %v2454_v61 = vld [vmem:[#allocation11 + $0x3b] ss:$8 sm:$0xf] }
 0x950   :  { %v2398_v28 = vadd.f32 %v2397_v46, %v2396_v54  ;;  %v2410_v2 = vadd.f32 %v2409_v26, %v2408_v0  ;;  %v2471_v54 = vrot.slane %v2452_v60, %v5097_v47  ;;  %v2479_v24 = vrot.slane %v2452_v60, %v5115_v15 }
 0x951   :  { %v2411_v30 = vmul.f32 0.125, %v2392_v27  ;;  %v2413_v23 = vmul.f32 0.125, %v2404_v55  ;;  %v2496_v26 = vrot.slane %v2454_v61, %v5097_v47  ;;  %v2475_v27 = vrot.slane %v2452_v60, %v5100_v50 }
 0x952   :  { %v2412_v31 = vmul.f32 0.125, %v2398_v28  ;;  %v2414_v5 = vmul.f32 0.125, %v2410_v2  ;;  %v2504_v2 = vrot.slane %v2454_v61, %v5115_v15 }
 0x953   :  { %v2415_v33 = vsub.f32 %v2339_v51, %v2411_v30  ;;  %v2417_v32 = vsub.f32 %v2380_v53, %v2413_v23  ;;  %v2483_v30 = vrot.slane %v2452_v60, %v5118_v17 }
 0x954   :  { %v2416_v34 = vsub.f32 %v2341_v57, %v2412_v31  ;;  %v2418_v29 = vsub.f32 %v2382_v7, %v2414_v5 }
 0x955   :  { %v2419_v37 = vmul.f32 %v2415_v33, %v2415_v33  ;;  %v2421_v18 = vmul.f32 %v2417_v32, %v2417_v32 }
 0x956   :  { %v2420_v38 = vmul.f32 %v2416_v34, %v2416_v34  ;;  %v2422_v40 = vmul.f32 %v2418_v29, %v2418_v29 }
 0x957   :  { %v2423_v39 = vrot.slane %v2419_v37, 4  ;;  %v2435_v19 = vrot.slane %v2421_v18, 4 }
 0x958   :  { %v2429_v42 = vrot.slane %v2420_v38, 4  ;;  %v2441_v43 = vrot.slane %v2422_v40, 4 }
 0x959   :  { %v2424_v44 = vadd.f32 %v2423_v39, %v2419_v37  ;;  %v2436_v22 = vadd.f32 %v2435_v19, %v2421_v18  ;;  %v2500_v37 = vrot.slane %v2454_v61, %v5100_v50 }
 0x95a   :  { %v2430_v4 = vadd.f32 %v2429_v42, %v2420_v38  ;;  %v2442_v6 = vadd.f32 %v2441_v43, %v2422_v40  ;;  %v2508_v40 = vrot.slane %v2454_v61, %v5118_v17 }
 0x95b   :  { %v2425_v45 = vrot.slane %v2424_v44, 2  ;;  %v2437_v52 = vrot.slane %v2436_v22, 2 }
 0x95c   :  { %v2431_v48 = vrot.slane %v2430_v4, 2  ;;  %v2443_v49 = vrot.slane %v2442_v6, 2 }
 0x95d   :  { %v2426_v51 = vadd.f32 %v2425_v45, %v2424_v44  ;;  %v2438_v53 = vadd.f32 %v2437_v52, %v2436_v22 }
 0x95e   :  { %v2432_v56 = vadd.f32 %v2431_v48, %v2430_v4  ;;  %v2444_v35 = vadd.f32 %v2443_v49, %v2442_v6 }
 0x95f   :  { %v2427_v57 = vrot.slane %v2426_v51, 1  ;;  %v2439_v7 = vrot.slane %v2438_v53, 1 }
 0x960   :  { %v2433_v63 = vrot.slane %v2432_v56, 1  ;;  %v2445_v1 = vrot.slane %v2444_v35, 1 }
 0x961   :  { %v2428_v62 = vadd.f32 %v2427_v57, %v2426_v51  ;;  %v2440_v8 = vadd.f32 %v2439_v7, %v2438_v53 }
 0x962   :  { %v2434_v58 = vadd.f32 %v2433_v63, %v2432_v56  ;;  %v2446_v9 = vadd.f32 %v2445_v1, %v2444_v35 }
 0x963   :  { %v2447_v10 = vmul.f32 0.125, %v2428_v62  ;;  %v2449_v11 = vmul.f32 0.125, %v2440_v8 }
 0x964   :  { %v2448_v12 = vmul.f32 0.125, %v2434_v58  ;;  %v2450_v20 = vmul.f32 0.125, %v2446_v9 }
 0x965   :  { %v2455_v59 = vadd.f32 1e-05, %v2447_v10  ;;  %v2457_v14 = vadd.f32 1e-05, %v2449_v11 }
 0x966   :  { %v2456_v13 = vadd.f32 1e-05, %v2448_v12  ;;  %v2458_v16 = vadd.f32 1e-05, %v2450_v20 }
 0x967   :  { %4630 = vrsqrt.f32 %v2455_v59 }
 0x968   :  { %4632 = vrsqrt.f32 %v2457_v14 }
 0x969   :  { %4634 = vrsqrt.f32 %v2456_v13 }
 0x96a   :  { %4636 = vrsqrt.f32 %v2458_v16 }
 0x971   :  { %v4631_v0 = vpop.eup %4630 }
 0x972   :  { %v4633_v3 = vpop.eup %4632  ;;  %v2463_v46 = vmul.f32 %v4631_v0, %v2415_v33 }
 0x973   :  { %v4635_v55 = vpop.eup %4634  ;;  %v2465_v28 = vmul.f32 %v4633_v3, %v2417_v32 }
 0x974   :  { %v4637_v23 = vpop.eup %4636  ;;  %v2488_v31 = vmul.f32 %v2471_v54, %v2463_v46  ;;  %v2464_v5 = vmul.f32 %v4635_v55, %v2416_v34 }
 0x975   :  { %v2490_v18 = vmul.f32 %v2479_v24, %v2465_v28  ;;  %v2466_v38 = vmul.f32 %v4637_v23, %v2418_v29 }
 0x976   :  { %v2513_v33 = vadd.f32 %v2496_v26, %v2488_v31  ;;  %v2489_v39 = vmul.f32 %v2475_v27, %v2464_v5 }
 0x977   :  { %v2515_v19 = vadd.f32 %v2504_v2, %v2490_v18  ;;  %v2491_v42 = vmul.f32 %v2483_v30, %v2466_v38 }
 0x978   :  { %vm2517_vm0 = vcmp.ge.f32.partialorder %v2513_v33, 0.0  ;;  %v2521_v43 = vmul.f32 0.4, %v2513_v33  ;;  %v2514_v32 = vadd.f32 %v2500_v37, %v2489_v39 }
 0x979   :  { %vm2519_vm2 = vcmp.ge.f32.partialorder %v2515_v19, 0.0  ;;  %v2523_v44 = vmul.f32 0.4, %v2515_v19  ;;  %v2516_v22 = vadd.f32 %v2508_v40, %v2491_v42 }
 0x97a   :  { %v5196_v4 = vsel %vm2517_vm0, %v2513_v33, %v2521_v43  ;;  %vm2518_vm3 = vcmp.ge.f32.partialorder %v2514_v32, 0.0  ;;  %v2522_v34 = vmul.f32 0.4, %v2514_v32 }
 0x97b   :  { %v5198_v6 = vsel %vm2519_vm2, %v2515_v19, %v2523_v44  ;;  %vm2520_vm4 = vcmp.ge.f32.partialorder %v2516_v22, 0.0  ;;  %v2524_v29 = vmul.f32 0.4, %v2516_v22 }
 0x97c   :  { %v2526_v45 = vsel %vm2518_vm3, %v2514_v32, %v2522_v34 }
 0x97d   :  { %v5200_v52 = vsel %vm2520_vm4, %v2516_v22, %v2524_v29 }
 0x97e   :  { %4770 = dma.done.wait [#allocation10 + $0x6], 20480 }
 0x97f   :  { %4771 = vsyncadd [#allocation10 + $0x6], 4294946816  ;;  %v5202_v48 = vpack.c.bf16 %v2526_v45, %v2526_v45  ;;  %v2533_v49 = vld [vmem:[#allocation8 + $0x8] sm:$0xff]  ;;  %v2535_v51 = vld [vmem:[#allocation8 + $0x18] sm:$0xff] }
 0x980   :  { %v2532_v53 = vld [vmem:[#allocation8] sm:$0xff]  ;;  %2696 = vmatprep.subr.bf16.mxu0 %v2533_v49  ;;  %2778 = vmatprep.subr.bf16.mxu1 %v2535_v51  ;;  %v2534_v56 = vld [vmem:[#allocation8 + $0x10] sm:$0xff]  ;;  %v2537_v7 = vld [vmem:[#allocation8 + $0x28] sm:$0xff] }
 0x981   :  { %2728 = vmatprep.mubr.bf16.mxu0 %v5202_v48  ;;  %2810 = vmatprep.mubr.bf16.mxu1 %v5202_v48  ;;  %v2538_v35 = vld [vmem:[#allocation8 + $0x30] sm:$0xff]  ;;  %v2540_v57 = vld [vmem:[#allocation8 + $0x40] sm:$0xff]  ;;  %v2539_v63 = vld [vmem:[#allocation8 + $0x38] sm:$0xff] }
 0x982   :  { %2697 = vmatpush1.bf16.msra.mxu0 %v2532_v53  ;;  %2779 = vmatpush1.bf16.msra.mxu1 %v2534_v56  ;;  %v2543_v1 = vld [vmem:[#allocation8 + $0x58] sm:$0xff]  ;;  %v2545_v62 = vld [vmem:[#allocation8 + $0x68] sm:$0xff]  ;;  %v2542_v8 = vld [vmem:[#allocation8 + $0x50] sm:$0xff] }
 0x983   :  { %2698 = vmatprep.subr.bf16.mxu0 %v2538_v35  ;;  %2780 = vmatprep.subr.bf16.mxu1 %v2540_v57  ;;  %v2544_v58 = vld [vmem:[#allocation8 + $0x60] sm:$0xff]  ;;  %v2550_v10 = vld [vmem:[#allocation8 + $0x90] sm:$0xff]  ;;  %v2547_v11 = vld [vmem:[#allocation8 + $0x78] sm:$0xff] }
 0x984   :  { %v2548_v9 = vld [vmem:[#allocation8 + $0x80] sm:$0xff]  ;;  %v2549_v12 = vld [vmem:[#allocation8 + $0x88] sm:$0xff]  ;;  %v2555_v59 = vld [vmem:[#allocation8 + $0xb8] sm:$0xff] }
 0x985   :  { %v2553_v20 = vld [vmem:[#allocation8 + $0xa8] sm:$0xff]  ;;  %v2552_v14 = vld [vmem:[#allocation8 + $0xa0] sm:$0xff]  ;;  %v2554_v13 = vld [vmem:[#allocation8 + $0xb0] sm:$0xff] }
 0x986   :  { %2699 = vmatpush1.bf16.msra.mxu0 %v2537_v7  ;;  %2781 = vmatpush1.bf16.msra.mxu1 %v2539_v63  ;;  %v2558_v16 = vld [vmem:[#allocation8 + $0xd0] sm:$0xff]  ;;  %v2560_v60 = vld [vmem:[#allocation8 + $0xe0] sm:$0xff]  ;;  %v2557_v61 = vld [vmem:[#allocation8 + $0xc8] sm:$0xff] }
 0x987   :  { %2700 = vmatprep.subr.bf16.mxu0 %v2543_v1  ;;  %2782 = vmatprep.subr.bf16.mxu1 %v2545_v62  ;;  %v2559_v54 = vld [vmem:[#allocation8 + $0xd8] sm:$0xff]  ;;  %v2565_v24 = vld [vmem:[#allocation8 + $0x108] sm:$0xff]  ;;  %v2562_v3 = vld [vmem:[#allocation8 + $0xf0] sm:$0xff] }
 0x988   :  { %v2563_v0 = vld [vmem:[#allocation8 + $0xf8] sm:$0xff]  ;;  %v2564_v46 = vld [vmem:[#allocation8 + $0x100] sm:$0xff]  ;;  %v2570_v27 = vld [vmem:[#allocation8 + $0x130] sm:$0xff] }
 0x989   :  { %v2568_v26 = vld [vmem:[#allocation8 + $0x120] sm:$0xff]  ;;  %v2567_v55 = vld [vmem:[#allocation8 + $0x118] sm:$0xff]  ;;  %v2569_v28 = vld [vmem:[#allocation8 + $0x128] sm:$0xff] }
 0x98a   :  { %2701 = vmatpush1.bf16.msra.mxu0 %v2542_v8  ;;  %2783 = vmatpush1.bf16.msra.mxu1 %v2544_v58  ;;  %v2573_v2 = vld [vmem:[#allocation8 + $0x148] sm:$0xff]  ;;  %v2575_v30 = vld [vmem:[#allocation8 + $0x158] sm:$0xff]  ;;  %v2572_v23 = vld [vmem:[#allocation8 + $0x140] sm:$0xff] }
 0x98b   :  { %2702 = vmatprep.subr.bf16.mxu0 %v2548_v9  ;;  %2784 = vmatprep.subr.bf16.mxu1 %v2550_v10  ;;  %v2574_v31 = vld [vmem:[#allocation8 + $0x150] sm:$0xff]  ;;  %v2580_v37 = vld [vmem:[#allocation8 + $0x180] sm:$0xff]  ;;  %v2577_v18 = vld [vmem:[#allocation8 + $0x168] sm:$0xff] }
 0x98c   :  { %v2578_v5 = vld [vmem:[#allocation8 + $0x170] sm:$0xff]  ;;  %v2579_v38 = vld [vmem:[#allocation8 + $0x178] sm:$0xff]  ;;  %v2585_v33 = vld [vmem:[#allocation8 + $0x1a8] sm:$0xff] }
 0x98d   :  { %v2583_v40 = vld [vmem:[#allocation8 + $0x198] sm:$0xff]  ;;  %v2582_v39 = vld [vmem:[#allocation8 + $0x190] sm:$0xff]  ;;  %v2584_v19 = vld [vmem:[#allocation8 + $0x1a0] sm:$0xff] }
 0x98e   :  { %2703 = vmatpush1.bf16.msra.mxu0 %v2547_v11  ;;  %2785 = vmatpush1.bf16.msra.mxu1 %v2549_v12  ;;  %v2588_v42 = vld [vmem:[#allocation8 + $0x1c0] sm:$0xff]  ;;  %v2590_v43 = vld [vmem:[#allocation8 + $0x1d0] sm:$0xff]  ;;  %v2587_v32 = vld [vmem:[#allocation8 + $0x1b8] sm:$0xff]  ;;  %v5208_v11 = vpack.c.bf16 %v5196_v4, %v5196_v4 }
 0x98f   :  { %2704 = vmatprep.subr.bf16.mxu0 %v2553_v20  ;;  %2786 = vmatprep.subr.bf16.mxu1 %v2555_v59  ;;  %v2589_v44 = vld [vmem:[#allocation8 + $0x1c8] sm:$0xff]  ;;  %v2595_v34 = vld [vmem:[#allocation8 + $0x1f8] sm:$0xff]  ;;  %v2592_v29 = vld [vmem:[#allocation8 + $0x1e0] sm:$0xff] }
 0x990   :  { %v2593_v22 = vld [vmem:[#allocation8 + $0x1e8] sm:$0xff]  ;;  %v2594_v45 = vld [vmem:[#allocation8 + $0x1f0] sm:$0xff]  ;;  %v2600_v51 = vld [vmem:[#allocation8 + $0x220] sm:$0xff] }
 0x991   :  { %v2598_v49 = vld [vmem:[#allocation8 + $0x210] sm:$0xff]  ;;  %v2597_v53 = vld [vmem:[#allocation8 + $0x208] sm:$0xff]  ;;  %v2599_v56 = vld [vmem:[#allocation8 + $0x218] sm:$0xff] }
 0x992   :  { %2705 = vmatpush1.bf16.msra.mxu0 %v2552_v14  ;;  %2787 = vmatpush1.bf16.msra.mxu1 %v2554_v13  ;;  %v2603_v35 = vld [vmem:[#allocation8 + $0x238] sm:$0xff]  ;;  %v2605_v57 = vld [vmem:[#allocation8 + $0x248] sm:$0xff]  ;;  %v2602_v7 = vld [vmem:[#allocation8 + $0x230] sm:$0xff]  ;;  %v5212_v13 = vpack.c.bf16 %v5200_v52, %v5200_v52 }
 0x993   :  { %2706 = vmatprep.subr.bf16.mxu0 %v2558_v16  ;;  %2788 = vmatprep.subr.bf16.mxu1 %v2560_v60  ;;  %v2604_v63 = vld [vmem:[#allocation8 + $0x240] sm:$0xff]  ;;  %v2610_v62 = vld [vmem:[#allocation8 + $0x270] sm:$0xff]  ;;  %v2607_v8 = vld [vmem:[#allocation8 + $0x258] sm:$0xff] }
 0x994   :  { %v2608_v1 = vld [vmem:[#allocation8 + $0x260] sm:$0xff]  ;;  %v2609_v58 = vld [vmem:[#allocation8 + $0x268] sm:$0xff]  ;;  %v2615_v10 = vld [vmem:[#allocation8 + $0x298] sm:$0xff] }
 0x995   :  { %v2613_v9 = vld [vmem:[#allocation8 + $0x288] sm:$0xff]  ;;  %v2612_v12 = vld [vmem:[#allocation8 + $0x280] sm:$0xff]  ;;  %v2614_v20 = vld [vmem:[#allocation8 + $0x290] sm:$0xff] }
 0x996   :  { %2707 = vmatpush1.bf16.msra.mxu0 %v2557_v61  ;;  %2789 = vmatpush1.bf16.msra.mxu1 %v2559_v54  ;;  %v2618_v59 = vld [vmem:[#allocation8 + $0x2b0] sm:$0xff]  ;;  %v2620_v14 = vld [vmem:[#allocation8 + $0x2c0] sm:$0xff]  ;;  %v2617_v4 = vld [vmem:[#allocation8 + $0x2a8] sm:$0xff] }
 0x997   :  { %2708 = vmatprep.subr.bf16.mxu0 %v2563_v0  ;;  %2790 = vmatprep.subr.bf16.mxu1 %v2565_v24  ;;  %v2619_v16 = vld [vmem:[#allocation8 + $0x2b8] sm:$0xff]  ;;  %v2625_v61 = vld [vmem:[#allocation8 + $0x2e8] sm:$0xff]  ;;  %v2622_v52 = vld [vmem:[#allocation8 + $0x2d0] sm:$0xff] }
 0x998   :  { %v2623_v60 = vld [vmem:[#allocation8 + $0x2d8] sm:$0xff]  ;;  %v2624_v54 = vld [vmem:[#allocation8 + $0x2e0] sm:$0xff]  ;;  %v2630_v24 = vld [vmem:[#allocation8 + $0x310] sm:$0xff] }
 0x999   :  { %v2628_v0 = vld [vmem:[#allocation8 + $0x300] sm:$0xff] }
 0x99a   :  { %2709 = vmatpush1.bf16.msra.mxu0 %v2562_v3  ;;  %2791 = vmatpush1.bf16.msra.mxu1 %v2564_v46  ;;  %v2627_v3 = vld [vmem:[#allocation8 + $0x2f8] sm:$0xff]  ;;  %v2629_v46 = vld [vmem:[#allocation8 + $0x308] sm:$0xff] }
 0x99b   :  { %2710 = vmatprep.subr.bf16.mxu0 %v2568_v26  ;;  %2792 = vmatprep.subr.bf16.mxu1 %v2570_v27  ;;  %v2633_v26 = vld [vmem:[#allocation8 + $0x328] sm:$0xff]  ;;  %v2635_v27 = vld [vmem:[#allocation8 + $0x338] sm:$0xff] }
 0x99e   :  { %2711 = vmatpush1.bf16.msra.mxu0 %v2567_v55  ;;  %2793 = vmatpush1.bf16.msra.mxu1 %v2569_v28  ;;  %v2632_v55 = vld [vmem:[#allocation8 + $0x320] sm:$0xff]  ;;  %v2634_v28 = vld [vmem:[#allocation8 + $0x330] sm:$0xff] }
 0x99f   :  { %2712 = vmatprep.subr.bf16.mxu0 %v2573_v2  ;;  %2794 = vmatprep.subr.bf16.mxu1 %v2575_v30  ;;  %v2638_v2 = vld [vmem:[#allocation8 + $0x350] sm:$0xff]  ;;  %v2640_v30 = vld [vmem:[#allocation8 + $0x360] sm:$0xff] }
 0x9a2   :  { %2713 = vmatpush1.bf16.msra.mxu0 %v2572_v23  ;;  %2795 = vmatpush1.bf16.msra.mxu1 %v2574_v31  ;;  %v2637_v23 = vld [vmem:[#allocation8 + $0x348] sm:$0xff]  ;;  %v2639_v31 = vld [vmem:[#allocation8 + $0x358] sm:$0xff] }
 0x9a3   :  { %2714 = vmatprep.subr.bf16.mxu0 %v2578_v5  ;;  %2796 = vmatprep.subr.bf16.mxu1 %v2580_v37  ;;  %v2643_v5 = vld [vmem:[#allocation8 + $0x378] sm:$0xff]  ;;  %v2645_v37 = vld [vmem:[#allocation8 + $0x388] sm:$0xff] }
 0x9a6   :  { %2715 = vmatpush1.bf16.msra.mxu0 %v2577_v18  ;;  %2797 = vmatpush1.bf16.msra.mxu1 %v2579_v38  ;;  %v2642_v18 = vld [vmem:[#allocation8 + $0x370] sm:$0xff]  ;;  %v2644_v38 = vld [vmem:[#allocation8 + $0x380] sm:$0xff] }
 0x9a7   :  { %2716 = vmatprep.subr.bf16.mxu0 %v2583_v40  ;;  %2798 = vmatprep.subr.bf16.mxu1 %v2585_v33  ;;  %v2648_v40 = vld [vmem:[#allocation8 + $0x3a0] sm:$0xff]  ;;  %v2650_v33 = vld [vmem:[#allocation8 + $0x3b0] sm:$0xff] }
 0x9aa   :  { %2717 = vmatpush1.bf16.msra.mxu0 %v2582_v39  ;;  %2799 = vmatpush1.bf16.msra.mxu1 %v2584_v19  ;;  %v2647_v39 = vld [vmem:[#allocation8 + $0x398] sm:$0xff]  ;;  %v2649_v19 = vld [vmem:[#allocation8 + $0x3a8] sm:$0xff] }
 0x9ab   :  { %2718 = vmatprep.subr.bf16.mxu0 %v2588_v42  ;;  %2800 = vmatprep.subr.bf16.mxu1 %v2590_v43  ;;  %v2653_v42 = vld [vmem:[#allocation8 + $0x3c8] sm:$0xff]  ;;  %v2655_v43 = vld [vmem:[#allocation8 + $0x3d8] sm:$0xff] }
 0x9ae   :  { %2719 = vmatpush1.bf16.msra.mxu0 %v2587_v32  ;;  %2801 = vmatpush1.bf16.msra.mxu1 %v2589_v44  ;;  %v2652_v32 = vld [vmem:[#allocation8 + $0x3c0] sm:$0xff]  ;;  %v2654_v44 = vld [vmem:[#allocation8 + $0x3d0] sm:$0xff] }
 0x9af   :  { %2720 = vmatprep.subr.bf16.mxu0 %v2593_v22  ;;  %2802 = vmatprep.subr.bf16.mxu1 %v2595_v34  ;;  %v2658_v22 = vld [vmem:[#allocation8 + $0x3f0] sm:$0xff]  ;;  %v2660_v34 = vld [vmem:[#allocation8 + $0x400] sm:$0xff] }
 0x9b2   :  { %2721 = vmatpush1.bf16.msra.mxu0 %v2592_v29  ;;  %2803 = vmatpush1.bf16.msra.mxu1 %v2594_v45  ;;  %v2657_v29 = vld [vmem:[#allocation8 + $0x3e8] sm:$0xff]  ;;  %v2659_v45 = vld [vmem:[#allocation8 + $0x3f8] sm:$0xff] }
 0x9b3   :  { %2722 = vmatprep.subr.bf16.mxu0 %v2598_v49  ;;  %2804 = vmatprep.subr.bf16.mxu1 %v2600_v51  ;;  %v2663_v49 = vld [vmem:[#allocation8 + $0x418] sm:$0xff]  ;;  %v2665_v51 = vld [vmem:[#allocation8 + $0x428] sm:$0xff] }
 0x9b6   :  { %2723 = vmatpush1.bf16.msra.mxu0 %v2597_v53  ;;  %2805 = vmatpush1.bf16.msra.mxu1 %v2599_v56  ;;  %v2662_v53 = vld [vmem:[#allocation8 + $0x410] sm:$0xff]  ;;  %v2664_v56 = vld [vmem:[#allocation8 + $0x420] sm:$0xff] }
 0x9b7   :  { %2724 = vmatprep.subr.bf16.mxu0 %v2603_v35  ;;  %2806 = vmatprep.subr.bf16.mxu1 %v2605_v57  ;;  %v2668_v35 = vld [vmem:[#allocation8 + $0x440] sm:$0xff]  ;;  %v2670_v57 = vld [vmem:[#allocation8 + $0x450] sm:$0xff] }
 0x9ba   :  { %2725 = vmatpush1.bf16.msra.mxu0 %v2602_v7  ;;  %2807 = vmatpush1.bf16.msra.mxu1 %v2604_v63  ;;  %v2667_v7 = vld [vmem:[#allocation8 + $0x438] sm:$0xff]  ;;  %v2669_v63 = vld [vmem:[#allocation8 + $0x448] sm:$0xff] }
 0x9bb   :  { %2726 = vmatprep.subr.bf16.mxu0 %v2608_v1  ;;  %2808 = vmatprep.subr.bf16.mxu1 %v2610_v62  ;;  %v2673_v1 = vld [vmem:[#allocation8 + $0x468] sm:$0xff]  ;;  %v2675_v62 = vld [vmem:[#allocation8 + $0x478] sm:$0xff] }
 0x9be   :  { %2727 = vmatpush1.bf16.msra.mxu0 %v2607_v8  ;;  %2809 = vmatpush1.bf16.msra.mxu1 %v2609_v58  ;;  %v2672_v8 = vld [vmem:[#allocation8 + $0x460] sm:$0xff]  ;;  %v2674_v58 = vld [vmem:[#allocation8 + $0x470] sm:$0xff] }
 0x9bf   :  { %2737 = vmatprep.subr.bf16.mxu0 %v2613_v9  ;;  %2819 = vmatprep.subr.bf16.mxu1 %v2615_v10  ;;  %v2678_v9 = vld [vmem:[#allocation8 + $0x490] sm:$0xff]  ;;  %v2680_v10 = vld [vmem:[#allocation8 + $0x4a0] sm:$0xff] }
 0x9c1   :  { %2729 = vmatmul.mubr.bf16.vlgmr.msra.gmra.mrb[36].mxu0 %v5208_v11  ;;  %2811 = vmatmul.mubr.bf16.vlgmr.msra.gmra.mrb[20].mxu1 %v5208_v11 }
 0x9c2   :  { %2738 = vmatpush1.bf16.msra.mxu0 %v2612_v12  ;;  %2820 = vmatpush1.bf16.msra.mxu1 %v2614_v20  ;;  %v2677_v12 = vld [vmem:[#allocation8 + $0x488] sm:$0xff]  ;;  %v2679_v20 = vld [vmem:[#allocation8 + $0x498] sm:$0xff] }
 0x9c3   :  { %2739 = vmatprep.subr.bf16.mxu0 %v2618_v59  ;;  %2821 = vmatprep.subr.bf16.mxu1 %v2620_v14  ;;  %v2683_v59 = vld [vmem:[#allocation8 + $0x4b8] sm:$0xff]  ;;  %v2685_v14 = vld [vmem:[#allocation8 + $0x4c8] sm:$0xff] }
 0x9c4   :  { %2769 = vmatprep.mubr.bf16.mxu0 %v5212_v13  ;;  %2851 = vmatprep.mubr.bf16.mxu1 %v5212_v13 }
 0x9c6   :  { %2740 = vmatpush1.bf16.msra.mxu0 %v2617_v4  ;;  %2822 = vmatpush1.bf16.msra.mxu1 %v2619_v16  ;;  %v2682_v4 = vld [vmem:[#allocation8 + $0x4b0] sm:$0xff]  ;;  %v2684_v16 = vld [vmem:[#allocation8 + $0x4c0] sm:$0xff] }
 0x9c7   :  { %2741 = vmatprep.subr.bf16.mxu0 %v2623_v60  ;;  %2823 = vmatprep.subr.bf16.mxu1 %v2625_v61  ;;  %v2688_v60 = vld [vmem:[#allocation8 + $0x4e0] sm:$0xff]  ;;  %v2690_v61 = vld [vmem:[#allocation8 + $0x4f0] sm:$0xff] }
 0x9ca   :  { %2742 = vmatpush1.bf16.msra.mxu0 %v2622_v52  ;;  %2824 = vmatpush1.bf16.msra.mxu1 %v2624_v54  ;;  %v2687_v52 = vld [vmem:[#allocation8 + $0x4d8] sm:$0xff]  ;;  %v2689_v54 = vld [vmem:[#allocation8 + $0x4e8] sm:$0xff] }
 0x9cb   :  { %2743 = vmatprep.subr.bf16.mxu0 %v2628_v0  ;;  %2825 = vmatprep.subr.bf16.mxu1 %v2630_v24  ;;  %v2576_v0 = vld [vmem:[#allocation8 + $0x160] sm:$0xff]  ;;  %v5220_v24 = vpack.c.bf16 %v5198_v6, %v5198_v6  ;;  %v2591_v6 = vld [vmem:[#allocation8 + $0x1d8] sm:$0xff] }
 0x9ce   :  { %2744 = vmatpush1.bf16.msra.mxu0 %v2627_v3  ;;  %2826 = vmatpush1.bf16.msra.mxu1 %v2629_v46  ;;  %v2536_v3 = vld [vmem:[#allocation8 + $0x20] sm:$0xff]  ;;  %v2581_v46 = vld [vmem:[#allocation8 + $0x188] sm:$0xff] }
 0x9cf   :  { %2745 = vmatprep.subr.bf16.mxu0 %v2633_v26  ;;  %2827 = vmatprep.subr.bf16.mxu1 %v2635_v27  ;;  %v2541_v26 = vld [vmem:[#allocation8 + $0x48] sm:$0xff]  ;;  %v2586_v27 = vld [vmem:[#allocation8 + $0x1b0] sm:$0xff] }
 0x9d2   :  { %2746 = vmatpush1.bf16.msra.mxu0 %v2632_v55  ;;  %2828 = vmatpush1.bf16.msra.mxu1 %v2634_v28  ;;  %v2546_v55 = vld [vmem:[#allocation8 + $0x70] sm:$0xff]  ;;  %v2551_v28 = vld [vmem:[#allocation8 + $0x98] sm:$0xff] }
 0x9d3   :  { %2747 = vmatprep.subr.bf16.mxu0 %v2638_v2  ;;  %2829 = vmatprep.subr.bf16.mxu1 %v2640_v30  ;;  %v2596_v2 = vld [vmem:[#allocation8 + $0x200] sm:$0xff] }
 0x9d4   :  { %v2556_v30 = vld [vmem:[#allocation8 + $0xc0] sm:$0xff] }
 0x9d6   :  { %2748 = vmatpush1.bf16.msra.mxu0 %v2637_v23  ;;  %2830 = vmatpush1.bf16.msra.mxu1 %v2639_v31  ;;  %v2601_v23 = vld [vmem:[#allocation8 + $0x228] sm:$0xff] }
 0x9d7   :  { %2749 = vmatprep.subr.bf16.mxu0 %v2643_v5  ;;  %2831 = vmatprep.subr.bf16.mxu1 %v2645_v37  ;;  %v2561_v31 = vld [vmem:[#allocation8 + $0xe8] sm:$0xff]  ;;  %v2606_v5 = vld [vmem:[#allocation8 + $0x250] sm:$0xff]  ;;  %v2611_v37 = vld [vmem:[#allocation8 + $0x278] sm:$0xff] }
 0x9da   :  { %2750 = vmatpush1.bf16.msra.mxu0 %v2642_v18  ;;  %2832 = vmatpush1.bf16.msra.mxu1 %v2644_v38  ;;  %v2571_v18 = vld [vmem:[#allocation8 + $0x138] sm:$0xff]  ;;  %v2656_v38 = vld [vmem:[#allocation8 + $0x3e0] sm:$0xff] }
 0x9db   :  { %2751 = vmatprep.subr.bf16.mxu0 %v2648_v40  ;;  %2833 = vmatprep.subr.bf16.mxu1 %v2650_v33  ;;  %v2616_v40 = vld [vmem:[#allocation8 + $0x2a0] sm:$0xff]  ;;  %v2661_v33 = vld [vmem:[#allocation8 + $0x408] sm:$0xff] }
 0x9de   :  { %2752 = vmatpush1.bf16.msra.mxu0 %v2647_v39  ;;  %2834 = vmatpush1.bf16.msra.mxu1 %v2649_v19  ;;  %v2621_v39 = vld [vmem:[#allocation8 + $0x2c8] sm:$0xff]  ;;  %v2666_v19 = vld [vmem:[#allocation8 + $0x430] sm:$0xff] }
 0x9df   :  { %2753 = vmatprep.subr.bf16.mxu0 %v2653_v42  ;;  %2835 = vmatprep.subr.bf16.mxu1 %v2655_v43  ;;  %v2626_v42 = vld [vmem:[#allocation8 + $0x2f0] sm:$0xff]  ;;  %v2671_v43 = vld [vmem:[#allocation8 + $0x458] sm:$0xff] }
 0x9e2   :  { %2754 = vmatpush1.bf16.msra.mxu0 %v2652_v32  ;;  %2836 = vmatpush1.bf16.msra.mxu1 %v2654_v44  ;;  %v2631_v32 = vld [vmem:[#allocation8 + $0x318] sm:$0xff]  ;;  %v2676_v44 = vld [vmem:[#allocation8 + $0x480] sm:$0xff] }
 0x9e3   :  { %2755 = vmatprep.subr.bf16.mxu0 %v2658_v22  ;;  %2837 = vmatprep.subr.bf16.mxu1 %v2660_v34  ;;  %v2636_v22 = vld [vmem:[#allocation8 + $0x340] sm:$0xff]  ;;  %v2681_v34 = vld [vmem:[#allocation8 + $0x4a8] sm:$0xff] }
 0x9e6   :  { %2756 = vmatpush1.bf16.msra.mxu0 %v2657_v29  ;;  %2838 = vmatpush1.bf16.msra.mxu1 %v2659_v45  ;;  %v2686_v29 = vld [vmem:[#allocation8 + $0x4d0] sm:$0xff]  ;;  %v2691_v45 = vld [vmem:[#allocation8 + $0x4f8] sm:$0xff] }
 0x9e7   :  { %2757 = vmatprep.subr.bf16.mxu0 %v2663_v49  ;;  %2839 = vmatprep.subr.bf16.mxu1 %v2665_v51  ;;  %v2651_v49 = vld [vmem:[#allocation8 + $0x3b8] sm:$0xff] }
 0x9ea   :  { %2758 = vmatpush1.bf16.msra.mxu0 %v2662_v53  ;;  %2840 = vmatpush1.bf16.msra.mxu1 %v2664_v56 }
 0x9eb   :  { %2759 = vmatprep.subr.bf16.mxu0 %v2668_v35  ;;  %2841 = vmatprep.subr.bf16.mxu1 %v2670_v57 }
 0x9ee   :  { %2760 = vmatpush1.bf16.msra.mxu0 %v2667_v7  ;;  %2842 = vmatpush1.bf16.msra.mxu1 %v2669_v63 }
 0x9ef   :  { %2761 = vmatprep.subr.bf16.mxu0 %v2673_v1  ;;  %2843 = vmatprep.subr.bf16.mxu1 %v2675_v62 }
 0x9f2   :  { %2762 = vmatpush1.bf16.msra.mxu0 %v2672_v8  ;;  %2844 = vmatpush1.bf16.msra.mxu1 %v2674_v58 }
 0x9f3   :  { %2763 = vmatprep.subr.bf16.mxu0 %v2678_v9  ;;  %2845 = vmatprep.subr.bf16.mxu1 %v2680_v10 }
 0x9f6   :  { %2764 = vmatpush1.bf16.msra.mxu0 %v2677_v12  ;;  %2846 = vmatpush1.bf16.msra.mxu1 %v2679_v20 }
 0x9f7   :  { %2765 = vmatprep.subr.bf16.mxu0 %v2683_v59  ;;  %2847 = vmatprep.subr.bf16.mxu1 %v2685_v14 }
 0x9fa   :  { %2766 = vmatpush1.bf16.msra.mxu0 %v2682_v4  ;;  %2848 = vmatpush1.bf16.msra.mxu1 %v2684_v16 }
 0x9fb   :  { %2767 = vmatprep.subr.bf16.mxu0 %v2688_v60  ;;  %2849 = vmatprep.subr.bf16.mxu1 %v2690_v61 }
 0x9fe   :  { %2768 = vmatpush1.bf16.msra.mxu0 %v2687_v52  ;;  %2850 = vmatpush1.bf16.msra.mxu1 %v2689_v54 }
 0x9ff   :  { %4365 = vmatprep.subr.bf16.mxu0 %v2576_v0 }
 0xa01   :  { %2770 = vmatmul.mubr.bf16.vlgmr.msra.gmra.mrb[36].mxu0 %v5220_v24  ;;  %2852 = vmatmul.mubr.bf16.vlgmr.msra.gmra.mrb[20].mxu1 %v5220_v24 }
 0xa02   :  { %4366 = vmatpush3.bf16.msra.mxu0 %v2536_v3  ;;  %2892 = vmatprep.mubr.bf16.mxu0 %v5202_v48  ;;  %v2566_v48 = vld [vmem:[#allocation8 + $0x110] sm:$0xff] }
 0xa03   :  { %4367 = vmatprep.subr.bf16.mxu0 %v2581_v46 }
 0xa06   :  { %4368 = vmatpush3.bf16.msra.mxu0 %v2541_v26 }
 0xa07   :  { %4369 = vmatprep.subr.bf16.mxu0 %v2586_v27 }
 0xa0a   :  { %4370 = vmatpush3.bf16.msra.mxu0 %v2546_v55 }
 0xa0b   :  { %4371 = vmatprep.subr.bf16.mxu0 %v2591_v6 }
 0xa0e   :  { %4372 = vmatpush3.bf16.msra.mxu0 %v2551_v28 }
 0xa0f   :  { %4373 = vmatprep.subr.bf16.mxu0 %v2596_v2 }
 0xa12   :  { %4374 = vmatpush3.bf16.msra.mxu0 %v2556_v30 }
 0xa13   :  { %4375 = vmatprep.subr.bf16.mxu0 %v2601_v23 }
 0xa16   :  { %4376 = vmatpush3.bf16.msra.mxu0 %v2561_v31 }
 0xa17   :  { %4377 = vmatprep.subr.bf16.mxu0 %v2606_v5 }
 0xa1a   :  { %4378 = vmatpush3.bf16.msra.mxu0 %v2566_v48 }
 0xa1b   :  { %4379 = vmatprep.subr.bf16.mxu0 %v2611_v37 }
 0xa1e   :  { %4380 = vmatpush3.bf16.msra.mxu0 %v2571_v18 }
 0xa1f   :  { %4387 = vmatprep.subr.bf16.mxu0 %v2656_v38 }
 0xa21   :  { %2893 = vmatmul.mubr.bf16.vlgmr.msra.gmra.mrb[40].mxu0 %v5208_v11  ;;  %v2641_v11 = vld [vmem:[#allocation8 + $0x368] sm:$0xff] }
 0xa22   :  { %4388 = vmatpush3.bf16.msra.mxu0 %v2616_v40  ;;  %2932 = vmatprep.mubr.bf16.mxu0 %v5212_v13  ;;  %v2646_v13 = vld [vmem:[#allocation8 + $0x390] sm:$0xff] }
 0xa23   :  { %4389 = vmatprep.subr.bf16.mxu0 %v2661_v33 }
 0xa26   :  { %4390 = vmatpush3.bf16.msra.mxu0 %v2621_v39 }
 0xa27   :  { %4391 = vmatprep.subr.bf16.mxu0 %v2666_v19 }
 0xa2a   :  { %4392 = vmatpush3.bf16.msra.mxu0 %v2626_v42 }
 0xa2b   :  { %4393 = vmatprep.subr.bf16.mxu0 %v2671_v43 }
 0xa2e   :  { %4394 = vmatpush3.bf16.msra.mxu0 %v2631_v32 }
 0xa2f   :  { %4395 = vmatprep.subr.bf16.mxu0 %v2676_v44 }
 0xa32   :  { %4396 = vmatpush3.bf16.msra.mxu0 %v2636_v22 }
 0xa33   :  { %4397 = vmatprep.subr.bf16.mxu0 %v2681_v34 }
 0xa36   :  { %4398 = vmatpush3.bf16.msra.mxu0 %v2641_v11 }
 0xa37   :  { %4399 = vmatprep.subr.bf16.mxu0 %v2686_v29 }
 0xa3a   :  { %4400 = vmatpush3.bf16.msra.mxu0 %v2646_v13 }
 0xa3b   :  { %4401 = vmatprep.subr.bf16.mxu0 %v2691_v45 }
 0xa3e   :  { %4402 = vmatpush3.bf16.msra.mxu0 %v2651_v49 }
 0xa41   :  { %2933 = vmatmul.mubr.bf16.vlgmr.msra.gmra.mrb[44].mxu0 %v5220_v24 }
 0xad4   :  { %v2771_v51 = vpop.f32.mrb[36].mxu0  ;;  %v2853_v53 = vpop.f32.mrb[20].mxu1 }
 0xad5   :  { %v2940_v56 = vrot.slane %v2771_v51, 4  ;;  %v2952_v35 = vrot.slane %v2853_v53, 4  ;;  %v2773_v57 = vpop.f32.mrb[37].mxu0  ;;  %v2855_v7 = vpop.f32.mrb[21].mxu1 }
 0xad6   :  { %v2946_v63 = vrot.slane %v2773_v57, 4  ;;  %v2958_v1 = vrot.slane %v2855_v7, 4  ;;  %v2775_v62 = vpop.f32.mrb[38].mxu0  ;;  %v2857_v8 = vpop.f32.mrb[22].mxu1 }
 0xad7   :  { %v2941_v58 = vadd.f32 %v2940_v56, %v2771_v51  ;;  %v2953_v9 = vadd.f32 %v2952_v35, %v2853_v53  ;;  %v2776_v10 = vpop.f32.mrb[39].mxu0  ;;  %v2858_v12 = vpop.f32.mrb[23].mxu1 }
 0xad8   :  { %v2947_v20 = vadd.f32 %v2946_v63, %v2773_v57  ;;  %v2959_v59 = vadd.f32 %v2958_v1, %v2855_v7 }
 0xad9   :  { %v2942_v14 = vrot.slane %v2941_v58, 2  ;;  %v2954_v4 = vrot.slane %v2953_v9, 2 }
 0xada   :  { %v2948_v16 = vrot.slane %v2947_v20, 2  ;;  %v2960_v60 = vrot.slane %v2959_v59, 2 }
 0xadb   :  { %v2943_v61 = vadd.f32 %v2942_v14, %v2941_v58  ;;  %v2955_v52 = vadd.f32 %v2954_v4, %v2953_v9 }
 0xadc   :  { %v2949_v54 = vadd.f32 %v2948_v16, %v2947_v20  ;;  %v2961_v0 = vadd.f32 %v2960_v60, %v2959_v59 }
 0xadd   :  { %v2944_v24 = vrot.slane %v2943_v61, 1  ;;  %v2956_v3 = vrot.slane %v2955_v52, 1 }
 0xade   :  { %v2950_v46 = vrot.slane %v2949_v54, 1  ;;  %v2962_v26 = vrot.slane %v2961_v0, 1 }
 0xadf   :  { %v2945_v27 = vadd.f32 %v2944_v24, %v2943_v61  ;;  %v2957_v55 = vadd.f32 %v2956_v3, %v2955_v52  ;;  %v3021_v3 = vld [vmem:[#allocation11 + $0x3c] ss:$8 sm:$0xf] }
 0xae0   :  { %v2951_v6 = vadd.f32 %v2950_v46, %v2949_v54  ;;  %v2963_v28 = vadd.f32 %v2962_v26, %v2961_v0  ;;  %v3022_v46 = vld [vmem:[#allocation11 + $0x3c] ss:$8 sm:$0x10]  ;;  %v3025_v26 = vld [vmem:[#allocation11 + $0x3d] ss:$8 sm:$0xf] }
 0xae1   :  { %v2970_v2 = vmul.f32 0.125, %v2945_v27  ;;  %v2972_v30 = vmul.f32 0.125, %v2957_v55  ;;  %v3026_v27 = vld [vmem:[#allocation11 + $0x3d] ss:$8 sm:$0x10]  ;;  %v5236_v55 = vor.u32 %v3022_v46, %v3021_v3 }
 0xae2   :  { %v2971_v23 = vmul.f32 0.125, %v2951_v6  ;;  %v2973_v31 = vmul.f32 0.125, %v2963_v28  ;;  %v5238_v6 = vor.u32 %v3026_v27, %v3025_v26 }
 0xae3   :  { %v2975_v5 = vsub.f32 %v2771_v51, %v2970_v2  ;;  %v2977_v48 = vsub.f32 %v2853_v53, %v2972_v30  ;;  %v3047_v28 = vrot.slane %v5236_v55, %v5097_v47  ;;  %v3055_v30 = vrot.slane %v5236_v55, %v5115_v15 }
 0xae4   :  { %v5228_v37 = vsub.f32 %v2773_v57, %v2971_v23  ;;  %v5230_v18 = vsub.f32 %v2855_v7, %v2973_v31 }
 0xae5   :  { %v2980_v38 = vmul.f32 %v2975_v5, %v2975_v5  ;;  %v2982_v40 = vmul.f32 %v2977_v48, %v2977_v48 }
 0xae6   :  { %v2981_v33 = vmul.f32 %v5228_v37, %v5228_v37  ;;  %v2983_v39 = vmul.f32 %v5230_v18, %v5230_v18 }
 0xae7   :  { %v2985_v19 = vrot.slane %v2980_v38, 4  ;;  %v2997_v42 = vrot.slane %v2982_v40, 4 }
 0xae8   :  { %v2991_v43 = vrot.slane %v2981_v33, 4  ;;  %v3003_v32 = vrot.slane %v2983_v39, 4 }
 0xae9   :  { %v2986_v44 = vadd.f32 %v2985_v19, %v2980_v38  ;;  %v2998_v22 = vadd.f32 %v2997_v42, %v2982_v40  ;;  %v3078_v38 = vrot.slane %v5238_v6, %v5097_v47  ;;  %v3051_v40 = vrot.slane %v5236_v55, %v5100_v50 }
 0xaea   :  { %v2992_v34 = vadd.f32 %v2991_v43, %v2981_v33  ;;  %v3004_v11 = vadd.f32 %v3003_v32, %v2983_v39  ;;  %v3086_v19 = vrot.slane %v5238_v6, %v5115_v15  ;;  %v3059_v42 = vrot.slane %v5236_v55, %v5118_v17 }
 0xaeb   :  { %v2987_v29 = vrot.slane %v2986_v44, 2  ;;  %v2999_v13 = vrot.slane %v2998_v22, 2 }
 0xaec   :  { %v2993_v45 = vrot.slane %v2992_v34, 2  ;;  %v3005_v49 = vrot.slane %v3004_v11, 2 }
 0xaed   :  { %v2988_v51 = vadd.f32 %v2987_v29, %v2986_v44  ;;  %v3000_v53 = vadd.f32 %v2999_v13, %v2998_v22 }
 0xaee   :  { %v2994_v56 = vadd.f32 %v2993_v45, %v2992_v34  ;;  %v3006_v35 = vadd.f32 %v3005_v49, %v3004_v11  ;;  %v3090_v11 = vrot.slane %v5238_v6, %v5118_v17 }
 0xaef   :  { %v2989_v57 = vrot.slane %v2988_v51, 1  ;;  %v3001_v7 = vrot.slane %v3000_v53, 1 }
 0xaf0   :  { %v2995_v63 = vrot.slane %v2994_v56, 1  ;;  %v3007_v1 = vrot.slane %v3006_v35, 1 }
 0xaf1   :  { %v2990_v62 = vadd.f32 %v2989_v57, %v2988_v51  ;;  %v3002_v8 = vadd.f32 %v3001_v7, %v3000_v53 }
 0xaf2   :  { %v2996_v58 = vadd.f32 %v2995_v63, %v2994_v56  ;;  %v3008_v9 = vadd.f32 %v3007_v1, %v3006_v35 }
 0xaf3   :  { %v3015_v10 = vmul.f32 0.125, %v2990_v62  ;;  %v3017_v12 = vmul.f32 0.125, %v3002_v8 }
 0xaf4   :  { %v3016_v20 = vmul.f32 0.125, %v2996_v58  ;;  %v3018_v59 = vmul.f32 0.125, %v3008_v9  ;;  %v4381_v14 = vpop.f32.mrb[40].mxu0 }
 0xaf5   :  { %v3028_v4 = vadd.f32 1e-05, %v3015_v10  ;;  %v3030_v16 = vadd.f32 1e-05, %v3017_v12  ;;  %v4382_v60 = vpop.f32.mrb[41].mxu0 }
 0xaf6   :  { %v3029_v61 = vadd.f32 1e-05, %v3016_v20  ;;  %v3031_v52 = vadd.f32 1e-05, %v3018_v59  ;;  %v4383_v54 = vadd.f32 %v4382_v60, %v4381_v14  ;;  %v4384_v0 = vpop.f32.mrb[42].mxu0 }
 0xaf7   :  { %4638 = vrsqrt.f32 %v3028_v4  ;;  %v4385_v24 = vpop.f32.mrb[43].mxu0 }
 0xaf8   :  { %4640 = vrsqrt.f32 %v3030_v16 }
 0xaf9   :  { %4642 = vrsqrt.f32 %v3029_v61 }
 0xafa   :  { %4644 = vrsqrt.f32 %v3031_v52 }
 0xb01   :  { %v4639_v2 = vpop.eup %4638 }
 0xb02   :  { %v4641_v23 = vpop.eup %4640  ;;  %v3038_v31 = vmul.f32 %v4639_v2, %v2975_v5  ;;  %v3082_v5 = vrot.slane %v5238_v6, %v5100_v50 }
 0xb03   :  { %v4643_v33 = vpop.eup %4642  ;;  %v3040_v39 = vmul.f32 %v4641_v23, %v2977_v48 }
 0xb04   :  { %v4645_v43 = vpop.eup %4644  ;;  %v3069_v32 = vmul.f32 %v3047_v28, %v3038_v31  ;;  %v3039_v44 = vmul.f32 %v4643_v33, %v5228_v37  ;;  %v3094_v31 = vrot.slane %v5238_v6, %v5137_v25 }
 0xb05   :  { %v3071_v22 = vmul.f32 %v3055_v30, %v3040_v39  ;;  %v3041_v34 = vmul.f32 %v4645_v43, %v5230_v18 }
 0xb06   :  { %v3100_v48 = vadd.f32 %v3078_v38, %v3069_v32  ;;  %v3070_v29 = vmul.f32 %v3051_v40, %v3039_v44 }
 0xb07   :  { %v3102_v13 = vadd.f32 %v3086_v19, %v3071_v22  ;;  %v3072_v45 = vmul.f32 %v3059_v42, %v3041_v34 }
 0xb08   :  { %vm3105_vm5 = vcmp.ge.f32.partialorder %v3100_v48, 0.0  ;;  %v3110_v49 = vmul.f32 0.4, %v3100_v48  ;;  %v3101_v51 = vadd.f32 %v3082_v5, %v3070_v29 }
 0xb09   :  { %vm3107_vm6 = vcmp.ge.f32.partialorder %v3102_v13, 0.0  ;;  %v3112_v53 = vmul.f32 0.4, %v3102_v13  ;;  %v3103_v56 = vadd.f32 %v3090_v11, %v3072_v45 }
 0xb0a   :  { %v5258_v37 = vsel %vm3105_vm5, %v3100_v48, %v3110_v49  ;;  %vm3106_vm7 = vcmp.ge.f32.partialorder %v3101_v51, 0.0  ;;  %v3111_v35 = vmul.f32 0.4, %v3101_v51 }
 0xb0b   :  { %v5260_v57 = vsel %vm3107_vm6, %v3102_v13, %v3112_v53  ;;  %vm3108_vm8 = vcmp.ge.f32.partialorder %v3103_v56, 0.0  ;;  %v3113_v18 = vmul.f32 0.4, %v3103_v56 }
 0xb0c   :  { %v3116_v7 = vsel %vm3106_vm7, %v3101_v51, %v3111_v35 }
 0xb0d   :  { %v5262_v63 = vsel %vm3108_vm8, %v3103_v56, %v3113_v18 }
 0xb14   :  { %v4403_v1 = vpop.f32.mrb[44].mxu0 }
 0xb15   :  { %v4404_v62 = vpop.f32.mrb[45].mxu0 }
 0xb16   :  { %v4405_v8 = vadd.f32 %v4404_v62, %v4403_v1  ;;  %v4406_v58 = vpop.f32.mrb[46].mxu0 }
 0xb17   :  { %v4407_v9 = vpop.f32.mrb[47].mxu0 }
 0xb18   :  { %v2935_v10 = vadd.f32 %v4405_v8, %v4383_v54  ;;  %v3063_v54 = vrot.slane %v5236_v55, %v5137_v25 }
 0xb1a   :  { %v2964_v12 = vrot.slane %v2935_v10, 4 }
 0xb1c   :  { %v2965_v20 = vadd.f32 %v2964_v12, %v2935_v10 }
 0xb1e   :  { %v2966_v59 = vrot.slane %v2965_v20, 2 }
 0xb20   :  { %v2967_v14 = vadd.f32 %v2966_v59, %v2965_v20 }
 0xb22   :  { %v2968_v4 = vrot.slane %v2967_v14, 1 }
 0xb24   :  { %v2969_v16 = vadd.f32 %v2968_v4, %v2967_v14 }
 0xb26   :  { %v2974_v60 = vmul.f32 0.125, %v2969_v16 }
 0xb28   :  { %v2979_v61 = vsub.f32 %v2935_v10, %v2974_v60 }
 0xb2a   :  { %v2984_v52 = vmul.f32 %v2979_v61, %v2979_v61 }
 0xb2c   :  { %v3009_v0 = vrot.slane %v2984_v52, 4 }
 0xb2e   :  { %v3010_v24 = vadd.f32 %v3009_v0, %v2984_v52 }
 0xb30   :  { %v3011_v3 = vrot.slane %v3010_v24, 2 }
 0xb32   :  { %v3012_v46 = vadd.f32 %v3011_v3, %v3010_v24 }
 0xb34   :  { %v3013_v26 = vrot.slane %v3012_v46, 1 }
 0xb36   :  { %v3014_v27 = vadd.f32 %v3013_v26, %v3012_v46 }
 0xb38   :  { %v3019_v28 = vmul.f32 0.125, %v3014_v27 }
 0xb3a   :  { %v3032_v2 = vadd.f32 1e-05, %v3019_v28 }
 0xb3c   :  { %4646 = vrsqrt.f32 %v3032_v2 }
 0xb46   :  { %v4647_v30 = vpop.eup %4646 }
 0xb47   :  { %v3042_v23 = vmul.f32 %v4647_v30, %v2979_v61 }
 0xb49   :  { %v3073_v38 = vmul.f32 %v3063_v54, %v3042_v23 }
 0xb4b   :  { %v3104_v40 = vadd.f32 %v3094_v31, %v3073_v38 }
 0xb4d   :  { %vm3109_vm9 = vcmp.ge.f32.partialorder %v3104_v40, 0.0  ;;  %v3114_v33 = vmul.f32 0.4, %v3104_v40 }
 0xb4f   :  { %v5268_v39 = vsel %vm3109_vm9, %v3104_v40, %v3114_v33 }
 0xb50   :  { %4772 = dma.done.wait [#allocation10 + $0x7], 35840 }
 0xb51   :  { %4773 = vsyncadd [#allocation10 + $0x7], 4294931456  ;;  %v5270_v19 = vpack.c.bf16 %v3116_v7, %v3116_v7  ;;  %v3124_v55 = vld [vmem:[#allocation9 + $0x8] sm:$0xff]  ;;  %v3126_v42 = vld [vmem:[#allocation9 + $0x18] sm:$0xff]  ;;  %s4815_s0 = smov [#allocation14]  }
 0xb52   :  { %v3123_v43 = vld [vmem:[#allocation9] sm:$0xff]  ;;  %3408 = vmatprep.subr.bf16.mxu1 %v3124_v55  ;;  %3531 = vmatprep.subr.bf16.mxu0 %v3126_v42  ;;  %v3125_v6 = vld [vmem:[#allocation9 + $0x10] sm:$0xff]  ;;  %v3130_v5 = vld [vmem:[#allocation9 + $0x38] sm:$0xff]  ;;  %s4179_s25 = sshll.u32 %s4815_s0, 4  ;;  %s4180_s25 = int_to_ptr.vmem [resolvable:$true] %s4179_s25 }
 0xb53   :  { %3440 = vmatprep.mubr.bf16.mxu1 %v5270_v19  ;;  %3563 = vmatprep.mubr.bf16.mxu0 %v5270_v19  ;;  %v3131_v32 = vld [vmem:[#allocation9 + $0x40] sm:$0xff]  ;;  %v3133_v44 = vld [vmem:[#allocation9 + $0x50] sm:$0xff]  ;;  %v3132_v22 = vld [vmem:[#allocation9 + $0x48] sm:$0xff]  ;;  %s4734_s27 = scalar_lea.vmem %s4180_s25, 896  ;;  %p4739_p3 = scmp.lt.s32.totalorder %s4180_s25, %s4180_s25 }
 0xb54   :  { %3409 = vmatpush1.bf16.msra.mxu1 %v3123_v43  ;;  %3532 = vmatpush1.bf16.msra.mxu0 %v3125_v6  ;;  %v3138_v34 = vld [vmem:[#allocation9 + $0x78] sm:$0xff]  ;;  %v3140_v11 = vld [vmem:[#allocation9 + $0x88] sm:$0xff]  ;;  %v3137_v48 = vld [vmem:[#allocation9 + $0x70] sm:$0xff]  ;;  %p4735_p2 = scmp.ne.s32.totalorder %s4180_s25, %s4734_s27  ;;  %p4740_p4 = scmp.lt.s32.totalorder %s4734_s27, %s4734_s27 }
 0xb55   :  { %3410 = vmatprep.subr.bf16.mxu1 %v3131_v32  ;;  %3533 = vmatprep.subr.bf16.mxu0 %v3133_v44  ;;  %v3139_v29 = vld [vmem:[#allocation9 + $0x80] sm:$0xff]  ;;  %v3145_v13 = vld [vmem:[#allocation9 + $0xb0] sm:$0xff]  ;;  %v3144_v49 = vld [vmem:[#allocation9 + $0xa8] sm:$0xff] }
 0xb56   :  { %v3147_v45 = vld [vmem:[#allocation9 + $0xc0] sm:$0xff]  ;;  %v3146_v51 = vld [vmem:[#allocation9 + $0xb8] sm:$0xff]  ;;  %v3152_v53 = vld [vmem:[#allocation9 + $0xe8] sm:$0xff]  ;;  %p4741_p5 = por %p4740_p4, %p4739_p3 }
 0xb57   :  { %v3154_v56 = vld [vmem:[#allocation9 + $0xf8] sm:$0xff]  ;;  %v3151_v35 = vld [vmem:[#allocation9 + $0xe0] sm:$0xff]  ;;  %v3153_v18 = vld [vmem:[#allocation9 + $0xf0] sm:$0xff] }
 0xb58   :  { %3411 = vmatpush1.bf16.msra.mxu1 %v3130_v5  ;;  %3534 = vmatpush1.bf16.msra.mxu0 %v3132_v22  ;;  %v3159_v7 = vld [vmem:[#allocation9 + $0x120] sm:$0xff]  ;;  %v3161_v1 = vld [vmem:[#allocation9 + $0x130] sm:$0xff]  ;;  %v3158_v62 = vld [vmem:[#allocation9 + $0x118] sm:$0xff]  ;;  %p4742_p6 = pnand %p4741_p5, %p4735_p2 }
 0xb59   :  { %3412 = vmatprep.subr.bf16.mxu1 %v3138_v34  ;;  %3535 = vmatprep.subr.bf16.mxu0 %v3140_v11  ;;  %v3160_v8 = vld [vmem:[#allocation9 + $0x128] sm:$0xff]  ;;  %v3166_v58 = vld [vmem:[#allocation9 + $0x158] sm:$0xff]  ;;  %v3165_v10 = vld [vmem:[#allocation9 + $0x150] sm:$0xff] }
 0xb5a   :  { %v3168_v9 = vld [vmem:[#allocation9 + $0x168] sm:$0xff]  ;;  %v3167_v12 = vld [vmem:[#allocation9 + $0x160] sm:$0xff]  ;;  %v3173_v20 = vld [vmem:[#allocation9 + $0x190] sm:$0xff] }
 0xb5b   :  { %v3175_v59 = vld [vmem:[#allocation9 + $0x1a0] sm:$0xff]  ;;  %v3172_v14 = vld [vmem:[#allocation9 + $0x188] sm:$0xff]  ;;  %v3174_v4 = vld [vmem:[#allocation9 + $0x198] sm:$0xff] }
 0xb5c   :  { %3413 = vmatpush1.bf16.msra.mxu1 %v3137_v48  ;;  %3536 = vmatpush1.bf16.msra.mxu0 %v3139_v29  ;;  %v3180_v16 = vld [vmem:[#allocation9 + $0x1c8] sm:$0xff]  ;;  %v3182_v60 = vld [vmem:[#allocation9 + $0x1d8] sm:$0xff]  ;;  %v3179_v61 = vld [vmem:[#allocation9 + $0x1c0] sm:$0xff] }
 0xb5d   :  { %3414 = vmatprep.subr.bf16.mxu1 %v3145_v13  ;;  %3537 = vmatprep.subr.bf16.mxu0 %v3147_v45  ;;  %v3181_v52 = vld [vmem:[#allocation9 + $0x1d0] sm:$0xff]  ;;  %v3187_v0 = vld [vmem:[#allocation9 + $0x200] sm:$0xff]  ;;  %v3186_v3 = vld [vmem:[#allocation9 + $0x1f8] sm:$0xff] }
 0xb5e   :  { %v3189_v24 = vld [vmem:[#allocation9 + $0x210] sm:$0xff]  ;;  %v3188_v46 = vld [vmem:[#allocation9 + $0x208] sm:$0xff]  ;;  %v3194_v26 = vld [vmem:[#allocation9 + $0x238] sm:$0xff] }
 0xb5f   :  { %v3196_v27 = vld [vmem:[#allocation9 + $0x248] sm:$0xff]  ;;  %v3193_v28 = vld [vmem:[#allocation9 + $0x230] sm:$0xff]  ;;  %v3195_v2 = vld [vmem:[#allocation9 + $0x240] sm:$0xff] }
 0xb60   :  { %3415 = vmatpush1.bf16.msra.mxu1 %v3144_v49  ;;  %3538 = vmatpush1.bf16.msra.mxu0 %v3146_v51  ;;  %v3201_v54 = vld [vmem:[#allocation9 + $0x270] sm:$0xff]  ;;  %v3203_v30 = vld [vmem:[#allocation9 + $0x280] sm:$0xff]  ;;  %v3200_v23 = vld [vmem:[#allocation9 + $0x268] sm:$0xff]  ;;  %v5276_v51 = vpack.c.bf16 %v5258_v37, %v5258_v37 }
 0xb61   :  { %3416 = vmatprep.subr.bf16.mxu1 %v3152_v53  ;;  %3539 = vmatprep.subr.bf16.mxu0 %v3154_v56  ;;  %v3202_v31 = vld [vmem:[#allocation9 + $0x278] sm:$0xff]  ;;  %v3208_v38 = vld [vmem:[#allocation9 + $0x2a8] sm:$0xff]  ;;  %v3207_v33 = vld [vmem:[#allocation9 + $0x2a0] sm:$0xff] }
 0xb62   :  { %v3210_v40 = vld [vmem:[#allocation9 + $0x2b8] sm:$0xff]  ;;  %v3209_v55 = vld [vmem:[#allocation9 + $0x2b0] sm:$0xff]  ;;  %v3215_v42 = vld [vmem:[#allocation9 + $0x2e0] sm:$0xff] }
 0xb63   :  { %v3217_v43 = vld [vmem:[#allocation9 + $0x2f0] sm:$0xff]  ;;  %v3214_v6 = vld [vmem:[#allocation9 + $0x2d8] sm:$0xff]  ;;  %v3216_v32 = vld [vmem:[#allocation9 + $0x2e8] sm:$0xff] }
 0xb64   :  { %3417 = vmatpush1.bf16.msra.mxu1 %v3151_v35  ;;  %3540 = vmatpush1.bf16.msra.mxu0 %v3153_v18  ;;  %v3222_v44 = vld [vmem:[#allocation9 + $0x318] sm:$0xff]  ;;  %v3224_v5 = vld [vmem:[#allocation9 + $0x328] sm:$0xff]  ;;  %v3221_v22 = vld [vmem:[#allocation9 + $0x310] sm:$0xff] }
 0xb65   :  { %3418 = vmatprep.subr.bf16.mxu1 %v3159_v7  ;;  %3541 = vmatprep.subr.bf16.mxu0 %v3161_v1  ;;  %v3223_v34 = vld [vmem:[#allocation9 + $0x320] sm:$0xff]  ;;  %v3229_v11 = vld [vmem:[#allocation9 + $0x350] sm:$0xff]  ;;  %v3228_v29 = vld [vmem:[#allocation9 + $0x348] sm:$0xff]  ;;  %v5280_v7 = vpack.c.bf16 %v5262_v63, %v5262_v63 }
 0xb66   :  { %v3231_v48 = vld [vmem:[#allocation9 + $0x360] sm:$0xff]  ;;  %v3230_v13 = vld [vmem:[#allocation9 + $0x358] sm:$0xff]  ;;  %v3236_v45 = vld [vmem:[#allocation9 + $0x388] sm:$0xff] }
 0xb67   :  { %v3238_v49 = vld [vmem:[#allocation9 + $0x398] sm:$0xff]  ;;  %v3235_v53 = vld [vmem:[#allocation9 + $0x380] sm:$0xff]  ;;  %v3237_v56 = vld [vmem:[#allocation9 + $0x390] sm:$0xff] }
 0xb68   :  { %3419 = vmatpush1.bf16.msra.mxu1 %v3158_v62  ;;  %3542 = vmatpush1.bf16.msra.mxu0 %v3160_v8  ;;  %v3243_v35 = vld [vmem:[#allocation9 + $0x3c0] sm:$0xff]  ;;  %v3245_v18 = vld [vmem:[#allocation9 + $0x3d0] sm:$0xff]  ;;  %v3242_v37 = vld [vmem:[#allocation9 + $0x3b8] sm:$0xff] }
 0xb69   :  { %3420 = vmatprep.subr.bf16.mxu1 %v3166_v58  ;;  %3543 = vmatprep.subr.bf16.mxu0 %v3168_v9  ;;  %v3244_v1 = vld [vmem:[#allocation9 + $0x3c8] sm:$0xff]  ;;  %v3250_v62 = vld [vmem:[#allocation9 + $0x3f8] sm:$0xff]  ;;  %v3249_v63 = vld [vmem:[#allocation9 + $0x3f0] sm:$0xff] }
 0xb6a   :  { %v3252_v8 = vld [vmem:[#allocation9 + $0x408] sm:$0xff]  ;;  %v3251_v58 = vld [vmem:[#allocation9 + $0x400] sm:$0xff]  ;;  %v3257_v9 = vld [vmem:[#allocation9 + $0x430] sm:$0xff] }
 0xb6c   :  { %3421 = vmatpush1.bf16.msra.mxu1 %v3165_v10  ;;  %3544 = vmatpush1.bf16.msra.mxu0 %v3167_v12  ;;  %v3259_v10 = vld [vmem:[#allocation9 + $0x440] sm:$0xff]  ;;  %v3256_v12 = vld [vmem:[#allocation9 + $0x428] sm:$0xff] }
 0xb6d   :  { %3422 = vmatprep.subr.bf16.mxu1 %v3173_v20  ;;  %3545 = vmatprep.subr.bf16.mxu0 %v3175_v59  ;;  %v3258_v20 = vld [vmem:[#allocation9 + $0x438] sm:$0xff]  ;;  %v3264_v59 = vld [vmem:[#allocation9 + $0x468] sm:$0xff] }
 0xb70   :  { %3423 = vmatpush1.bf16.msra.mxu1 %v3172_v14  ;;  %3546 = vmatpush1.bf16.msra.mxu0 %v3174_v4  ;;  %v3266_v14 = vld [vmem:[#allocation9 + $0x478] sm:$0xff]  ;;  %v3263_v4 = vld [vmem:[#allocation9 + $0x460] sm:$0xff] }
 0xb71   :  { %3424 = vmatprep.subr.bf16.mxu1 %v3180_v16  ;;  %3547 = vmatprep.subr.bf16.mxu0 %v3182_v60  ;;  %v3265_v16 = vld [vmem:[#allocation9 + $0x470] sm:$0xff]  ;;  %v3271_v60 = vld [vmem:[#allocation9 + $0x4a0] sm:$0xff] }
 0xb74   :  { %3425 = vmatpush1.bf16.msra.mxu1 %v3179_v61  ;;  %3548 = vmatpush1.bf16.msra.mxu0 %v3181_v52  ;;  %v3273_v61 = vld [vmem:[#allocation9 + $0x4b0] sm:$0xff]  ;;  %v3270_v52 = vld [vmem:[#allocation9 + $0x498] sm:$0xff] }
 0xb75   :  { %3426 = vmatprep.subr.bf16.mxu1 %v3187_v0  ;;  %3549 = vmatprep.subr.bf16.mxu0 %v3189_v24  ;;  %v3272_v0 = vld [vmem:[#allocation9 + $0x4a8] sm:$0xff]  ;;  %v3278_v24 = vld [vmem:[#allocation9 + $0x4d8] sm:$0xff] }
 0xb78   :  { %3427 = vmatpush1.bf16.msra.mxu1 %v3186_v3  ;;  %3550 = vmatpush1.bf16.msra.mxu0 %v3188_v46  ;;  %v3280_v3 = vld [vmem:[#allocation9 + $0x4e8] sm:$0xff]  ;;  %v3277_v46 = vld [vmem:[#allocation9 + $0x4d0] sm:$0xff] }
 0xb79   :  { %3428 = vmatprep.subr.bf16.mxu1 %v3194_v26  ;;  %3551 = vmatprep.subr.bf16.mxu0 %v3196_v27  ;;  %v3279_v26 = vld [vmem:[#allocation9 + $0x4e0] sm:$0xff]  ;;  %v3285_v27 = vld [vmem:[#allocation9 + $0x510] sm:$0xff] }
 0xb7c   :  { %3429 = vmatpush1.bf16.msra.mxu1 %v3193_v28  ;;  %3552 = vmatpush1.bf16.msra.mxu0 %v3195_v2  ;;  %v3287_v28 = vld [vmem:[#allocation9 + $0x520] sm:$0xff]  ;;  %v3284_v2 = vld [vmem:[#allocation9 + $0x508] sm:$0xff] }
 0xb7d   :  { %3430 = vmatprep.subr.bf16.mxu1 %v3201_v54  ;;  %3553 = vmatprep.subr.bf16.mxu0 %v3203_v30  ;;  %v3286_v54 = vld [vmem:[#allocation9 + $0x518] sm:$0xff]  ;;  %v3292_v30 = vld [vmem:[#allocation9 + $0x548] sm:$0xff] }
 0xb80   :  { %3431 = vmatpush1.bf16.msra.mxu1 %v3200_v23  ;;  %3554 = vmatpush1.bf16.msra.mxu0 %v3202_v31  ;;  %v3294_v23 = vld [vmem:[#allocation9 + $0x558] sm:$0xff]  ;;  %v3291_v31 = vld [vmem:[#allocation9 + $0x540] sm:$0xff] }
 0xb81   :  { %3432 = vmatprep.subr.bf16.mxu1 %v3208_v38  ;;  %3555 = vmatprep.subr.bf16.mxu0 %v3210_v40  ;;  %v3293_v38 = vld [vmem:[#allocation9 + $0x550] sm:$0xff]  ;;  %v3299_v40 = vld [vmem:[#allocation9 + $0x580] sm:$0xff] }
 0xb84   :  { %3433 = vmatpush1.bf16.msra.mxu1 %v3207_v33  ;;  %3556 = vmatpush1.bf16.msra.mxu0 %v3209_v55  ;;  %v3301_v33 = vld [vmem:[#allocation9 + $0x590] sm:$0xff]  ;;  %v3298_v55 = vld [vmem:[#allocation9 + $0x578] sm:$0xff] }
 0xb85   :  { %3434 = vmatprep.subr.bf16.mxu1 %v3215_v42  ;;  %3557 = vmatprep.subr.bf16.mxu0 %v3217_v43  ;;  %v3300_v42 = vld [vmem:[#allocation9 + $0x588] sm:$0xff]  ;;  %v3306_v43 = vld [vmem:[#allocation9 + $0x5b8] sm:$0xff] }
 0xb88   :  { %3435 = vmatpush1.bf16.msra.mxu1 %v3214_v6  ;;  %3558 = vmatpush1.bf16.msra.mxu0 %v3216_v32  ;;  %v3308_v6 = vld [vmem:[#allocation9 + $0x5c8] sm:$0xff]  ;;  %v3305_v32 = vld [vmem:[#allocation9 + $0x5b0] sm:$0xff] }
 0xb89   :  { %3436 = vmatprep.subr.bf16.mxu1 %v3222_v44  ;;  %3559 = vmatprep.subr.bf16.mxu0 %v3224_v5  ;;  %v3307_v44 = vld [vmem:[#allocation9 + $0x5c0] sm:$0xff]  ;;  %v3313_v5 = vld [vmem:[#allocation9 + $0x5f0] sm:$0xff] }
 0xb8c   :  { %3437 = vmatpush1.bf16.msra.mxu1 %v3221_v22  ;;  %3560 = vmatpush1.bf16.msra.mxu0 %v3223_v34  ;;  %v3315_v22 = vld [vmem:[#allocation9 + $0x600] sm:$0xff]  ;;  %v3312_v34 = vld [vmem:[#allocation9 + $0x5e8] sm:$0xff] }
 0xb8d   :  { %3438 = vmatprep.subr.bf16.mxu1 %v3229_v11  ;;  %3561 = vmatprep.subr.bf16.mxu0 %v3231_v48  ;;  %v3314_v11 = vld [vmem:[#allocation9 + $0x5f8] sm:$0xff]  ;;  %v3320_v48 = vld [vmem:[#allocation9 + $0x628] sm:$0xff] }
 0xb90   :  { %3439 = vmatpush1.bf16.msra.mxu1 %v3228_v29  ;;  %3562 = vmatpush1.bf16.msra.mxu0 %v3230_v13  ;;  %v3322_v29 = vld [vmem:[#allocation9 + $0x638] sm:$0xff]  ;;  %v3319_v13 = vld [vmem:[#allocation9 + $0x620] sm:$0xff] }
 0xb91   :  { %3449 = vmatprep.subr.bf16.mxu1 %v3236_v45  ;;  %3572 = vmatprep.subr.bf16.mxu0 %v3238_v49  ;;  %v3321_v45 = vld [vmem:[#allocation9 + $0x630] sm:$0xff]  ;;  %v3327_v49 = vld [vmem:[#allocation9 + $0x660] sm:$0xff] }
 0xb93   :  { %3441 = vmatmul.mubr.bf16.vlgmr.msra.gmra.mrb[24].mxu1 %v5276_v51  ;;  %3564 = vmatmul.mubr.bf16.vlgmr.msra.gmra.mrb[48].mxu0 %v5276_v51 }
 0xb94   :  { %3450 = vmatpush1.bf16.msra.mxu1 %v3235_v53  ;;  %3573 = vmatpush1.bf16.msra.mxu0 %v3237_v56  ;;  %v3329_v53 = vld [vmem:[#allocation9 + $0x670] sm:$0xff]  ;;  %v3326_v56 = vld [vmem:[#allocation9 + $0x658] sm:$0xff] }
 0xb95   :  { %3451 = vmatprep.subr.bf16.mxu1 %v3243_v35  ;;  %3574 = vmatprep.subr.bf16.mxu0 %v3245_v18  ;;  %v3328_v35 = vld [vmem:[#allocation9 + $0x668] sm:$0xff]  ;;  %v3334_v18 = vld [vmem:[#allocation9 + $0x698] sm:$0xff] }
 0xb96   :  { %3481 = vmatprep.mubr.bf16.mxu1 %v5280_v7  ;;  %3604 = vmatprep.mubr.bf16.mxu0 %v5280_v7 }
 0xb98   :  { %3452 = vmatpush1.bf16.msra.mxu1 %v3242_v37  ;;  %3575 = vmatpush1.bf16.msra.mxu0 %v3244_v1  ;;  %v3336_v37 = vld [vmem:[#allocation9 + $0x6a8] sm:$0xff]  ;;  %v3333_v1 = vld [vmem:[#allocation9 + $0x690] sm:$0xff] }
 0xb99   :  { %3453 = vmatprep.subr.bf16.mxu1 %v3250_v62  ;;  %3576 = vmatprep.subr.bf16.mxu0 %v3252_v8  ;;  %v3335_v62 = vld [vmem:[#allocation9 + $0x6a0] sm:$0xff]  ;;  %v3341_v8 = vld [vmem:[#allocation9 + $0x6d0] sm:$0xff] }
 0xb9c   :  { %3454 = vmatpush1.bf16.msra.mxu1 %v3249_v63  ;;  %3577 = vmatpush1.bf16.msra.mxu0 %v3251_v58  ;;  %v3343_v63 = vld [vmem:[#allocation9 + $0x6e0] sm:$0xff]  ;;  %v3340_v58 = vld [vmem:[#allocation9 + $0x6c8] sm:$0xff] }
 0xb9d   :  { %3455 = vmatprep.subr.bf16.mxu1 %v3257_v9  ;;  %3578 = vmatprep.subr.bf16.mxu0 %v3259_v10  ;;  %v3342_v9 = vld [vmem:[#allocation9 + $0x6d8] sm:$0xff]  ;;  %v3348_v10 = vld [vmem:[#allocation9 + $0x708] sm:$0xff] }
 0xba0   :  { %3456 = vmatpush1.bf16.msra.mxu1 %v3256_v12  ;;  %3579 = vmatpush1.bf16.msra.mxu0 %v3258_v20  ;;  %v3350_v12 = vld [vmem:[#allocation9 + $0x718] sm:$0xff]  ;;  %v5288_v20 = vpack.c.bf16 %v5260_v57, %v5260_v57 }
 0xba1   :  { %3457 = vmatprep.subr.bf16.mxu1 %v3264_v59  ;;  %3580 = vmatprep.subr.bf16.mxu0 %v3266_v14  ;;  %v3347_v59 = vld [vmem:[#allocation9 + $0x700] sm:$0xff]  ;;  %v3349_v14 = vld [vmem:[#allocation9 + $0x710] sm:$0xff]  ;;  %v3362_v57 = vld [vmem:[#allocation9 + $0x778] sm:$0xff] }
 0xba4   :  { %3458 = vmatpush1.bf16.msra.mxu1 %v3263_v4  ;;  %3581 = vmatpush1.bf16.msra.mxu0 %v3265_v16  ;;  %v3355_v4 = vld [vmem:[#allocation9 + $0x740] sm:$0xff]  ;;  %v3357_v16 = vld [vmem:[#allocation9 + $0x750] sm:$0xff] }
 0xba5   :  { %3459 = vmatprep.subr.bf16.mxu1 %v3271_v60  ;;  %3582 = vmatprep.subr.bf16.mxu0 %v3273_v61  ;;  %v3354_v60 = vld [vmem:[#allocation9 + $0x738] sm:$0xff]  ;;  %v3356_v61 = vld [vmem:[#allocation9 + $0x748] sm:$0xff] }
 0xba8   :  { %3460 = vmatpush1.bf16.msra.mxu1 %v3270_v52  ;;  %3583 = vmatpush1.bf16.msra.mxu0 %v3272_v0  ;;  %v3364_v52 = vld [vmem:[#allocation9 + $0x788] sm:$0xff]  ;;  %v3361_v0 = vld [vmem:[#allocation9 + $0x770] sm:$0xff] }
 0xba9   :  { %3461 = vmatprep.subr.bf16.mxu1 %v3278_v24  ;;  %3584 = vmatprep.subr.bf16.mxu0 %v3280_v3  ;;  %v3363_v24 = vld [vmem:[#allocation9 + $0x780] sm:$0xff]  ;;  %v3369_v3 = vld [vmem:[#allocation9 + $0x7b0] sm:$0xff] }
 0xbac   :  { %3462 = vmatpush1.bf16.msra.mxu1 %v3277_v46  ;;  %3585 = vmatpush1.bf16.msra.mxu0 %v3279_v26  ;;  %v3371_v46 = vld [vmem:[#allocation9 + $0x7c0] sm:$0xff]  ;;  %v3368_v26 = vld [vmem:[#allocation9 + $0x7a8] sm:$0xff] }
 0xbad   :  { %3463 = vmatprep.subr.bf16.mxu1 %v3285_v27  ;;  %3586 = vmatprep.subr.bf16.mxu0 %v3287_v28  ;;  %v3370_v27 = vld [vmem:[#allocation9 + $0x7b8] sm:$0xff]  ;;  %v3376_v28 = vld [vmem:[#allocation9 + $0x7e8] sm:$0xff] }
 0xbb0   :  { %3464 = vmatpush1.bf16.msra.mxu1 %v3284_v2  ;;  %3587 = vmatpush1.bf16.msra.mxu0 %v3286_v54  ;;  %v3378_v2 = vld [vmem:[#allocation9 + $0x7f8] sm:$0xff]  ;;  %v3375_v54 = vld [vmem:[#allocation9 + $0x7e0] sm:$0xff] }
 0xbb1   :  { %3465 = vmatprep.subr.bf16.mxu1 %v3292_v30  ;;  %3588 = vmatprep.subr.bf16.mxu0 %v3294_v23  ;;  %v3377_v30 = vld [vmem:[#allocation9 + $0x7f0] sm:$0xff]  ;;  %v3383_v23 = vld [vmem:[#allocation9 + $0x820] sm:$0xff] }
 0xbb4   :  { %3466 = vmatpush1.bf16.msra.mxu1 %v3291_v31  ;;  %3589 = vmatpush1.bf16.msra.mxu0 %v3293_v38  ;;  %v3385_v31 = vld [vmem:[#allocation9 + $0x830] sm:$0xff]  ;;  %v3382_v38 = vld [vmem:[#allocation9 + $0x818] sm:$0xff] }
 0xbb5   :  { %3467 = vmatprep.subr.bf16.mxu1 %v3299_v40  ;;  %3590 = vmatprep.subr.bf16.mxu0 %v3301_v33  ;;  %v3384_v40 = vld [vmem:[#allocation9 + $0x828] sm:$0xff]  ;;  %v3390_v33 = vld [vmem:[#allocation9 + $0x858] sm:$0xff] }
 0xbb8   :  { %3468 = vmatpush1.bf16.msra.mxu1 %v3298_v55  ;;  %3591 = vmatpush1.bf16.msra.mxu0 %v3300_v42  ;;  %v3392_v55 = vld [vmem:[#allocation9 + $0x868] sm:$0xff]  ;;  %v3389_v42 = vld [vmem:[#allocation9 + $0x850] sm:$0xff] }
 0xbb9   :  { %3469 = vmatprep.subr.bf16.mxu1 %v3306_v43  ;;  %3592 = vmatprep.subr.bf16.mxu0 %v3308_v6  ;;  %v3391_v43 = vld [vmem:[#allocation9 + $0x860] sm:$0xff]  ;;  %v3397_v6 = vld [vmem:[#allocation9 + $0x890] sm:$0xff] }
 0xbbc   :  { %3470 = vmatpush1.bf16.msra.mxu1 %v3305_v32  ;;  %3593 = vmatpush1.bf16.msra.mxu0 %v3307_v44  ;;  %v3399_v32 = vld [vmem:[#allocation9 + $0x8a0] sm:$0xff]  ;;  %v3396_v44 = vld [vmem:[#allocation9 + $0x888] sm:$0xff] }
 0xbbd   :  { %3471 = vmatprep.subr.bf16.mxu1 %v3313_v5  ;;  %3594 = vmatprep.subr.bf16.mxu0 %v3315_v22  ;;  %v3398_v5 = vld [vmem:[#allocation9 + $0x898] sm:$0xff]  ;;  %v3128_v22 = vld [vmem:[#allocation9 + $0x28] sm:$0xff] }
 0xbc0   :  { %3472 = vmatpush1.bf16.msra.mxu1 %v3312_v34  ;;  %3595 = vmatpush1.bf16.msra.mxu0 %v3314_v11  ;;  %v3185_v34 = vld [vmem:[#allocation9 + $0x1f0] sm:$0xff]  ;;  %v5296_v11 = vpack.c.bf16 %v5268_v39, %v5268_v39  ;;  %v3142_v39 = vld [vmem:[#allocation9 + $0x98] sm:$0xff] }
 0xbc1   :  { %3473 = vmatprep.subr.bf16.mxu1 %v3320_v48  ;;  %3596 = vmatprep.subr.bf16.mxu0 %v3322_v29  ;;  %v3127_v48 = vld [vmem:[#allocation9 + $0x20] sm:$0xff]  ;;  %v3129_v29 = vld [vmem:[#allocation9 + $0x30] sm:$0xff] }
 0xbc4   :  { %3474 = vmatpush1.bf16.msra.mxu1 %v3319_v13  ;;  %3597 = vmatpush1.bf16.msra.mxu0 %v3321_v45  ;;  %v3135_v13 = vld [vmem:[#allocation9 + $0x60] sm:$0xff]  ;;  %v3192_v45 = vld [vmem:[#allocation9 + $0x228] sm:$0xff] }
 0xbc5   :  { %3475 = vmatprep.subr.bf16.mxu1 %v3327_v49  ;;  %3598 = vmatprep.subr.bf16.mxu0 %v3329_v53  ;;  %v3134_v49 = vld [vmem:[#allocation9 + $0x58] sm:$0xff]  ;;  %v3136_v53 = vld [vmem:[#allocation9 + $0x68] sm:$0xff] }
 0xbc8   :  { %3476 = vmatpush1.bf16.msra.mxu1 %v3326_v56  ;;  %3599 = vmatpush1.bf16.msra.mxu0 %v3328_v35  ;;  %v3199_v56 = vld [vmem:[#allocation9 + $0x260] sm:$0xff]  ;;  %v3141_v35 = vld [vmem:[#allocation9 + $0x90] sm:$0xff] }
 0xbc9   :  { %3477 = vmatprep.subr.bf16.mxu1 %v3334_v18  ;;  %3600 = vmatprep.subr.bf16.mxu0 %v3336_v37  ;;  %v3143_v18 = vld [vmem:[#allocation9 + $0xa0] sm:$0xff]  ;;  %v3149_v37 = vld [vmem:[#allocation9 + $0xd0] sm:$0xff] }
 0xbcc   :  { %3478 = vmatpush1.bf16.msra.mxu1 %v3333_v1  ;;  %3601 = vmatpush1.bf16.msra.mxu0 %v3335_v62  ;;  %v3206_v1 = vld [vmem:[#allocation9 + $0x298] sm:$0xff]  ;;  %v3148_v62 = vld [vmem:[#allocation9 + $0xc8] sm:$0xff] }
 0xbcd   :  { %3479 = vmatprep.subr.bf16.mxu1 %v3341_v8  ;;  %3602 = vmatprep.subr.bf16.mxu0 %v3343_v63  ;;  %v3150_v8 = vld [vmem:[#allocation9 + $0xd8] sm:$0xff]  ;;  %v3156_v63 = vld [vmem:[#allocation9 + $0x108] sm:$0xff] }
 0xbd0   :  { %3480 = vmatpush1.bf16.msra.mxu1 %v3340_v58  ;;  %3603 = vmatpush1.bf16.msra.mxu0 %v3342_v9  ;;  %v3213_v58 = vld [vmem:[#allocation9 + $0x2d0] sm:$0xff] }
 0xbd1   :  { %3490 = vmatprep.subr.bf16.mxu1 %v3348_v10  ;;  %3613 = vmatprep.subr.bf16.mxu0 %v3350_v12  ;;  %v3157_v9 = vld [vmem:[#allocation9 + $0x110] sm:$0xff]  ;;  %v3163_v10 = vld [vmem:[#allocation9 + $0x140] sm:$0xff]  ;;  %v3220_v12 = vld [vmem:[#allocation9 + $0x308] sm:$0xff] }
 0xbd3   :  { %3482 = vmatmul.mubr.bf16.vlgmr.msra.gmra.mrb[24].mxu1 %v5288_v20  ;;  %3605 = vmatmul.mubr.bf16.vlgmr.msra.gmra.mrb[48].mxu0 %v5288_v20 }
 0xbd4   :  { %3491 = vmatpush1.bf16.msra.mxu1 %v3347_v59  ;;  %3614 = vmatpush1.bf16.msra.mxu0 %v3349_v14  ;;  %v3162_v59 = vld [vmem:[#allocation9 + $0x138] sm:$0xff]  ;;  %v3164_v14 = vld [vmem:[#allocation9 + $0x148] sm:$0xff] }
 0xbd5   :  { %3492 = vmatprep.subr.bf16.mxu1 %v3355_v4  ;;  %3615 = vmatprep.subr.bf16.mxu0 %v3357_v16  ;;  %v3170_v4 = vld [vmem:[#allocation9 + $0x178] sm:$0xff]  ;;  %v3227_v16 = vld [vmem:[#allocation9 + $0x340] sm:$0xff] }
 0xbd6   :  { %3522 = vmatprep.mubr.bf16.mxu1 %v4812_v36  ;;  %3645 = vmatprep.mubr.bf16.mxu0 %v4812_v36 }
 0xbd8   :  { %3493 = vmatpush1.bf16.msra.mxu1 %v3354_v60  ;;  %3616 = vmatpush1.bf16.msra.mxu0 %v3356_v61  ;;  %v3169_v60 = vld [vmem:[#allocation9 + $0x170] sm:$0xff]  ;;  %v3171_v61 = vld [vmem:[#allocation9 + $0x180] sm:$0xff] }
 0xbd9   :  { %3494 = vmatprep.subr.bf16.mxu1 %v3362_v57  ;;  %3617 = vmatprep.subr.bf16.mxu0 %v3364_v52  ;;  %v3177_v57 = vld [vmem:[#allocation9 + $0x1b0] sm:$0xff]  ;;  %v3234_v52 = vld [vmem:[#allocation9 + $0x378] sm:$0xff] }
 0xbdc   :  { %3495 = vmatpush1.bf16.msra.mxu1 %v3361_v0  ;;  %3618 = vmatpush1.bf16.msra.mxu0 %v3363_v24  ;;  %v3176_v0 = vld [vmem:[#allocation9 + $0x1a8] sm:$0xff]  ;;  %v3178_v24 = vld [vmem:[#allocation9 + $0x1b8] sm:$0xff] }
 0xbdd   :  { %3496 = vmatprep.subr.bf16.mxu1 %v3369_v3  ;;  %3619 = vmatprep.subr.bf16.mxu0 %v3371_v46  ;;  %v3184_v3 = vld [vmem:[#allocation9 + $0x1e8] sm:$0xff]  ;;  %v3297_v46 = vld [vmem:[#allocation9 + $0x570] sm:$0xff] }
 0xbe0   :  { %3497 = vmatpush1.bf16.msra.mxu1 %v3368_v26  ;;  %3620 = vmatpush1.bf16.msra.mxu0 %v3370_v27  ;;  %v3183_v26 = vld [vmem:[#allocation9 + $0x1e0] sm:$0xff]  ;;  %v3241_v27 = vld [vmem:[#allocation9 + $0x3b0] sm:$0xff] }
 0xbe1   :  { %3498 = vmatprep.subr.bf16.mxu1 %v3376_v28  ;;  %3621 = vmatprep.subr.bf16.mxu0 %v3378_v2  ;;  %v3191_v28 = vld [vmem:[#allocation9 + $0x220] sm:$0xff]  ;;  %v3304_v2 = vld [vmem:[#allocation9 + $0x5a8] sm:$0xff] }
 0xbe4   :  { %3499 = vmatpush1.bf16.msra.mxu1 %v3375_v54  ;;  %3622 = vmatpush1.bf16.msra.mxu0 %v3377_v30  ;;  %v3190_v54 = vld [vmem:[#allocation9 + $0x218] sm:$0xff]  ;;  %v3248_v30 = vld [vmem:[#allocation9 + $0x3e8] sm:$0xff] }
 0xbe5   :  { %3500 = vmatprep.subr.bf16.mxu1 %v3383_v23  ;;  %3623 = vmatprep.subr.bf16.mxu0 %v3385_v31  ;;  %v3198_v23 = vld [vmem:[#allocation9 + $0x258] sm:$0xff]  ;;  %v3311_v31 = vld [vmem:[#allocation9 + $0x5e0] sm:$0xff] }
 0xbe8   :  { %3501 = vmatpush1.bf16.msra.mxu1 %v3382_v38  ;;  %3624 = vmatpush1.bf16.msra.mxu0 %v3384_v40  ;;  %v3197_v38 = vld [vmem:[#allocation9 + $0x250] sm:$0xff]  ;;  %v3255_v40 = vld [vmem:[#allocation9 + $0x420] sm:$0xff] }
 0xbe9   :  { %3502 = vmatprep.subr.bf16.mxu1 %v3390_v33  ;;  %3625 = vmatprep.subr.bf16.mxu0 %v3392_v55  ;;  %v3205_v33 = vld [vmem:[#allocation9 + $0x290] sm:$0xff]  ;;  %v3318_v55 = vld [vmem:[#allocation9 + $0x618] sm:$0xff] }
 0xbec   :  { %3503 = vmatpush1.bf16.msra.mxu1 %v3389_v42  ;;  %3626 = vmatpush1.bf16.msra.mxu0 %v3391_v43  ;;  %v3204_v42 = vld [vmem:[#allocation9 + $0x288] sm:$0xff]  ;;  %v3262_v43 = vld [vmem:[#allocation9 + $0x458] sm:$0xff] }
 0xbed   :  { %3504 = vmatprep.subr.bf16.mxu1 %v3397_v6  ;;  %3627 = vmatprep.subr.bf16.mxu0 %v3399_v32  ;;  %v3212_v6 = vld [vmem:[#allocation9 + $0x2c8] sm:$0xff]  ;;  %v3325_v32 = vld [vmem:[#allocation9 + $0x650] sm:$0xff] }
 0xbf0   :  { %3505 = vmatpush1.bf16.msra.mxu1 %v3396_v44  ;;  %3628 = vmatpush1.bf16.msra.mxu0 %v3398_v5  ;;  %v3211_v44 = vld [vmem:[#allocation9 + $0x2c0] sm:$0xff]  ;;  %v3269_v5 = vld [vmem:[#allocation9 + $0x490] sm:$0xff] }
 0xbf1   :  { %3654 = vmatprep.subr.bf16.mxu1 %v3128_v22  ;;  %4409 = vmatprep.subr.bf16.mxu0 %v3185_v34  ;;  %v3219_v22 = vld [vmem:[#allocation9 + $0x300] sm:$0xff]  ;;  %v3332_v34 = vld [vmem:[#allocation9 + $0x688] sm:$0xff] }
 0xbf3   :  { %3523 = vmatmul.mubr.bf16.vlgmr.msra.gmra.mrb[24].mxu1 %v5296_v11  ;;  %3646 = vmatmul.mubr.bf16.vlgmr.msra.gmra.mrb[48].mxu0 %v5296_v11 }
 0xbf4   :  { %3655 = vmatpush1.bf16.msra.mxu1 %v3127_v48  ;;  %4410 = vmatpush3.bf16.msra.mxu0 %v3129_v29  ;;  %v3218_v48 = vld [vmem:[#allocation9 + $0x2f8] sm:$0xff]  ;;  %v3276_v29 = vld [vmem:[#allocation9 + $0x4c8] sm:$0xff] }
 0xbf5   :  { %3656 = vmatprep.subr.bf16.mxu1 %v3135_v13  ;;  %4411 = vmatprep.subr.bf16.mxu0 %v3192_v45  ;;  %v3226_v13 = vld [vmem:[#allocation9 + $0x338] sm:$0xff]  ;;  %v3339_v45 = vld [vmem:[#allocation9 + $0x6c0] sm:$0xff] }
 0xbf6   :  { %3809 = vmatprep.mubr.bf16.mxu0 %v5270_v19  ;;  %3686 = vmatprep.mubr.bf16.mxu1 %v5270_v19  ;;  %v3155_v19 = vld [vmem:[#allocation9 + $0x100] sm:$0xff] }
 0xbf8   :  { %3657 = vmatpush1.bf16.msra.mxu1 %v3134_v49  ;;  %4412 = vmatpush3.bf16.msra.mxu0 %v3136_v53  ;;  %v3225_v49 = vld [vmem:[#allocation9 + $0x330] sm:$0xff]  ;;  %v3283_v53 = vld [vmem:[#allocation9 + $0x500] sm:$0xff] }
 0xbf9   :  { %3658 = vmatprep.subr.bf16.mxu1 %v3142_v39  ;;  %4413 = vmatprep.subr.bf16.mxu0 %v3199_v56  ;;  %v3233_v39 = vld [vmem:[#allocation9 + $0x370] sm:$0xff]  ;;  %v3346_v56 = vld [vmem:[#allocation9 + $0x6f8] sm:$0xff] }
 0xbfc   :  { %3659 = vmatpush1.bf16.msra.mxu1 %v3141_v35  ;;  %4414 = vmatpush3.bf16.msra.mxu0 %v3143_v18  ;;  %v3232_v35 = vld [vmem:[#allocation9 + $0x368] sm:$0xff]  ;;  %v3290_v18 = vld [vmem:[#allocation9 + $0x538] sm:$0xff] }
 0xbfd   :  { %3660 = vmatprep.subr.bf16.mxu1 %v3149_v37  ;;  %4415 = vmatprep.subr.bf16.mxu0 %v3206_v1  ;;  %v3240_v37 = vld [vmem:[#allocation9 + $0x3a8] sm:$0xff]  ;;  %v3239_v1 = vld [vmem:[#allocation9 + $0x3a0] sm:$0xff] }
 0xc00   :  { %3661 = vmatpush1.bf16.msra.mxu1 %v3148_v62  ;;  %4416 = vmatpush3.bf16.msra.mxu0 %v3150_v8  ;;  %v3353_v62 = vld [vmem:[#allocation9 + $0x730] sm:$0xff]  ;;  %v3247_v8 = vld [vmem:[#allocation9 + $0x3e0] sm:$0xff] }
 0xc01   :  { %3662 = vmatprep.subr.bf16.mxu1 %v3156_v63  ;;  %4417 = vmatprep.subr.bf16.mxu0 %v3213_v58  ;;  %v3246_v63 = vld [vmem:[#allocation9 + $0x3d8] sm:$0xff]  ;;  %v3360_v58 = vld [vmem:[#allocation9 + $0x768] sm:$0xff] }
 0xc04   :  { %3663 = vmatpush1.bf16.msra.mxu1 %v3155_v19  ;;  %4418 = vmatpush3.bf16.msra.mxu0 %v3157_v9  ;;  %v3254_v19 = vld [vmem:[#allocation9 + $0x418] sm:$0xff]  ;;  %v3367_v9 = vld [vmem:[#allocation9 + $0x7a0] sm:$0xff] }
 0xc05   :  { %3664 = vmatprep.subr.bf16.mxu1 %v3163_v10  ;;  %4419 = vmatprep.subr.bf16.mxu0 %v3220_v12  ;;  %v3261_v10 = vld [vmem:[#allocation9 + $0x450] sm:$0xff]  ;;  %v3260_v12 = vld [vmem:[#allocation9 + $0x448] sm:$0xff] }
 0xc08   :  { %3665 = vmatpush1.bf16.msra.mxu1 %v3162_v59  ;;  %4420 = vmatpush3.bf16.msra.mxu0 %v3164_v14  ;;  %v3374_v59 = vld [vmem:[#allocation9 + $0x7d8] sm:$0xff]  ;;  %v3268_v14 = vld [vmem:[#allocation9 + $0x488] sm:$0xff] }
 0xc09   :  { %3666 = vmatprep.subr.bf16.mxu1 %v3170_v4  ;;  %4421 = vmatprep.subr.bf16.mxu0 %v3227_v16  ;;  %v3381_v4 = vld [vmem:[#allocation9 + $0x810] sm:$0xff]  ;;  %v3275_v16 = vld [vmem:[#allocation9 + $0x4c0] sm:$0xff] }
 0xc0c   :  { %3667 = vmatpush1.bf16.msra.mxu1 %v3169_v60  ;;  %4422 = vmatpush3.bf16.msra.mxu0 %v3171_v61  ;;  %v3274_v60 = vld [vmem:[#allocation9 + $0x4b8] sm:$0xff]  ;;  %v3388_v61 = vld [vmem:[#allocation9 + $0x848] sm:$0xff] }
 0xc0d   :  { %3668 = vmatprep.subr.bf16.mxu1 %v3177_v57  ;;  %4423 = vmatprep.subr.bf16.mxu0 %v3234_v52  ;;  %v3282_v57 = vld [vmem:[#allocation9 + $0x4f8] sm:$0xff]  ;;  %v3281_v52 = vld [vmem:[#allocation9 + $0x4f0] sm:$0xff] }
 0xc10   :  { %3669 = vmatpush1.bf16.msra.mxu1 %v3176_v0  ;;  %4424 = vmatpush3.bf16.msra.mxu0 %v3178_v24  ;;  %v3395_v0 = vld [vmem:[#allocation9 + $0x880] sm:$0xff]  ;;  %v3289_v24 = vld [vmem:[#allocation9 + $0x530] sm:$0xff] }
 0xc11   :  { %3670 = vmatprep.subr.bf16.mxu1 %v3184_v3  ;;  %4431 = vmatprep.subr.bf16.mxu0 %v3297_v46  ;;  %v3288_v3 = vld [vmem:[#allocation9 + $0x528] sm:$0xff]  ;;  %v3402_v46 = vld [vmem:[#allocation9 + $0x8b8] sm:$0xff] }
 0xc13   :  { %3810 = vmatmul.mubr.bf16.vlgmr.msra.gmra.mrb[52].mxu0 %v5276_v51 }
 0xc14   :  { %3671 = vmatpush1.bf16.msra.mxu1 %v3183_v26  ;;  %4432 = vmatpush3.bf16.msra.mxu0 %v3241_v27  ;;  %v3296_v26 = vld [vmem:[#allocation9 + $0x568] sm:$0xff]  ;;  %v3295_v27 = vld [vmem:[#allocation9 + $0x560] sm:$0xff] }
 0xc15   :  { %3672 = vmatprep.subr.bf16.mxu1 %v3191_v28  ;;  %4433 = vmatprep.subr.bf16.mxu0 %v3304_v2  ;;  %v3303_v28 = vld [vmem:[#allocation9 + $0x5a0] sm:$0xff]  ;;  %v3302_v2 = vld [vmem:[#allocation9 + $0x598] sm:$0xff] }
 0xc16   :  { %3849 = vmatprep.mubr.bf16.mxu0 %v5280_v7 }
 0xc18   :  { %3673 = vmatpush1.bf16.msra.mxu1 %v3190_v54  ;;  %4434 = vmatpush3.bf16.msra.mxu0 %v3248_v30  ;;  %v3310_v54 = vld [vmem:[#allocation9 + $0x5d8] sm:$0xff]  ;;  %v3309_v30 = vld [vmem:[#allocation9 + $0x5d0] sm:$0xff] }
 0xc19   :  { %3674 = vmatprep.subr.bf16.mxu1 %v3198_v23  ;;  %4435 = vmatprep.subr.bf16.mxu0 %v3311_v31  ;;  %v3317_v23 = vld [vmem:[#allocation9 + $0x610] sm:$0xff]  ;;  %v3324_v31 = vld [vmem:[#allocation9 + $0x648] sm:$0xff] }
 0xc1c   :  { %3675 = vmatpush1.bf16.msra.mxu1 %v3197_v38  ;;  %4436 = vmatpush3.bf16.msra.mxu0 %v3255_v40  ;;  %v3323_v38 = vld [vmem:[#allocation9 + $0x640] sm:$0xff] }
 0xc1d   :  { %3676 = vmatprep.subr.bf16.mxu1 %v3205_v33  ;;  %4437 = vmatprep.subr.bf16.mxu0 %v3318_v55  ;;  %v3331_v40 = vld [vmem:[#allocation9 + $0x680] sm:$0xff]  ;;  %v3330_v33 = vld [vmem:[#allocation9 + $0x678] sm:$0xff] }
 0xc1e   :  { %v3338_v55 = vld [vmem:[#allocation9 + $0x6b8] sm:$0xff] }
 0xc20   :  { %3677 = vmatpush1.bf16.msra.mxu1 %v3204_v42  ;;  %4438 = vmatpush3.bf16.msra.mxu0 %v3262_v43  ;;  %v3337_v42 = vld [vmem:[#allocation9 + $0x6b0] sm:$0xff] }
 0xc21   :  { %3678 = vmatprep.subr.bf16.mxu1 %v3212_v6  ;;  %4439 = vmatprep.subr.bf16.mxu0 %v3325_v32  ;;  %v3345_v43 = vld [vmem:[#allocation9 + $0x6f0] sm:$0xff]  ;;  %v3344_v6 = vld [vmem:[#allocation9 + $0x6e8] sm:$0xff] }
 0xc22   :  { %v3352_v32 = vld [vmem:[#allocation9 + $0x728] sm:$0xff] }
 0xc24   :  { %3679 = vmatpush1.bf16.msra.mxu1 %v3211_v44  ;;  %4440 = vmatpush3.bf16.msra.mxu0 %v3269_v5  ;;  %v3351_v44 = vld [vmem:[#allocation9 + $0x720] sm:$0xff] }
 0xc25   :  { %3680 = vmatprep.subr.bf16.mxu1 %v3219_v22  ;;  %4441 = vmatprep.subr.bf16.mxu0 %v3332_v34  ;;  %v3359_v5 = vld [vmem:[#allocation9 + $0x760] sm:$0xff]  ;;  %v3358_v22 = vld [vmem:[#allocation9 + $0x758] sm:$0xff] }
 0xc26   :  { %v3366_v34 = vld [vmem:[#allocation9 + $0x798] sm:$0xff] }
 0xc28   :  { %3681 = vmatpush1.bf16.msra.mxu1 %v3218_v48  ;;  %4442 = vmatpush3.bf16.msra.mxu0 %v3276_v29  ;;  %v3365_v48 = vld [vmem:[#allocation9 + $0x790] sm:$0xff] }
 0xc29   :  { %3682 = vmatprep.subr.bf16.mxu1 %v3226_v13  ;;  %4443 = vmatprep.subr.bf16.mxu0 %v3339_v45  ;;  %v3373_v29 = vld [vmem:[#allocation9 + $0x7d0] sm:$0xff]  ;;  %v3372_v13 = vld [vmem:[#allocation9 + $0x7c8] sm:$0xff] }
 0xc2a   :  { %v3380_v45 = vld [vmem:[#allocation9 + $0x808] sm:$0xff] }
 0xc2c   :  { %3683 = vmatpush1.bf16.msra.mxu1 %v3225_v49  ;;  %4444 = vmatpush3.bf16.msra.mxu0 %v3283_v53  ;;  %v3379_v49 = vld [vmem:[#allocation9 + $0x800] sm:$0xff] }
 0xc2d   :  { %3684 = vmatprep.subr.bf16.mxu1 %v3233_v39  ;;  %4445 = vmatprep.subr.bf16.mxu0 %v3346_v56  ;;  %v3387_v53 = vld [vmem:[#allocation9 + $0x840] sm:$0xff]  ;;  %v3394_v39 = vld [vmem:[#allocation9 + $0x878] sm:$0xff]  ;;  %v3401_v56 = vld [vmem:[#allocation9 + $0x8b0] sm:$0xff] }
 0xc30   :  { %3685 = vmatpush1.bf16.msra.mxu1 %v3232_v35  ;;  %4446 = vmatpush3.bf16.msra.mxu0 %v3290_v18  ;;  %v3400_v35 = vld [vmem:[#allocation9 + $0x8a8] sm:$0xff] }
 0xc31   :  { %3695 = vmatprep.subr.bf16.mxu1 %v3240_v37  ;;  %4468 = vmatprep.subr.bf16.mxu0 %v4813_v21 }
 0xc33   :  { %3687 = vmatmul.mubr.bf16.vlgmr.msra.gmra.mrb[28].mxu1 %v5276_v51  ;;  %3850 = vmatmul.mubr.bf16.vlgmr.msra.gmra.mrb[56].mxu0 %v5288_v20  ;;  %v3253_v51 = vld [vmem:[#allocation9 + $0x410] sm:$0xff] }
 0xc34   :  { %3696 = vmatpush1.bf16.msra.mxu1 %v3239_v1  ;;  %4469 = vmatpush3.bf16.msra.mxu0 %v3353_v62 }
 0xc35   :  { %3697 = vmatprep.subr.bf16.mxu1 %v3247_v8  ;;  %4470 = vmatprep.subr.bf16.mxu0 %v4813_v21 }
 0xc36   :  { %4484 = vmatprep.mubr.msk.bf16.mxu0 %vm4814_vm1, %v4813_v21  ;;  %3727 = vmatprep.mubr.bf16.mxu1 %v5280_v7  ;;  %v3267_v7 = vld [vmem:[#allocation9 + $0x480] sm:$0xff] }
 0xc38   :  { %3698 = vmatpush1.bf16.msra.mxu1 %v3246_v63  ;;  %4471 = vmatpush3.bf16.msra.mxu0 %v3360_v58 }
 0xc39   :  { %3699 = vmatprep.subr.bf16.mxu1 %v3254_v19  ;;  %4472 = vmatprep.subr.bf16.mxu0 %v4813_v21 }
 0xc3c   :  { %3700 = vmatpush1.bf16.msra.mxu1 %v3253_v51  ;;  %4473 = vmatpush3.bf16.msra.mxu0 %v3367_v9 }
 0xc3d   :  { %3701 = vmatprep.subr.bf16.mxu1 %v3261_v10  ;;  %4474 = vmatprep.subr.bf16.mxu0 %v4813_v21 }
 0xc40   :  { %3702 = vmatpush1.bf16.msra.mxu1 %v3260_v12  ;;  %4475 = vmatpush3.bf16.msra.mxu0 %v3374_v59 }
 0xc41   :  { %3703 = vmatprep.subr.bf16.mxu1 %v3268_v14  ;;  %4476 = vmatprep.subr.bf16.mxu0 %v4813_v21 }
 0xc44   :  { %3704 = vmatpush1.bf16.msra.mxu1 %v3267_v7  ;;  %4477 = vmatpush3.bf16.msra.mxu0 %v3381_v4 }
 0xc45   :  { %3705 = vmatprep.subr.bf16.mxu1 %v3275_v16  ;;  %4478 = vmatprep.subr.bf16.mxu0 %v4813_v21 }
 0xc48   :  { %3706 = vmatpush1.bf16.msra.mxu1 %v3274_v60  ;;  %4479 = vmatpush3.bf16.msra.mxu0 %v3388_v61 }
 0xc49   :  { %3707 = vmatprep.subr.bf16.mxu1 %v3282_v57  ;;  %4480 = vmatprep.subr.bf16.mxu0 %v4813_v21 }
 0xc4c   :  { %3708 = vmatpush1.bf16.msra.mxu1 %v3281_v52  ;;  %4481 = vmatpush3.bf16.msra.mxu0 %v3395_v0 }
 0xc4d   :  { %3709 = vmatprep.subr.bf16.mxu1 %v3289_v24  ;;  %4482 = vmatprep.subr.bf16.mxu0 %v4813_v21  ;;  %v3316_v21 = vld [vmem:[#allocation9 + $0x608] sm:$0xff] }
 0xc50   :  { %3710 = vmatpush1.bf16.msra.mxu1 %v3288_v3  ;;  %4483 = vmatpush3.bf16.msra.mxu0 %v3402_v46 }
 0xc51   :  { %3711 = vmatprep.subr.bf16.mxu1 %v3296_v26 }
 0xc53   :  { %4485 = vmatmul.mubr.bf16.vlgmr.msra.gmra.mrb[60].mxu0 %v5296_v11 }
 0xc54   :  { %3712 = vmatpush1.bf16.msra.mxu1 %v3295_v27 }
 0xc55   :  { %3713 = vmatprep.subr.bf16.mxu1 %v3303_v28 }
 0xc58   :  { %3714 = vmatpush1.bf16.msra.mxu1 %v3302_v2 }
 0xc59   :  { %3715 = vmatprep.subr.bf16.mxu1 %v3310_v54 }
 0xc5c   :  { %3716 = vmatpush1.bf16.msra.mxu1 %v3309_v30 }
 0xc5d   :  { %3717 = vmatprep.subr.bf16.mxu1 %v3317_v23 }
 0xc60   :  { %3718 = vmatpush1.bf16.msra.mxu1 %v3316_v21 }
 0xc61   :  { %3719 = vmatprep.subr.bf16.mxu1 %v3324_v31 }
 0xc64   :  { %3720 = vmatpush1.bf16.msra.mxu1 %v3323_v38 }
 0xc65   :  { %3721 = vmatprep.subr.bf16.mxu1 %v3331_v40 }
 0xc68   :  { %3722 = vmatpush1.bf16.msra.mxu1 %v3330_v33 }
 0xc69   :  { %3723 = vmatprep.subr.bf16.mxu1 %v3338_v55 }
 0xc6c   :  { %3724 = vmatpush1.bf16.msra.mxu1 %v3337_v42 }
 0xc6d   :  { %3725 = vmatprep.subr.bf16.mxu1 %v3345_v43 }
 0xc70   :  { %3726 = vmatpush1.bf16.msra.mxu1 %v3344_v6 }
 0xc71   :  { %3736 = vmatprep.subr.bf16.mxu1 %v3352_v32 }
 0xc73   :  { %3728 = vmatmul.mubr.bf16.vlgmr.msra.gmra.mrb[28].mxu1 %v5288_v20  ;;  %v3386_v20 = vld [vmem:[#allocation9 + $0x838] sm:$0xff] }
 0xc74   :  { %3737 = vmatpush1.bf16.msra.mxu1 %v3351_v44  ;;  %3768 = vmatprep.mubr.bf16.mxu1 %v4812_v36  ;;  %v3393_v36 = vld [vmem:[#allocation9 + $0x870] sm:$0xff] }
 0xc75   :  { %3738 = vmatprep.subr.bf16.mxu1 %v3359_v5 }
 0xc78   :  { %3739 = vmatpush1.bf16.msra.mxu1 %v3358_v22 }
 0xc79   :  { %3740 = vmatprep.subr.bf16.mxu1 %v3366_v34 }
 0xc7c   :  { %3741 = vmatpush1.bf16.msra.mxu1 %v3365_v48 }
 0xc7d   :  { %3742 = vmatprep.subr.bf16.mxu1 %v3373_v29 }
 0xc80   :  { %3743 = vmatpush1.bf16.msra.mxu1 %v3372_v13 }
 0xc81   :  { %3744 = vmatprep.subr.bf16.mxu1 %v3380_v45 }
 0xc84   :  { %3745 = vmatpush1.bf16.msra.mxu1 %v3379_v49 }
 0xc85   :  { %3746 = vmatprep.subr.bf16.mxu1 %v3387_v53 }
 0xc88   :  { %3747 = vmatpush1.bf16.msra.mxu1 %v3386_v20 }
 0xc89   :  { %3748 = vmatprep.subr.bf16.mxu1 %v3394_v39 }
 0xc8c   :  { %3749 = vmatpush1.bf16.msra.mxu1 %v3393_v36 }
 0xc8d   :  { %3750 = vmatprep.subr.bf16.mxu1 %v3401_v56 }
 0xc90   :  { %3751 = vmatpush1.bf16.msra.mxu1 %v3400_v35 }
 0xc93   :  { %3769 = vmatmul.mubr.bf16.vlgmr.msra.gmra.mrb[28].mxu1 %v5296_v11 }
 0xcc6   :  { %v3524_v18 = vpop.f32.mrb[24].mxu1  ;;  %v3647_v37 = vpop.f32.mrb[48].mxu0 }
 0xcc7   :  { %v3897_v1 = vrot.slane %v3524_v18, 4  ;;  %v3909_v62 = vrot.slane %v3647_v37, 4  ;;  %v3526_v8 = vpop.f32.mrb[25].mxu1  ;;  %v3649_v63 = vpop.f32.mrb[49].mxu0 }
 0xcc8   :  { %v3903_v58 = vrot.slane %v3526_v8, 4  ;;  %v3915_v19 = vrot.slane %v3649_v63, 4  ;;  %v3528_v51 = vpop.f32.mrb[26].mxu1  ;;  %v3651_v9 = vpop.f32.mrb[50].mxu0 }
 0xcc9   :  { %v3898_v10 = vadd.f32 %v3897_v1, %v3524_v18  ;;  %v3910_v12 = vadd.f32 %v3909_v62, %v3647_v37  ;;  %v3529_v59 = vpop.f32.mrb[27].mxu1  ;;  %v3652_v14 = vpop.f32.mrb[51].mxu0 }
 0xcca   :  { %v3904_v7 = vadd.f32 %v3903_v58, %v3526_v8  ;;  %v3916_v4 = vadd.f32 %v3915_v19, %v3649_v63 }
 0xccb   :  { %v3899_v16 = vrot.slane %v3898_v10, 2  ;;  %v3911_v60 = vrot.slane %v3910_v12, 2 }
 0xccc   :  { %v3905_v61 = vrot.slane %v3904_v7, 2  ;;  %v3917_v11 = vrot.slane %v3916_v4, 2 }
 0xccd   :  { %v3900_v57 = vadd.f32 %v3899_v16, %v3898_v10  ;;  %v3912_v52 = vadd.f32 %v3911_v60, %v3910_v12 }
 0xcce   :  { %v3906_v0 = vadd.f32 %v3905_v61, %v3904_v7  ;;  %v3918_v24 = vadd.f32 %v3917_v11, %v3916_v4 }
 0xccf   :  { %v3901_v3 = vrot.slane %v3900_v57, 1  ;;  %v3913_v46 = vrot.slane %v3912_v52, 1 }
 0xcd0   :  { %v3907_v26 = vrot.slane %v3906_v0, 1  ;;  %v3919_v27 = vrot.slane %v3918_v24, 1 }
 0xcd1   :  { %v3902_v28 = vadd.f32 %v3901_v3, %v3900_v57  ;;  %v3914_v2 = vadd.f32 %v3913_v46, %v3912_v52  ;;  %v4011_v3 = vld [vmem:[#allocation11 + $0x3e] ss:$8 sm:$0xf0]  ;;  %v4014_v46 = vld [vmem:[#allocation11 + $0x3f] ss:$8 sm:$0xf] }
 0xcd2   :  { %v3908_v54 = vadd.f32 %v3907_v26, %v3906_v0  ;;  %v3920_v30 = vadd.f32 %v3919_v27, %v3918_v24  ;;  %v4010_v24 = vld [vmem:[#allocation11 + $0x3e] ss:$8 sm:$0xf]  ;;  %v4015_v26 = vld [vmem:[#allocation11 + $0x3f] ss:$8 sm:$0xf0] }
 0xcd3   :  { %v3939_v23 = vmul.f32 0.125, %v3902_v28  ;;  %v3941_v21 = vmul.f32 0.125, %v3914_v2  ;;  %v5329_v27 = vor.u32 %v4011_v3, %v4010_v24  ;;  %v5331_v28 = vor.u32 %v4015_v26, %v4014_v46 }
 0xcd4   :  { %v3940_v31 = vmul.f32 0.125, %v3908_v54  ;;  %v3942_v38 = vmul.f32 0.125, %v3920_v30 }
 0xcd5   :  { %v3946_v40 = vsub.f32 %v3524_v18, %v3939_v23  ;;  %v3948_v33 = vsub.f32 %v3647_v37, %v3941_v21  ;;  %v4042_v2 = vrot.slane %v5329_v27, %v5097_v47  ;;  %v4050_v30 = vrot.slane %v5329_v27, %v5115_v15 }
 0xcd6   :  { %v5321_v55 = vsub.f32 %v3526_v8, %v3940_v31  ;;  %v5323_v42 = vsub.f32 %v3649_v63, %v3942_v38  ;;  %v4085_v31 = vrot.slane %v5331_v28, %v5097_v47  ;;  %v4046_v38 = vrot.slane %v5329_v27, %v5100_v50 }
 0xcd7   :  { %v3953_v43 = vmul.f32 %v3946_v40, %v3946_v40  ;;  %v3955_v6 = vmul.f32 %v3948_v33, %v3948_v33 }
 0xcd8   :  { %v3954_v32 = vmul.f32 %v5321_v55, %v5321_v55  ;;  %v3956_v44 = vmul.f32 %v5323_v42, %v5323_v42 }
 0xcd9   :  { %v3960_v5 = vrot.slane %v3953_v43, 4  ;;  %v3972_v22 = vrot.slane %v3955_v6, 4 }
 0xcda   :  { %v3966_v34 = vrot.slane %v3954_v32, 4  ;;  %v3978_v48 = vrot.slane %v3956_v44, 4 }
 0xcdb   :  { %v3961_v29 = vadd.f32 %v3960_v5, %v3953_v43  ;;  %v3973_v13 = vadd.f32 %v3972_v22, %v3955_v6 }
 0xcdc   :  { %v3967_v45 = vadd.f32 %v3966_v34, %v3954_v32  ;;  %v3979_v49 = vadd.f32 %v3978_v48, %v3956_v44  ;;  %v4093_v32 = vrot.slane %v5331_v28, %v5115_v15  ;;  %v4054_v44 = vrot.slane %v5329_v27, %v5118_v17 }
 0xcdd   :  { %v3962_v53 = vrot.slane %v3961_v29, 2  ;;  %v3974_v20 = vrot.slane %v3973_v13, 2 }
 0xcde   :  { %v3968_v39 = vrot.slane %v3967_v45, 2  ;;  %v3980_v36 = vrot.slane %v3979_v49, 2 }
 0xcdf   :  { %v3963_v56 = vadd.f32 %v3962_v53, %v3961_v29  ;;  %v3975_v35 = vadd.f32 %v3974_v20, %v3973_v13  ;;  %v4097_v29 = vrot.slane %v5331_v28, %v5118_v17 }
 0xce0   :  { %v3969_v18 = vadd.f32 %v3968_v39, %v3967_v45  ;;  %v3981_v37 = vadd.f32 %v3980_v36, %v3979_v49 }
 0xce1   :  { %v3964_v1 = vrot.slane %v3963_v56, 1  ;;  %v3976_v62 = vrot.slane %v3975_v35, 1 }
 0xce2   :  { %v3970_v8 = vrot.slane %v3969_v18, 1  ;;  %v3982_v63 = vrot.slane %v3981_v37, 1 }
 0xce3   :  { %v3965_v58 = vadd.f32 %v3964_v1, %v3963_v56  ;;  %v3977_v19 = vadd.f32 %v3976_v62, %v3975_v35 }
 0xce4   :  { %v3971_v51 = vadd.f32 %v3970_v8, %v3969_v18  ;;  %v3983_v9 = vadd.f32 %v3982_v63, %v3981_v37 }
 0xce5   :  { %v4002_v10 = vmul.f32 0.125, %v3965_v58  ;;  %v4004_v12 = vmul.f32 0.125, %v3977_v19 }
 0xce6   :  { %v4003_v59 = vmul.f32 0.125, %v3971_v51  ;;  %v4005_v14 = vmul.f32 0.125, %v3983_v9  ;;  %v4425_v7 = vpop.f32.mrb[52].mxu0 }
 0xce7   :  { %v4017_v4 = vadd.f32 1e-05, %v4002_v10  ;;  %v4019_v16 = vadd.f32 1e-05, %v4004_v12  ;;  %v4426_v60 = vpop.f32.mrb[53].mxu0 }
 0xce8   :  { %v4018_v61 = vadd.f32 1e-05, %v4003_v59  ;;  %v4020_v11 = vadd.f32 1e-05, %v4005_v14  ;;  %v4427_v57 = vadd.f32 %v4426_v60, %v4425_v7  ;;  %v4428_v52 = vpop.f32.mrb[54].mxu0 }
 0xce9   :  { %4648 = vrsqrt.f32 %v4017_v4  ;;  %v4429_v0 = vpop.f32.mrb[55].mxu0 }
 0xcea   :  { %4650 = vrsqrt.f32 %v4019_v16 }
 0xceb   :  { %4652 = vrsqrt.f32 %v4018_v61 }
 0xcec   :  { %4654 = vrsqrt.f32 %v4020_v11 }
 0xcf3   :  { %v4649_v54 = vpop.eup %4648 }
 0xcf4   :  { %v4651_v23 = vpop.eup %4650  ;;  %v4031_v21 = vmul.f32 %v4649_v54, %v3946_v40  ;;  %v4089_v40 = vrot.slane %v5331_v28, %v5100_v50 }
 0xcf5   :  { %v4653_v43 = vpop.eup %4652  ;;  %v4033_v6 = vmul.f32 %v4651_v23, %v3948_v33 }
 0xcf6   :  { %v4655_v5 = vpop.eup %4654  ;;  %v4074_v22 = vmul.f32 %v4042_v2, %v4031_v21  ;;  %v4032_v34 = vmul.f32 %v4653_v43, %v5321_v55 }
 0xcf7   :  { %v4076_v48 = vmul.f32 %v4050_v30, %v4033_v6  ;;  %v4034_v47 = vmul.f32 %v4655_v5, %v5323_v42  ;;  %v4065_v6 = vsub.s32 6, %v5092_v41 }
 0xcf8   :  { %v4117_v33 = vadd.f32 %v4085_v31, %v4074_v22  ;;  %v4075_v13 = vmul.f32 %v4046_v38, %v4032_v34 }
 0xcf9   :  { %v4119_v45 = vadd.f32 %v4093_v32, %v4076_v48  ;;  %v4077_v15 = vmul.f32 %v4054_v44, %v4034_v47  ;;  %v4066_v32 = vrot.slane %v5329_v27, %v4065_v6  ;;  %v4109_v22 = vrot.slane %v5331_v28, %v4065_v6 }
 0xcfa   :  { %v4260_v49 = vmul.f32 -1.442695, %v4117_v33  ;;  %v4118_v53 = vadd.f32 %v4089_v40, %v4075_v13 }
 0xcfb   :  { %v4262_v20 = vmul.f32 -1.442695, %v4119_v45  ;;  %v4120_v39 = vadd.f32 %v4097_v29, %v4077_v15 }
 0xcfc   :  { %4656 = vpow2.f32 %v4260_v49  ;;  %v4261_v36 = vmul.f32 -1.442695, %v4118_v53 }
 0xcfd   :  { %4658 = vpow2.f32 %v4262_v20  ;;  %v4263_v55 = vmul.f32 -1.442695, %v4120_v39 }
 0xcfe   :  { %4660 = vpow2.f32 %v4261_v36 }
 0xcff   :  { %4662 = vpow2.f32 %v4263_v55 }
 0xd06   :  { %v4657_v50 = vpop.eup %4656  ;;  %v4447_v56 = vpop.f32.mrb[56].mxu0 }
 0xd07   :  { %v4659_v42 = vpop.eup %4658  ;;  %v4145_v35 = vadd.f32 1.0, %v4657_v50  ;;  %v4448_v18 = vpop.f32.mrb[57].mxu0 }
 0xd08   :  { %v4661_v17 = vpop.eup %4660  ;;  %v4147_v37 = vadd.f32 1.0, %v4659_v42  ;;  %v4449_v1 = vadd.f32 %v4448_v18, %v4447_v56  ;;  %v4450_v62 = vpop.f32.mrb[58].mxu0 }
 0xd09   :  { %v4663_v8 = vpop.eup %4662  ;;  %4664 = vrcp.f32 %v4145_v35  ;;  %v4146_v63 = vadd.f32 1.0, %v4661_v17  ;;  %v4451_v58 = vpop.f32.mrb[59].mxu0 }
 0xd0a   :  { %4666 = vrcp.f32 %v4147_v37  ;;  %v4148_v19 = vadd.f32 1.0, %v4663_v8  ;;  %v3852_v51 = vadd.f32 %v4449_v1, %v4427_v57 }
 0xd0b   :  { %4668 = vrcp.f32 %v4146_v63 }
 0xd0c   :  { %4670 = vrcp.f32 %v4148_v19 }
 0xd13   :  { %v4665_v9 = vpop.eup %4664 }
 0xd14   :  { %v4667_v10 = vpop.eup %4666  ;;  %4166 = vst [vmem:[#allocation14] sm:$0xff] %v4665_v9 }
 0xd15   :  { %v4669_v12 = vpop.eup %4668  ;;  %4168 = vst [vmem:[#allocation14 + $0x10] sm:$0xff] %v4667_v10 }
 0xd16   :  { %v4671_v59 = vpop.eup %4670  ;;  %4167 = vst [vmem:[#allocation14 + $0x8] sm:$0xff] %v4669_v12 }
 0xd17   :  { %4169 = vst [vmem:[#allocation14 + $0x18] sm:$0xff] %v4671_v59 }
 0xd26   :  { %v3891_v14 = vpop.f32.mrb[60].mxu0 }
 0xd27   :  { %v3892_v7 = vadd.f32 %v3891_v14, %v3852_v51  ;;  %v4486_v4 = vpop.f32.mrb[61].mxu0 }
 0xd28   :  { %v3894_v16 = vpop.f32.mrb[62].mxu0 }
 0xd29   :  { %v3933_v60 = vrot.slane %v3892_v7, 4  ;;  %v4487_v61 = vpop.f32.mrb[63].mxu0 }
 0xd2b   :  { %v3934_v11 = vadd.f32 %v3933_v60, %v3892_v7 }
 0xd2d   :  { %v3935_v52 = vrot.slane %v3934_v11, 2 }
 0xd2f   :  { %v3936_v0 = vadd.f32 %v3935_v52, %v3934_v11 }
 0xd31   :  { %v3937_v57 = vrot.slane %v3936_v0, 1 }
 0xd33   :  { %v3938_v24 = vadd.f32 %v3937_v57, %v3936_v0 }
 0xd35   :  { %v3945_v3 = vmul.f32 0.125, %v3938_v24 }
 0xd37   :  { %v3952_v46 = vsub.f32 %v3892_v7, %v3945_v3  ;;  %v4061_v3 = vsub.s32 5, %v5092_v41 }
 0xd39   :  { %v3959_v26 = vmul.f32 %v3952_v46, %v3952_v46 }
 0xd3b   :  { %v3996_v2 = vrot.slane %v3959_v26, 4 }
 0xd3d   :  { %v3997_v54 = vadd.f32 %v3996_v2, %v3959_v26  ;;  %v4062_v2 = vrot.slane %v5329_v27, %v4061_v3 }
 0xd3f   :  { %v3998_v30 = vrot.slane %v3997_v54, 2 }
 0xd41   :  { %v3999_v23 = vadd.f32 %v3998_v30, %v3997_v54 }
 0xd43   :  { %v4000_v21 = vrot.slane %v3999_v23, 1 }
 0xd45   :  { %v4001_v31 = vadd.f32 %v4000_v21, %v3999_v23  ;;  %v4101_v23 = vrot.slane %v5331_v28, %v5137_v25 }
 0xd47   :  { %v4008_v38 = vmul.f32 0.125, %v4001_v31  ;;  %v4105_v31 = vrot.slane %v5331_v28, %v4061_v3 }
 0xd49   :  { %v4023_v43 = vadd.f32 1e-05, %v4008_v38 }
 0xd4b   :  { %4672 = vrsqrt.f32 %v4023_v43 }
 0xd55   :  { %v4673_v44 = vpop.eup %4672 }
 0xd56   :  { %v4037_v5 = vmul.f32 %v4673_v44, %v3952_v46  ;;  %v4058_v46 = vrot.slane %v5329_v27, %v5137_v25 }
 0xd58   :  { %v4080_v34 = vmul.f32 %v4066_v32, %v4037_v5 }
 0xd5a   :  { %v4123_v40 = vadd.f32 %v4109_v22, %v4080_v34 }
 0xd5c   :  { %v4266_v48 = vmul.f32 -1.442695, %v4123_v40 }
 0xd5e   :  { %4674 = vpow2.f32 %v4266_v48 }
 0xd66   :  { %v3770_v47 = vpop.f32.mrb[28].mxu1 }
 0xd67   :  { %v3921_v29 = vrot.slane %v3770_v47, 4  ;;  %v3772_v33 = vpop.f32.mrb[29].mxu1 }
 0xd68   :  { %v4675_v13 = vpop.eup %4674  ;;  %v3927_v45 = vrot.slane %v3772_v33, 4  ;;  %v3774_v15 = vpop.f32.mrb[30].mxu1 }
 0xd69   :  { %v4151_v49 = vadd.f32 1.0, %v4675_v13  ;;  %v3922_v53 = vadd.f32 %v3921_v29, %v3770_v47  ;;  %v3775_v20 = vpop.f32.mrb[31].mxu1 }
 0xd6a   :  { %v3928_v39 = vadd.f32 %v3927_v45, %v3772_v33 }
 0xd6b   :  { %4676 = vrcp.f32 %v4151_v49  ;;  %v3923_v36 = vrot.slane %v3922_v53, 2 }
 0xd6c   :  { %v3929_v55 = vrot.slane %v3928_v39, 2 }
 0xd6d   :  { %v3924_v50 = vadd.f32 %v3923_v36, %v3922_v53 }
 0xd6e   :  { %v3930_v56 = vadd.f32 %v3929_v55, %v3928_v39 }
 0xd6f   :  { %v3925_v42 = vrot.slane %v3924_v50, 1 }
 0xd70   :  { %v3931_v35 = vrot.slane %v3930_v56, 1 }
 0xd71   :  { %v3926_v18 = vadd.f32 %v3925_v42, %v3924_v50 }
 0xd72   :  { %v3932_v17 = vadd.f32 %v3931_v35, %v3930_v56 }
 0xd73   :  { %v3943_v37 = vmul.f32 0.125, %v3926_v18 }
 0xd74   :  { %v3944_v1 = vmul.f32 0.125, %v3932_v17 }
 0xd75   :  { %v4677_v62 = vpop.eup %4676  ;;  %v3950_v8 = vsub.f32 %v3770_v47, %v3943_v37 }
 0xd76   :  { %4172 = vst [vmem:[#allocation14 + $0x30] sm:$0xff] %v4677_v62  ;;  %v3951_v63 = vsub.f32 %v3772_v33, %v3944_v1 }
 0xd77   :  { %v3957_v58 = vmul.f32 %v3950_v8, %v3950_v8 }
 0xd78   :  { %v3958_v19 = vmul.f32 %v3951_v63, %v3951_v63 }
 0xd79   :  { %v3984_v51 = vrot.slane %v3957_v58, 4 }
 0xd7a   :  { %v3990_v9 = vrot.slane %v3958_v19, 4 }
 0xd7b   :  { %v3985_v10 = vadd.f32 %v3984_v51, %v3957_v58 }
 0xd7c   :  { %v3991_v12 = vadd.f32 %v3990_v9, %v3958_v19 }
 0xd7d   :  { %v3986_v59 = vrot.slane %v3985_v10, 2 }
 0xd7e   :  { %v3992_v14 = vrot.slane %v3991_v12, 2 }
 0xd7f   :  { %v3987_v7 = vadd.f32 %v3986_v59, %v3985_v10 }
 0xd80   :  { %v3993_v4 = vadd.f32 %v3992_v14, %v3991_v12 }
 0xd81   :  { %v3988_v16 = vrot.slane %v3987_v7, 1 }
 0xd82   :  { %v3994_v60 = vrot.slane %v3993_v4, 1 }
 0xd83   :  { %v3989_v61 = vadd.f32 %v3988_v16, %v3987_v7 }
 0xd84   :  { %v3995_v11 = vadd.f32 %v3994_v60, %v3993_v4 }
 0xd85   :  { %v4006_v52 = vmul.f32 0.125, %v3989_v61 }
 0xd86   :  { %v4007_v0 = vmul.f32 0.125, %v3995_v11 }
 0xd87   :  { %v4021_v57 = vadd.f32 1e-05, %v4006_v52 }
 0xd88   :  { %v4022_v24 = vadd.f32 1e-05, %v4007_v0 }
 0xd89   :  { %4678 = vrsqrt.f32 %v4021_v57 }
 0xd8a   :  { %4680 = vrsqrt.f32 %v4022_v24 }
 0xd93   :  { %v4679_v26 = vpop.eup %4678 }
 0xd94   :  { %v4681_v54 = vpop.eup %4680  ;;  %v4035_v30 = vmul.f32 %v4679_v26, %v3950_v8 }
 0xd95   :  { %v4036_v21 = vmul.f32 %v4681_v54, %v3951_v63 }
 0xd96   :  { %v4078_v38 = vmul.f32 %v4058_v46, %v4035_v30 }
 0xd97   :  { %v4079_v43 = vmul.f32 %v4062_v2, %v4036_v21 }
 0xd98   :  { %v4121_v6 = vadd.f32 %v4101_v23, %v4078_v38 }
 0xd99   :  { %v4122_v32 = vadd.f32 %v4105_v31, %v4079_v43 }
 0xd9a   :  { %v4264_v44 = vmul.f32 -1.442695, %v4121_v6 }
 0xd9b   :  { %v4265_v41 = vmul.f32 -1.442695, %v4122_v32 }
 0xd9c   :  { %4682 = vpow2.f32 %v4264_v44 }
 0xd9d   :  { %4684 = vpow2.f32 %v4265_v41 }
 0xda6   :  { %v4683_v5 = vpop.eup %4682 }
 0xda7   :  { %v4685_v22 = vpop.eup %4684  ;;  %v4149_v34 = vadd.f32 1.0, %v4683_v5 }
 0xda8   :  { %v4150_v27 = vadd.f32 1.0, %v4685_v22 }
 0xda9   :  { %4686 = vrcp.f32 %v4149_v34 }
 0xdaa   :  { %4688 = vrcp.f32 %v4150_v27 }
 0xdb3   :  { %v4687_v25 = vpop.eup %4686 }
 0xdb4   :  { %v4689_v40 = vpop.eup %4688  ;;  %4170 = vst [vmem:[#allocation14 + $0x20] sm:$0xff] %v4687_v25 }
 0xdb5   :  { %4171 = vst [vmem:[#allocation14 + $0x28] sm:$0xff] %v4689_v40 }
 0xdb6   :  { %4745 = shalt.err (!%p4742_p6)
}
 0xdb7   :  { %s4746_s26 = scalar_lea.hbm %s5383_s10, 896 }
 0xdb8   :  { %p4747_p7 = scmp.ne.s32.totalorder %s5383_s10, %s4746_s26  ;;  %p4750_p8 = scmp.lt.u32.totalorder %s4746_s26, %s5383_s10 }
 0xdba   :  { %p4752_p9 = pnand %p4750_p8, %p4747_p7 }
 0xdbc   :  { %4755 = shalt.err (!%p4752_p9)
}
 0xdbd   :  { %4182 = dma.vmem_to_hbm [thread:$0]  %s4180_s25, 896, %s5383_s10, [#allocation13]  }
 0xdbe   :  { %4774 = dma.done.wait [#allocation13], 896  }
 0xdbf   :  { %4775 = vsyncadd [#allocation13], 4294966400 }
 0xdc0   :  { %4186 = vsyncpa [#allocation12], 1 }
 0xdc1   :  { %4187 = vsyncpa [#allocation13], 1 }
 0xdc2   :  { %4188 = vsyncmov [#allocation10] }
 0xdc5   :  { %s4189_s8 = vpop.sfrf %4188 }
 0xdc6   :  { %p4267_p10 = scmp.ne.s32.totalorder %s4189_s8, 0 }
 0xdc8   :  { %4193 = shalt.err (%p4267_p10)  }
 0xdc9   :  { %4195 = vsyncmov [#allocation10 + $0x1] }
 0xdcc   :  { %s4196_s24 = vpop.sfrf %4195 }
 0xdcd   :  { %p4268_p11 = scmp.ne.s32.totalorder %s4196_s24, 0 }
 0xdcf   :  { %4200 = shalt.err (%p4268_p11)  }
 0xdd0   :  { %4202 = vsyncmov [#allocation10 + $0x2] }
 0xdd3   :  { %s4203_s23 = vpop.sfrf %4202 }
 0xdd4   :  { %p4269_p12 = scmp.ne.s32.totalorder %s4203_s23, 0 }
 0xdd6   :  { %4207 = shalt.err (%p4269_p12)  }
 0xdd7   :  { %4209 = vsyncmov [#allocation10 + $0x3] }
 0xdda   :  { %s4210_s2 = vpop.sfrf %4209 }
 0xddb   :  { %p4270_p13 = scmp.ne.s32.totalorder %s4210_s2, 0 }
 0xddd   :  { %4214 = shalt.err (%p4270_p13)  }
 0xdde   :  { %4216 = vsyncmov [#allocation10 + $0x4] }
 0xde1   :  { %s4217_s10 = vpop.sfrf %4216 }
 0xde2   :  { %p4271_p0 = scmp.ne.s32.totalorder %s4217_s10, 0 }
 0xde4   :  { %4221 = shalt.err (%p4271_p0)  }
 0xde5   :  { %4223 = vsyncmov [#allocation10 + $0x5] }
 0xde8   :  { %s4224_s4 = vpop.sfrf %4223 }
 0xde9   :  { %p4272_p1 = scmp.ne.s32.totalorder %s4224_s4, 0 }
 0xdeb   :  { %4228 = shalt.err (%p4272_p1)  }
 0xdec   :  { %4230 = vsyncmov [#allocation10 + $0x6] }
 0xdef   :  { %s4231_s1 = vpop.sfrf %4230 }
 0xdf0   :  { %p4273_p2 = scmp.ne.s32.totalorder %s4231_s1, 0 }
 0xdf2   :  { %4235 = shalt.err (%p4273_p2)  }
 0xdf3   :  { %4237 = vsyncmov [#allocation10 + $0x7] }
 0xdf6   :  { %s4238_s11 = vpop.sfrf %4237 }
 0xdf7   :  { %p4274_p3 = scmp.ne.s32.totalorder %s4238_s11, 0 }
 0xdf9   :  { %4242 = shalt.err (%p4274_p3)  }

</bundles_post_ra>
